<compile_context>
chip_gen: v7x
topology: tpu7x:2x2x1
jax: 0.10.0
libtpu: 0.0.40
codegen_flags: <defaults>
</compile_context>

<pallas_src>
import math
import functools

import jax
import jax.numpy as jnp
from jax.experimental import pallas as pl
from jax.experimental.pallas import tpu as pltpu


def transformer_layer_kernel(
    x_kv_ref, x_q_ref, amask_ref,
    wq_ref, bq_ref, wk_ref, bk_ref, wv_ref, bv_ref, wo_ref, bo_ref,
    gamma_ref, beta_ref, w1_ref, b1_ref, w2_ref, b2_ref,
    out_ref, *, heads):
    """One grid step == one tile of bt batch elements (all resident in VMEM)."""
    bt, seq, d_model = x_q_ref.shape
    rows = bt * seq
    dh = d_model // heads

    # Activations as a dense (bt*S, D) row slab; bf16 inputs for the MXU.
    xq_f32 = x_q_ref[...].reshape(rows, d_model)              # residual (f32)
    xq = xq_f32.astype(jnp.bfloat16)
    xkv = x_kv_ref[...].reshape(rows, d_model).astype(jnp.bfloat16)
    amask = amask_ref[...].astype(jnp.float32)                # (1|bt, S, S) additive

    # Per-head projections from per-head weight slabs (leading-dim ref index,
    # no lane slicing of activations) + accumulation through Wo.
    attn_out = jnp.zeros((rows, d_model), jnp.float32)
    for h in range(heads):                                    # static unroll
        qh = (jnp.dot(xq, wq_ref[h], preferred_element_type=jnp.float32)
              + bq_ref[h]).astype(jnp.bfloat16).reshape(bt, seq, dh)
        kh = (jnp.dot(xkv, wk_ref[h], preferred_element_type=jnp.float32)
              + bk_ref[h]).astype(jnp.bfloat16).reshape(bt, seq, dh)
        vh = (jnp.dot(xkv, wv_ref[h], preferred_element_type=jnp.float32)
              + bv_ref[h]).astype(jnp.bfloat16).reshape(bt, seq, dh)

        # bt-batched q @ k^T; contraction handles K without an explicit .T
        s = jnp.einsum("bqd,bkd->bqk", qh, kh,
                       preferred_element_type=jnp.float32)    # (bt, S, S) f32
        s = s + amask                                         # masked_fill via add
        s = s - jnp.max(s, axis=-1, keepdims=True)
        p = jnp.exp(s)
        inv = pl.reciprocal(jnp.sum(p, axis=-1, keepdims=True), approx=True)
        attn = (p * inv).astype(jnp.bfloat16)
        ctx = jnp.einsum("bqk,bkd->bqd", attn, vh,
                         preferred_element_type=jnp.float32)  # (bt, S, dh)
        # context @ Wo, head slice accumulated in f32 (no lane-dim concat).
        attn_out = attn_out + jnp.dot(
            ctx.reshape(rows, dh).astype(jnp.bfloat16), wo_ref[h],
            preferred_element_type=jnp.float32)

    out1 = attn_out + bo_ref[...] + xq_f32    # dropout(context) + item_embeds (eval)

    # PositionwiseFeedForward: LayerNorm(eps=1e-6) -> W1 -> ReLU -> W2 -> + residual.
    mean = jnp.mean(out1, axis=-1, keepdims=True)
    centered = out1 - mean
    var = jnp.mean(centered * centered, axis=-1, keepdims=True)
    ln = centered * jax.lax.rsqrt(var + 1e-6) * gamma_ref[...] + beta_ref[...]
    inter = jnp.maximum(
        jnp.dot(ln.astype(jnp.bfloat16), w1_ref[...],
                preferred_element_type=jnp.float32) + b1_ref[...], 0.0)
    ff = jnp.dot(inter.astype(jnp.bfloat16), w2_ref[...],
                 preferred_element_type=jnp.float32) + b2_ref[...]
    out_ref[...] = (ff + out1).reshape(bt, seq, d_model).astype(out_ref.dtype)


def prepare_params(params, heads):
    """Fold 1/sqrt(dh) into Wq/bq, split QKV/Wo per head, cast weights bf16."""
    d_model = params["wq"].shape[0]
    dh = d_model // heads
    scale = 1.0 / math.sqrt(dh)
    bf16, f32 = jnp.bfloat16, jnp.float32

    def split_cols(w, scl=1.0):     # (D, H*dh) -> (H, D, dh)
        return (w * scl).astype(bf16).reshape(d_model, heads, dh).transpose(1, 0, 2)

    def split_bias(b, scl=1.0):     # (1, H*dh) -> (H, 1, dh)
        return (b * scl).astype(f32).reshape(heads, 1, dh)

    return {
        "wq": split_cols(params["wq"], scale), "bq": split_bias(params["bq"], scale),
        "wk": split_cols(params["wk"]),        "bk": split_bias(params["bk"]),
        "wv": split_cols(params["wv"]),        "bv": split_bias(params["bv"]),
        "wo": params["wo"].astype(bf16).reshape(heads, dh, d_model),
        "bo": params["bo"].astype(f32),
        "gamma": params["gamma"].astype(f32), "beta": params["beta"].astype(f32),
        "w1": params["w1"].astype(bf16), "b1": params["b1"].astype(f32),
        "w2": params["w2"].astype(bf16), "b2": params["b2"].astype(f32),
    }


def _choose_batch_tile(batch, seq, d_model, d_ff, heads, weight_bytes,
                       vmem_budget, shared_mask):
    """Largest divisor of `batch` whose per-step working set fits the budget;
    prefer an even grid length (v7x megacore) when it costs < 2x tile size."""
    dh = d_model // heads

    def fits(bt):
        rows = bt * seq
        io = 2 * 2 * rows * d_model * 4                       # two f32 inputs, dbl-buf
        io += 2 * rows * d_model * 4                          # output block, dbl-buf
        io += 2 * (1 if shared_mask else bt) * seq * seq * 2  # bf16 additive mask
        interm = 4 * rows * d_model * 4                       # residual/acc/out1/ln f32
        interm += rows * d_ff * 4                             # FFN intermediate
        interm += 2 * bt * seq * seq * 4                      # live score + prob slabs
        interm += 3 * rows * dh * 4                           # q/k/v head slabs
        return weight_bytes + io + interm <= vmem_budget

    divisors = [d for d in range(1, batch + 1) if batch % d == 0]
    fitting = [d for d in divisors if fits(d)] or [1]
    bt = max(fitting)
    steps = batch // bt
    if steps > 1 and steps % 2 == 1:
        even = [d for d in fitting if (batch // d) % 2 == 0]
        if even and 2 * max(even) >= bt:
            bt = max(even)
    return bt


def transformer_encoder_layer(interaction_embeds, item_embeds, mask_bool,
                              params, heads, out_dtype=jnp.float32):
    """Eval-mode forward of TransformerEncoderLayer.

    interaction_embeds: (B, S, D)  -> key/value input
    item_embeds:        (B, S, D)  -> query input (+ residual)
    mask_bool:          (S, S) shared or (B, S, S) per-batch; True = blocked.
    params: PyTorch-style weights, pre-transposed to (in_features, out_features).
    """
    B, S, D = item_embeds.shape
    F = params["w1"].shape[1]
    dh = D // heads
    kp = prepare_params(params, heads)

    # Additive mask computed once outside the hot loop, stored bf16 (add
    # instead of compare+select inside the kernel; scores stay f32).
    shared_mask = (mask_bool.ndim == 2)
    if shared_mask:
        add_mask = jnp.where(mask_bool, -1e18, 0.0).astype(jnp.bfloat16)[None]
    else:
        add_mask = jnp.where(mask_bool, -1e18, 0.0).astype(jnp.bfloat16)

    # VMEM capacity -> scoped limit (leave headroom) and byte-budgeted tiling.
    try:
        vmem_cap = int(pltpu.get_tpu_info().vmem_capacity_bytes)
    except Exception:
        vmem_cap = 64 * 1024 * 1024
    vmem_limit = min(int(vmem_cap * 3 // 4), 96 * 1024 * 1024)

    weight_bytes = 2 * sum(int(a.size) * a.dtype.itemsize for a in kp.values())
    bt = _choose_batch_tile(B, S, D, F, heads, weight_bytes,
                            int(vmem_limit * 0.8), shared_mask)
    grid = (B // bt,)

    data_spec = pl.BlockSpec((bt, S, D), lambda b: (b, 0, 0))

    cost = pl.CostEstimate(
        flops=int(8 * B * S * D * D + 4 * B * S * D * F + 4 * B * S * S * D),
        transcendentals=int(heads * B * S * S + 2 * B * S),
        bytes_accessed=int(3 * B * S * D * 4 + add_mask.size * 2 + weight_bytes // 2),
    )

    kernel = functools.partial(transformer_layer_kernel, heads=heads)

    def build(weight_mode):
        def wspec(shape):
            n = len(shape)
            if weight_mode is None:
                return pl.BlockSpec(shape, lambda b, _n=n: (0,) * _n)
            return pl.BlockSpec(shape, lambda b, _n=n: (0,) * _n,
                                pipeline_mode=weight_mode)

        if shared_mask:
            mask_spec = wspec((1, S, S))            # constant index map, DMA'd once
        else:
            mask_spec = pl.BlockSpec((bt, S, S), lambda b: (b, 0, 0))

        in_specs = [
            data_spec, data_spec, mask_spec,
            wspec((heads, D, dh)), wspec((heads, 1, dh)),   # Wq*scale, bq*scale
            wspec((heads, D, dh)), wspec((heads, 1, dh)),   # Wk, bk
            wspec((heads, D, dh)), wspec((heads, 1, dh)),   # Wv, bv
            wspec((heads, dh, D)), wspec((1, D)),           # Wo (per head), bo
            wspec((1, D)), wspec((1, D)),                   # gamma, beta (FFN LN)
            wspec((D, F)), wspec((1, F)),                   # W1, b1
            wspec((F, D)), wspec((1, D)),                   # W2, b2
        ]
        return pl.pallas_call(
            kernel,
            out_shape=jax.ShapeDtypeStruct((B, S, D), out_dtype),
            grid_spec=pltpu.PrefetchScalarGridSpec(
                num_scalar_prefetch=0,
                grid=grid,
                in_specs=in_specs,
                out_specs=data_spec,
            ),
            compiler_params=pltpu.CompilerParams(
                dimension_semantics=("parallel",),
                vmem_limit_bytes=vmem_limit,
            ),
            cost_estimate=cost,
        )

    args = (interaction_embeds, item_embeds, add_mask,
            kp["wq"], kp["bq"], kp["wk"], kp["bk"], kp["wv"], kp["bv"],
            kp["wo"], kp["bo"], kp["gamma"], kp["beta"],
            kp["w1"], kp["b1"], kp["w2"], kp["b2"])

    try:
        # Weights/biases have constant index maps -> single-buffer them so only
        # one VMEM copy is resident (key on v7x's 64 MiB per-TC VMEM).
        return jax.block_until_ready(build(pl.Buffered(buffer_count=1))(*args))
    except Exception:
        # Fallback if this jax build rejects pipeline_mode / Buffered(1).
        return jax.block_until_ready(build(None)(*args))


def reference_jax(interaction_embeds, item_embeds, mask_bool, params, heads):
    """Pure-JAX reference mirroring the PyTorch forward (eval mode) with the
    same bf16-input / f32-accumulate matmul policy as the kernel."""
    B, S, D = item_embeds.shape
    dh = D // heads
    bf16 = jnp.bfloat16

    def mm(a, w):
        return jnp.dot(a.astype(bf16), w.astype(bf16),
                       preferred_element_type=jnp.float32)

    scale = 1.0 / math.sqrt(dh)
    q = mm(item_embeds, params["wq"] * scale) + params["bq"][0] * scale
    k = mm(interaction_embeds, params["wk"]) + params["bk"][0]
    v = mm(interaction_embeds, params["wv"]) + params["bv"][0]

    def split(x):  # (B,S,D) -> (B,H,S,dh)
        return x.reshape(B, S, heads, dh).transpose(0, 2, 1, 3)

    qh, kh, vh = (split(q).astype(bf16), split(k).astype(bf16),
                  split(v).astype(bf16))
    scores = jnp.einsum("bhqd,bhkd->bhqk", qh, kh,
                        preferred_element_type=jnp.float32)
    scores = jnp.where(mask_bool[:, None, :, :], -1e18, scores)
    attn = jax.nn.softmax(scores, axis=-1)
    ctx = jnp.einsum("bhqk,bhkd->bhqd", attn.astype(bf16), vh,
                     preferred_element_type=jnp.float32)
    ctx = ctx.transpose(0, 2, 1, 3).reshape(B, S, D)
    out1 = mm(ctx, params["wo"]) + params["bo"][0] + item_embeds
    mean = out1.mean(-1, keepdims=True)
    var = ((out1 - mean) ** 2).mean(-1, keepdims=True)
    ln = (out1 - mean) / jnp.sqrt(var + 1e-6) * params["gamma"][0] + params["beta"][0]
    inter = jnp.maximum(mm(ln, params["w1"]) + params["b1"][0], 0.0)
    ff = mm(inter, params["w2"]) + params["b2"][0]
    return ff + out1


if __name__ == "__main__":
    B, S, D, H, F = 2, 8, 32, 4, 64
    key = jax.random.PRNGKey(0)
    ks = jax.random.split(key, 16)

    def w(k, shape, scale):
        return (scale * jax.random.normal(k, shape)).astype(jnp.float32)

    params = {
        "wq": w(ks[0], (D, D), 1 / math.sqrt(D)), "bq": w(ks[1], (1, D), 0.02),
        "wk": w(ks[2], (D, D), 1 / math.sqrt(D)), "bk": w(ks[3], (1, D), 0.02),
        "wv": w(ks[4], (D, D), 1 / math.sqrt(D)), "bv": w(ks[5], (1, D), 0.02),
        "wo": w(ks[6], (D, D), 1 / math.sqrt(D)), "bo": w(ks[7], (1, D), 0.02),
        "gamma": jnp.ones((1, D), jnp.float32),
        "beta": jnp.zeros((1, D), jnp.float32),
        "w1": w(ks[8], (D, F), 1 / math.sqrt(D)), "b1": w(ks[9], (1, F), 0.02),
        "w2": w(ks[10], (F, D), 1 / math.sqrt(F)), "b2": w(ks[11], (1, D), 0.02),
    }

    interaction_embeds = w(ks[12], (B, S, D), 1.0)
    item_embeds = w(ks[13], (B, S, D), 1.0)

    # Shared causal mask (S, S): True = blocked (future positions).
    causal = jnp.triu(jnp.ones((S, S), jnp.float32), k=1) > 0

    out = transformer_encoder_layer(interaction_embeds, item_embeds, causal,
                                    params, heads=H)
    out = jax.block_until_ready(out)

    mask3 = jnp.broadcast_to(causal, (B, S, S))
    ref = reference_jax(interaction_embeds, item_embeds, mask3, params, H)
    assert out.shape == (B, S, D)
    assert jnp.allclose(out, ref, rtol=1e-2, atol=1e-2), "mismatch vs reference"

    print("KERNEL_OK")
</pallas_src>

<mosaic_0001>
module attributes {stable_mosaic.version = 11 : i64} {
  func.func @transformer_layer_kernel(%arg0: i32, %arg1: memref<2x8x32xf32, #tpu.memory_space<vmem>>, %arg2: memref<2x8x32xf32, #tpu.memory_space<vmem>>, %arg3: memref<1x8x8xbf16, #tpu.memory_space<vmem>>, %arg4: memref<4x32x8xbf16, #tpu.memory_space<vmem>>, %arg5: memref<4x1x8xf32, #tpu.memory_space<vmem>>, %arg6: memref<4x32x8xbf16, #tpu.memory_space<vmem>>, %arg7: memref<4x1x8xf32, #tpu.memory_space<vmem>>, %arg8: memref<4x32x8xbf16, #tpu.memory_space<vmem>>, %arg9: memref<4x1x8xf32, #tpu.memory_space<vmem>>, %arg10: memref<4x8x32xbf16, #tpu.memory_space<vmem>>, %arg11: memref<1x32xf32, #tpu.memory_space<vmem>>, %arg12: memref<1x32xf32, #tpu.memory_space<vmem>>, %arg13: memref<1x32xf32, #tpu.memory_space<vmem>>, %arg14: memref<32x64xbf16, #tpu.memory_space<vmem>>, %arg15: memref<1x64xf32, #tpu.memory_space<vmem>>, %arg16: memref<64x32xbf16, #tpu.memory_space<vmem>>, %arg17: memref<1x32xf32, #tpu.memory_space<vmem>>, %arg18: memref<2x8x32xf32, #tpu.memory_space<vmem>>) attributes {dimension_semantics = [#tpu.dimension_semantics<parallel>], iteration_bounds = array<i64: 1>, scalar_prefetch = 0 : i64, scratch_operands = 0 : i64, tpu.core_type = #tpu.core_type<tc>, window_params = [{transform_indices = @transform_0, window_bounds = array<i64: 2, 8, 32>}, {transform_indices = @transform_1, window_bounds = array<i64: 2, 8, 32>}, {pipeline_mode = #tpu.pipeline_mode<synchronous>, transform_indices = @transform_2, window_bounds = array<i64: 1, 8, 8>}, {pipeline_mode = #tpu.pipeline_mode<synchronous>, transform_indices = @transform_3, window_bounds = array<i64: 4, 32, 8>}, {pipeline_mode = #tpu.pipeline_mode<synchronous>, transform_indices = @transform_4, window_bounds = array<i64: 4, 1, 8>}, {pipeline_mode = #tpu.pipeline_mode<synchronous>, transform_indices = @transform_5, window_bounds = array<i64: 4, 32, 8>}, {pipeline_mode = #tpu.pipeline_mode<synchronous>, transform_indices = @transform_6, window_bounds = array<i64: 4, 1, 8>}, {pipeline_mode = #tpu.pipeline_mode<synchronous>, transform_indices = @transform_7, window_bounds = array<i64: 4, 32, 8>}, {pipeline_mode = #tpu.pipeline_mode<synchronous>, transform_indices = @transform_8, window_bounds = array<i64: 4, 1, 8>}, {pipeline_mode = #tpu.pipeline_mode<synchronous>, transform_indices = @transform_9, window_bounds = array<i64: 4, 8, 32>}, {pipeline_mode = #tpu.pipeline_mode<synchronous>, transform_indices = @transform_10, window_bounds = array<i64: 1, 32>}, {pipeline_mode = #tpu.pipeline_mode<synchronous>, transform_indices = @transform_11, window_bounds = array<i64: 1, 32>}, {pipeline_mode = #tpu.pipeline_mode<synchronous>, transform_indices = @transform_12, window_bounds = array<i64: 1, 32>}, {pipeline_mode = #tpu.pipeline_mode<synchronous>, transform_indices = @transform_13, window_bounds = array<i64: 32, 64>}, {pipeline_mode = #tpu.pipeline_mode<synchronous>, transform_indices = @transform_14, window_bounds = array<i64: 1, 64>}, {pipeline_mode = #tpu.pipeline_mode<synchronous>, transform_indices = @transform_15, window_bounds = array<i64: 64, 32>}, {pipeline_mode = #tpu.pipeline_mode<synchronous>, transform_indices = @transform_16, window_bounds = array<i64: 1, 32>}, {transform_indices = @transform_17, window_bounds = array<i64: 2, 8, 32>}]} {
    %c0 = arith.constant 0 : index
    %c0_0 = arith.constant 0 : index
    %c0_1 = arith.constant 0 : index
    %0 = vector.load %arg2[%c0, %c0_0, %c0_1] : memref<2x8x32xf32, #tpu.memory_space<vmem>>, vector<2x8x32xf32>
    %1 = vector.shape_cast %0 : vector<2x8x32xf32> to vector<16x32xf32>
    %2 = arith.truncf %1 : vector<16x32xf32> to vector<16x32xbf16>
    %c0_2 = arith.constant 0 : index
    %c0_3 = arith.constant 0 : index
    %c0_4 = arith.constant 0 : index
    %3 = vector.load %arg1[%c0_2, %c0_3, %c0_4] : memref<2x8x32xf32, #tpu.memory_space<vmem>>, vector<2x8x32xf32>
    %4 = vector.shape_cast %3 : vector<2x8x32xf32> to vector<16x32xf32>
    %5 = arith.truncf %4 : vector<16x32xf32> to vector<16x32xbf16>
    %c0_5 = arith.constant 0 : index
    %c0_6 = arith.constant 0 : index
    %c0_7 = arith.constant 0 : index
    %6 = vector.load %arg3[%c0_5, %c0_6, %c0_7] : memref<1x8x8xbf16, #tpu.memory_space<vmem>>, vector<1x8x8xbf16>
    %7 = arith.extf %6 : vector<1x8x8xbf16> to vector<1x8x8xf32>
    %cst = arith.constant 0.000000e+00 : f32
    %8 = vector.broadcast %cst : f32 to vector<16x32xf32>
    %c0_8 = arith.constant 0 : index
    %c0_9 = arith.constant 0 : index
    %c0_10 = arith.constant 0 : index
    %9 = vector.load %arg4[%c0_8, %c0_9, %c0_10] : memref<4x32x8xbf16, #tpu.memory_space<vmem>>, vector<1x32x8xbf16>
    %10 = vector.shape_cast %9 : vector<1x32x8xbf16> to vector<32x8xbf16>
    %cst_11 = arith.constant dense<0.000000e+00> : vector<16x8xf32>
    %11 = tpu.matmul %2, %10, %cst_11 {dimension_numbers = #tpu.dot_dimension_numbers<[1], [0], [0], [1], [0, 0, 1, 1], [], []>} : vector<16x32xbf16>, vector<32x8xbf16>, vector<16x8xf32> -> vector<16x8xf32>
    %c0_12 = arith.constant 0 : index
    %c0_13 = arith.constant 0 : index
    %c0_14 = arith.constant 0 : index
    %12 = vector.load %arg5[%c0_12, %c0_13, %c0_14] : memref<4x1x8xf32, #tpu.memory_space<vmem>>, vector<1x1x8xf32>
    %13 = vector.shape_cast %12 : vector<1x1x8xf32> to vector<1x8xf32>
    %14 = vector.broadcast %13 : vector<1x8xf32> to vector<16x8xf32>
    %15 = arith.addf %11, %14 : vector<16x8xf32>
    %16 = arith.truncf %15 : vector<16x8xf32> to vector<16x8xbf16>
    %17 = vector.shape_cast %16 : vector<16x8xbf16> to vector<2x8x8xbf16>
    %c0_15 = arith.constant 0 : index
    %c0_16 = arith.constant 0 : index
    %c0_17 = arith.constant 0 : index
    %18 = vector.load %arg6[%c0_15, %c0_16, %c0_17] : memref<4x32x8xbf16, #tpu.memory_space<vmem>>, vector<1x32x8xbf16>
    %19 = vector.shape_cast %18 : vector<1x32x8xbf16> to vector<32x8xbf16>
    %cst_18 = arith.constant dense<0.000000e+00> : vector<16x8xf32>
    %20 = tpu.matmul %5, %19, %cst_18 {dimension_numbers = #tpu.dot_dimension_numbers<[1], [0], [0], [1], [0, 0, 1, 1], [], []>} : vector<16x32xbf16>, vector<32x8xbf16>, vector<16x8xf32> -> vector<16x8xf32>
    %c0_19 = arith.constant 0 : index
    %c0_20 = arith.constant 0 : index
    %c0_21 = arith.constant 0 : index
    %21 = vector.load %arg7[%c0_19, %c0_20, %c0_21] : memref<4x1x8xf32, #tpu.memory_space<vmem>>, vector<1x1x8xf32>
    %22 = vector.shape_cast %21 : vector<1x1x8xf32> to vector<1x8xf32>
    %23 = vector.broadcast %22 : vector<1x8xf32> to vector<16x8xf32>
    %24 = arith.addf %20, %23 : vector<16x8xf32>
    %25 = arith.truncf %24 : vector<16x8xf32> to vector<16x8xbf16>
    %26 = vector.shape_cast %25 : vector<16x8xbf16> to vector<2x8x8xbf16>
    %c0_22 = arith.constant 0 : index
    %c0_23 = arith.constant 0 : index
    %c0_24 = arith.constant 0 : index
    %27 = vector.load %arg8[%c0_22, %c0_23, %c0_24] : memref<4x32x8xbf16, #tpu.memory_space<vmem>>, vector<1x32x8xbf16>
    %28 = vector.shape_cast %27 : vector<1x32x8xbf16> to vector<32x8xbf16>
    %cst_25 = arith.constant dense<0.000000e+00> : vector<16x8xf32>
    %29 = tpu.matmul %5, %28, %cst_25 {dimension_numbers = #tpu.dot_dimension_numbers<[1], [0], [0], [1], [0, 0, 1, 1], [], []>} : vector<16x32xbf16>, vector<32x8xbf16>, vector<16x8xf32> -> vector<16x8xf32>
    %c0_26 = arith.constant 0 : index
    %c0_27 = arith.constant 0 : index
    %c0_28 = arith.constant 0 : index
    %30 = vector.load %arg9[%c0_26, %c0_27, %c0_28] : memref<4x1x8xf32, #tpu.memory_space<vmem>>, vector<1x1x8xf32>
    %31 = vector.shape_cast %30 : vector<1x1x8xf32> to vector<1x8xf32>
    %32 = vector.broadcast %31 : vector<1x8xf32> to vector<16x8xf32>
    %33 = arith.addf %29, %32 : vector<16x8xf32>
    %34 = arith.truncf %33 : vector<16x8xf32> to vector<16x8xbf16>
    %35 = vector.shape_cast %34 : vector<16x8xbf16> to vector<2x8x8xbf16>
    "tpu.trace_start"() <{level = 10 : i32, message = "bqd,bkd->bqk"}> : () -> ()
    %cst_29 = arith.constant dense<0.000000e+00> : vector<2x8x8xf32>
    %36 = tpu.matmul %17, %26, %cst_29 {dimension_numbers = #tpu.dot_dimension_numbers<[2], [2], [1], [1], [0, 0, 0, 1, 1, 1], [0], [0]>} : vector<2x8x8xbf16>, vector<2x8x8xbf16>, vector<2x8x8xf32> -> vector<2x8x8xf32>
    "tpu.trace_stop"() : () -> ()
    %37 = vector.broadcast %7 : vector<1x8x8xf32> to vector<2x8x8xf32>
    %38 = arith.addf %36, %37 : vector<2x8x8xf32>
    %cst_30 = arith.constant dense<0xFF800000> : vector<2x8xf32>
    %39 = vector.multi_reduction <maximumf>, %38, %cst_30 [2] : vector<2x8x8xf32> to vector<2x8xf32>
    %40 = vector.shape_cast %39 : vector<2x8xf32> to vector<2x8x1xf32>
    %41 = vector.broadcast %40 : vector<2x8x1xf32> to vector<2x8x8xf32>
    %42 = arith.subf %38, %41 : vector<2x8x8xf32>
    %43 = math.exp %42 : vector<2x8x8xf32>
    %cst_31 = arith.constant dense<0.000000e+00> : vector<2x8xf32>
    %44 = vector.multi_reduction <add>, %43, %cst_31 [2] : vector<2x8x8xf32> to vector<2x8xf32>
    %45 = vector.shape_cast %44 : vector<2x8xf32> to vector<2x8x1xf32>
    %46 = tpu.reciprocal %45 {approx = true} : vector<2x8x1xf32> -> vector<2x8x1xf32>
    %47 = vector.broadcast %46 : vector<2x8x1xf32> to vector<2x8x8xf32>
    %48 = arith.mulf %43, %47 : vector<2x8x8xf32>
    %49 = arith.truncf %48 : vector<2x8x8xf32> to vector<2x8x8xbf16>
    "tpu.trace_start"() <{level = 10 : i32, message = "bqk,bkd->bqd"}> : () -> ()
    %cst_32 = arith.constant dense<0.000000e+00> : vector<2x8x8xf32>
    %50 = tpu.matmul %49, %35, %cst_32 {dimension_numbers = #tpu.dot_dimension_numbers<[2], [1], [1], [2], [0, 0, 0, 1, 1, 2], [0], [0]>} : vector<2x8x8xbf16>, vector<2x8x8xbf16>, vector<2x8x8xf32> -> vector<2x8x8xf32>
    "tpu.trace_stop"() : () -> ()
    %51 = vector.shape_cast %50 : vector<2x8x8xf32> to vector<16x8xf32>
    %52 = arith.truncf %51 : vector<16x8xf32> to vector<16x8xbf16>
    %c0_33 = arith.constant 0 : index
    %c0_34 = arith.constant 0 : index
    %c0_35 = arith.constant 0 : index
    %53 = vector.load %arg10[%c0_33, %c0_34, %c0_35] : memref<4x8x32xbf16, #tpu.memory_space<vmem>>, vector<1x8x32xbf16>
    %54 = vector.shape_cast %53 : vector<1x8x32xbf16> to vector<8x32xbf16>
    %cst_36 = arith.constant dense<0.000000e+00> : vector<16x32xf32>
    %55 = tpu.matmul %52, %54, %cst_36 {dimension_numbers = #tpu.dot_dimension_numbers<[1], [0], [0], [1], [0, 0, 1, 1], [], []>} : vector<16x8xbf16>, vector<8x32xbf16>, vector<16x32xf32> -> vector<16x32xf32>
    %56 = arith.addf %8, %55 : vector<16x32xf32>
    %c1 = arith.constant 1 : index
    %c0_37 = arith.constant 0 : index
    %c0_38 = arith.constant 0 : index
    %57 = vector.load %arg4[%c1, %c0_37, %c0_38] : memref<4x32x8xbf16, #tpu.memory_space<vmem>>, vector<1x32x8xbf16>
    %58 = vector.shape_cast %57 : vector<1x32x8xbf16> to vector<32x8xbf16>
    %cst_39 = arith.constant dense<0.000000e+00> : vector<16x8xf32>
    %59 = tpu.matmul %2, %58, %cst_39 {dimension_numbers = #tpu.dot_dimension_numbers<[1], [0], [0], [1], [0, 0, 1, 1], [], []>} : vector<16x32xbf16>, vector<32x8xbf16>, vector<16x8xf32> -> vector<16x8xf32>
    %c1_40 = arith.constant 1 : index
    %c0_41 = arith.constant 0 : index
    %c0_42 = arith.constant 0 : index
    %60 = vector.load %arg5[%c1_40, %c0_41, %c0_42] : memref<4x1x8xf32, #tpu.memory_space<vmem>>, vector<1x1x8xf32>
    %61 = vector.shape_cast %60 : vector<1x1x8xf32> to vector<1x8xf32>
    %62 = vector.broadcast %61 : vector<1x8xf32> to vector<16x8xf32>
    %63 = arith.addf %59, %62 : vector<16x8xf32>
    %64 = arith.truncf %63 : vector<16x8xf32> to vector<16x8xbf16>
    %65 = vector.shape_cast %64 : vector<16x8xbf16> to vector<2x8x8xbf16>
    %c1_43 = arith.constant 1 : index
    %c0_44 = arith.constant 0 : index
    %c0_45 = arith.constant 0 : index
    %66 = vector.load %arg6[%c1_43, %c0_44, %c0_45] : memref<4x32x8xbf16, #tpu.memory_space<vmem>>, vector<1x32x8xbf16>
    %67 = vector.shape_cast %66 : vector<1x32x8xbf16> to vector<32x8xbf16>
    %cst_46 = arith.constant dense<0.000000e+00> : vector<16x8xf32>
    %68 = tpu.matmul %5, %67, %cst_46 {dimension_numbers = #tpu.dot_dimension_numbers<[1], [0], [0], [1], [0, 0, 1, 1], [], []>} : vector<16x32xbf16>, vector<32x8xbf16>, vector<16x8xf32> -> vector<16x8xf32>
    %c1_47 = arith.constant 1 : index
    %c0_48 = arith.constant 0 : index
    %c0_49 = arith.constant 0 : index
    %69 = vector.load %arg7[%c1_47, %c0_48, %c0_49] : memref<4x1x8xf32, #tpu.memory_space<vmem>>, vector<1x1x8xf32>
    %70 = vector.shape_cast %69 : vector<1x1x8xf32> to vector<1x8xf32>
    %71 = vector.broadcast %70 : vector<1x8xf32> to vector<16x8xf32>
    %72 = arith.addf %68, %71 : vector<16x8xf32>
    %73 = arith.truncf %72 : vector<16x8xf32> to vector<16x8xbf16>
    %74 = vector.shape_cast %73 : vector<16x8xbf16> to vector<2x8x8xbf16>
    %c1_50 = arith.constant 1 : index
    %c0_51 = arith.constant 0 : index
    %c0_52 = arith.constant 0 : index
    %75 = vector.load %arg8[%c1_50, %c0_51, %c0_52] : memref<4x32x8xbf16, #tpu.memory_space<vmem>>, vector<1x32x8xbf16>
    %76 = vector.shape_cast %75 : vector<1x32x8xbf16> to vector<32x8xbf16>
    %cst_53 = arith.constant dense<0.000000e+00> : vector<16x8xf32>
    %77 = tpu.matmul %5, %76, %cst_53 {dimension_numbers = #tpu.dot_dimension_numbers<[1], [0], [0], [1], [0, 0, 1, 1], [], []>} : vector<16x32xbf16>, vector<32x8xbf16>, vector<16x8xf32> -> vector<16x8xf32>
    %c1_54 = arith.constant 1 : index
    %c0_55 = arith.constant 0 : index
    %c0_56 = arith.constant 0 : index
    %78 = vector.load %arg9[%c1_54, %c0_55, %c0_56] : memref<4x1x8xf32, #tpu.memory_space<vmem>>, vector<1x1x8xf32>
    %79 = vector.shape_cast %78 : vector<1x1x8xf32> to vector<1x8xf32>
    %80 = vector.broadcast %79 : vector<1x8xf32> to vector<16x8xf32>
    %81 = arith.addf %77, %80 : vector<16x8xf32>
    %82 = arith.truncf %81 : vector<16x8xf32> to vector<16x8xbf16>
    %83 = vector.shape_cast %82 : vector<16x8xbf16> to vector<2x8x8xbf16>
    "tpu.trace_start"() <{level = 10 : i32, message = "bqd,bkd->bqk"}> : () -> ()
    %cst_57 = arith.constant dense<0.000000e+00> : vector<2x8x8xf32>
    %84 = tpu.matmul %65, %74, %cst_57 {dimension_numbers = #tpu.dot_dimension_numbers<[2], [2], [1], [1], [0, 0, 0, 1, 1, 1], [0], [0]>} : vector<2x8x8xbf16>, vector<2x8x8xbf16>, vector<2x8x8xf32> -> vector<2x8x8xf32>
    "tpu.trace_stop"() : () -> ()
    %85 = vector.broadcast %7 : vector<1x8x8xf32> to vector<2x8x8xf32>
    %86 = arith.addf %84, %85 : vector<2x8x8xf32>
    %cst_58 = arith.constant dense<0xFF800000> : vector<2x8xf32>
    %87 = vector.multi_reduction <maximumf>, %86, %cst_58 [2] : vector<2x8x8xf32> to vector<2x8xf32>
    %88 = vector.shape_cast %87 : vector<2x8xf32> to vector<2x8x1xf32>
    %89 = vector.broadcast %88 : vector<2x8x1xf32> to vector<2x8x8xf32>
    %90 = arith.subf %86, %89 : vector<2x8x8xf32>
    %91 = math.exp %90 : vector<2x8x8xf32>
    %cst_59 = arith.constant dense<0.000000e+00> : vector<2x8xf32>
    %92 = vector.multi_reduction <add>, %91, %cst_59 [2] : vector<2x8x8xf32> to vector<2x8xf32>
    %93 = vector.shape_cast %92 : vector<2x8xf32> to vector<2x8x1xf32>
    %94 = tpu.reciprocal %93 {approx = true} : vector<2x8x1xf32> -> vector<2x8x1xf32>
    %95 = vector.broadcast %94 : vector<2x8x1xf32> to vector<2x8x8xf32>
    %96 = arith.mulf %91, %95 : vector<2x8x8xf32>
    %97 = arith.truncf %96 : vector<2x8x8xf32> to vector<2x8x8xbf16>
    "tpu.trace_start"() <{level = 10 : i32, message = "bqk,bkd->bqd"}> : () -> ()
    %cst_60 = arith.constant dense<0.000000e+00> : vector<2x8x8xf32>
    %98 = tpu.matmul %97, %83, %cst_60 {dimension_numbers = #tpu.dot_dimension_numbers<[2], [1], [1], [2], [0, 0, 0, 1, 1, 2], [0], [0]>} : vector<2x8x8xbf16>, vector<2x8x8xbf16>, vector<2x8x8xf32> -> vector<2x8x8xf32>
    "tpu.trace_stop"() : () -> ()
    %99 = vector.shape_cast %98 : vector<2x8x8xf32> to vector<16x8xf32>
    %100 = arith.truncf %99 : vector<16x8xf32> to vector<16x8xbf16>
    %c1_61 = arith.constant 1 : index
    %c0_62 = arith.constant 0 : index
    %c0_63 = arith.constant 0 : index
    %101 = vector.load %arg10[%c1_61, %c0_62, %c0_63] : memref<4x8x32xbf16, #tpu.memory_space<vmem>>, vector<1x8x32xbf16>
    %102 = vector.shape_cast %101 : vector<1x8x32xbf16> to vector<8x32xbf16>
    %cst_64 = arith.constant dense<0.000000e+00> : vector<16x32xf32>
    %103 = tpu.matmul %100, %102, %cst_64 {dimension_numbers = #tpu.dot_dimension_numbers<[1], [0], [0], [1], [0, 0, 1, 1], [], []>} : vector<16x8xbf16>, vector<8x32xbf16>, vector<16x32xf32> -> vector<16x32xf32>
    %104 = arith.addf %56, %103 : vector<16x32xf32>
    %c2 = arith.constant 2 : index
    %c0_65 = arith.constant 0 : index
    %c0_66 = arith.constant 0 : index
    %105 = vector.load %arg4[%c2, %c0_65, %c0_66] : memref<4x32x8xbf16, #tpu.memory_space<vmem>>, vector<1x32x8xbf16>
    %106 = vector.shape_cast %105 : vector<1x32x8xbf16> to vector<32x8xbf16>
    %cst_67 = arith.constant dense<0.000000e+00> : vector<16x8xf32>
    %107 = tpu.matmul %2, %106, %cst_67 {dimension_numbers = #tpu.dot_dimension_numbers<[1], [0], [0], [1], [0, 0, 1, 1], [], []>} : vector<16x32xbf16>, vector<32x8xbf16>, vector<16x8xf32> -> vector<16x8xf32>
    %c2_68 = arith.constant 2 : index
    %c0_69 = arith.constant 0 : index
    %c0_70 = arith.constant 0 : index
    %108 = vector.load %arg5[%c2_68, %c0_69, %c0_70] : memref<4x1x8xf32, #tpu.memory_space<vmem>>, vector<1x1x8xf32>
    %109 = vector.shape_cast %108 : vector<1x1x8xf32> to vector<1x8xf32>
    %110 = vector.broadcast %109 : vector<1x8xf32> to vector<16x8xf32>
    %111 = arith.addf %107, %110 : vector<16x8xf32>
    %112 = arith.truncf %111 : vector<16x8xf32> to vector<16x8xbf16>
    %113 = vector.shape_cast %112 : vector<16x8xbf16> to vector<2x8x8xbf16>
    %c2_71 = arith.constant 2 : index
    %c0_72 = arith.constant 0 : index
    %c0_73 = arith.constant 0 : index
    %114 = vector.load %arg6[%c2_71, %c0_72, %c0_73] : memref<4x32x8xbf16, #tpu.memory_space<vmem>>, vector<1x32x8xbf16>
    %115 = vector.shape_cast %114 : vector<1x32x8xbf16> to vector<32x8xbf16>
    %cst_74 = arith.constant dense<0.000000e+00> : vector<16x8xf32>
    %116 = tpu.matmul %5, %115, %cst_74 {dimension_numbers = #tpu.dot_dimension_numbers<[1], [0], [0], [1], [0, 0, 1, 1], [], []>} : vector<16x32xbf16>, vector<32x8xbf16>, vector<16x8xf32> -> vector<16x8xf32>
    %c2_75 = arith.constant 2 : index
    %c0_76 = arith.constant 0 : index
    %c0_77 = arith.constant 0 : index
    %117 = vector.load %arg7[%c2_75, %c0_76, %c0_77] : memref<4x1x8xf32, #tpu.memory_space<vmem>>, vector<1x1x8xf32>
    %118 = vector.shape_cast %117 : vector<1x1x8xf32> to vector<1x8xf32>
    %119 = vector.broadcast %118 : vector<1x8xf32> to vector<16x8xf32>
    %120 = arith.addf %116, %119 : vector<16x8xf32>
    %121 = arith.truncf %120 : vector<16x8xf32> to vector<16x8xbf16>
    %122 = vector.shape_cast %121 : vector<16x8xbf16> to vector<2x8x8xbf16>
    %c2_78 = arith.constant 2 : index
    %c0_79 = arith.constant 0 : index
    %c0_80 = arith.constant 0 : index
    %123 = vector.load %arg8[%c2_78, %c0_79, %c0_80] : memref<4x32x8xbf16, #tpu.memory_space<vmem>>, vector<1x32x8xbf16>
    %124 = vector.shape_cast %123 : vector<1x32x8xbf16> to vector<32x8xbf16>
    %cst_81 = arith.constant dense<0.000000e+00> : vector<16x8xf32>
    %125 = tpu.matmul %5, %124, %cst_81 {dimension_numbers = #tpu.dot_dimension_numbers<[1], [0], [0], [1], [0, 0, 1, 1], [], []>} : vector<16x32xbf16>, vector<32x8xbf16>, vector<16x8xf32> -> vector<16x8xf32>
    %c2_82 = arith.constant 2 : index
    %c0_83 = arith.constant 0 : index
    %c0_84 = arith.constant 0 : index
    %126 = vector.load %arg9[%c2_82, %c0_83, %c0_84] : memref<4x1x8xf32, #tpu.memory_space<vmem>>, vector<1x1x8xf32>
    %127 = vector.shape_cast %126 : vector<1x1x8xf32> to vector<1x8xf32>
    %128 = vector.broadcast %127 : vector<1x8xf32> to vector<16x8xf32>
    %129 = arith.addf %125, %128 : vector<16x8xf32>
    %130 = arith.truncf %129 : vector<16x8xf32> to vector<16x8xbf16>
    %131 = vector.shape_cast %130 : vector<16x8xbf16> to vector<2x8x8xbf16>
    "tpu.trace_start"() <{level = 10 : i32, message = "bqd,bkd->bqk"}> : () -> ()
    %cst_85 = arith.constant dense<0.000000e+00> : vector<2x8x8xf32>
    %132 = tpu.matmul %113, %122, %cst_85 {dimension_numbers = #tpu.dot_dimension_numbers<[2], [2], [1], [1], [0, 0, 0, 1, 1, 1], [0], [0]>} : vector<2x8x8xbf16>, vector<2x8x8xbf16>, vector<2x8x8xf32> -> vector<2x8x8xf32>
    "tpu.trace_stop"() : () -> ()
    %133 = vector.broadcast %7 : vector<1x8x8xf32> to vector<2x8x8xf32>
    %134 = arith.addf %132, %133 : vector<2x8x8xf32>
    %cst_86 = arith.constant dense<0xFF800000> : vector<2x8xf32>
    %135 = vector.multi_reduction <maximumf>, %134, %cst_86 [2] : vector<2x8x8xf32> to vector<2x8xf32>
    %136 = vector.shape_cast %135 : vector<2x8xf32> to vector<2x8x1xf32>
    %137 = vector.broadcast %136 : vector<2x8x1xf32> to vector<2x8x8xf32>
    %138 = arith.subf %134, %137 : vector<2x8x8xf32>
    %139 = math.exp %138 : vector<2x8x8xf32>
    %cst_87 = arith.constant dense<0.000000e+00> : vector<2x8xf32>
    %140 = vector.multi_reduction <add>, %139, %cst_87 [2] : vector<2x8x8xf32> to vector<2x8xf32>
    %141 = vector.shape_cast %140 : vector<2x8xf32> to vector<2x8x1xf32>
    %142 = tpu.reciprocal %141 {approx = true} : vector<2x8x1xf32> -> vector<2x8x1xf32>
    %143 = vector.broadcast %142 : vector<2x8x1xf32> to vector<2x8x8xf32>
    %144 = arith.mulf %139, %143 : vector<2x8x8xf32>
    %145 = arith.truncf %144 : vector<2x8x8xf32> to vector<2x8x8xbf16>
    "tpu.trace_start"() <{level = 10 : i32, message = "bqk,bkd->bqd"}> : () -> ()
    %cst_88 = arith.constant dense<0.000000e+00> : vector<2x8x8xf32>
    %146 = tpu.matmul %145, %131, %cst_88 {dimension_numbers = #tpu.dot_dimension_numbers<[2], [1], [1], [2], [0, 0, 0, 1, 1, 2], [0], [0]>} : vector<2x8x8xbf16>, vector<2x8x8xbf16>, vector<2x8x8xf32> -> vector<2x8x8xf32>
    "tpu.trace_stop"() : () -> ()
    %147 = vector.shape_cast %146 : vector<2x8x8xf32> to vector<16x8xf32>
    %148 = arith.truncf %147 : vector<16x8xf32> to vector<16x8xbf16>
    %c2_89 = arith.constant 2 : index
    %c0_90 = arith.constant 0 : index
    %c0_91 = arith.constant 0 : index
    %149 = vector.load %arg10[%c2_89, %c0_90, %c0_91] : memref<4x8x32xbf16, #tpu.memory_space<vmem>>, vector<1x8x32xbf16>
    %150 = vector.shape_cast %149 : vector<1x8x32xbf16> to vector<8x32xbf16>
    %cst_92 = arith.constant dense<0.000000e+00> : vector<16x32xf32>
    %151 = tpu.matmul %148, %150, %cst_92 {dimension_numbers = #tpu.dot_dimension_numbers<[1], [0], [0], [1], [0, 0, 1, 1], [], []>} : vector<16x8xbf16>, vector<8x32xbf16>, vector<16x32xf32> -> vector<16x32xf32>
    %152 = arith.addf %104, %151 : vector<16x32xf32>
    %c3 = arith.constant 3 : index
    %c0_93 = arith.constant 0 : index
    %c0_94 = arith.constant 0 : index
    %153 = vector.load %arg4[%c3, %c0_93, %c0_94] : memref<4x32x8xbf16, #tpu.memory_space<vmem>>, vector<1x32x8xbf16>
    %154 = vector.shape_cast %153 : vector<1x32x8xbf16> to vector<32x8xbf16>
    %cst_95 = arith.constant dense<0.000000e+00> : vector<16x8xf32>
    %155 = tpu.matmul %2, %154, %cst_95 {dimension_numbers = #tpu.dot_dimension_numbers<[1], [0], [0], [1], [0, 0, 1, 1], [], []>} : vector<16x32xbf16>, vector<32x8xbf16>, vector<16x8xf32> -> vector<16x8xf32>
    %c3_96 = arith.constant 3 : index
    %c0_97 = arith.constant 0 : index
    %c0_98 = arith.constant 0 : index
    %156 = vector.load %arg5[%c3_96, %c0_97, %c0_98] : memref<4x1x8xf32, #tpu.memory_space<vmem>>, vector<1x1x8xf32>
    %157 = vector.shape_cast %156 : vector<1x1x8xf32> to vector<1x8xf32>
    %158 = vector.broadcast %157 : vector<1x8xf32> to vector<16x8xf32>
    %159 = arith.addf %155, %158 : vector<16x8xf32>
    %160 = arith.truncf %159 : vector<16x8xf32> to vector<16x8xbf16>
    %161 = vector.shape_cast %160 : vector<16x8xbf16> to vector<2x8x8xbf16>
    %c3_99 = arith.constant 3 : index
    %c0_100 = arith.constant 0 : index
    %c0_101 = arith.constant 0 : index
    %162 = vector.load %arg6[%c3_99, %c0_100, %c0_101] : memref<4x32x8xbf16, #tpu.memory_space<vmem>>, vector<1x32x8xbf16>
    %163 = vector.shape_cast %162 : vector<1x32x8xbf16> to vector<32x8xbf16>
    %cst_102 = arith.constant dense<0.000000e+00> : vector<16x8xf32>
    %164 = tpu.matmul %5, %163, %cst_102 {dimension_numbers = #tpu.dot_dimension_numbers<[1], [0], [0], [1], [0, 0, 1, 1], [], []>} : vector<16x32xbf16>, vector<32x8xbf16>, vector<16x8xf32> -> vector<16x8xf32>
    %c3_103 = arith.constant 3 : index
    %c0_104 = arith.constant 0 : index
    %c0_105 = arith.constant 0 : index
    %165 = vector.load %arg7[%c3_103, %c0_104, %c0_105] : memref<4x1x8xf32, #tpu.memory_space<vmem>>, vector<1x1x8xf32>
    %166 = vector.shape_cast %165 : vector<1x1x8xf32> to vector<1x8xf32>
    %167 = vector.broadcast %166 : vector<1x8xf32> to vector<16x8xf32>
    %168 = arith.addf %164, %167 : vector<16x8xf32>
    %169 = arith.truncf %168 : vector<16x8xf32> to vector<16x8xbf16>
    %170 = vector.shape_cast %169 : vector<16x8xbf16> to vector<2x8x8xbf16>
    %c3_106 = arith.constant 3 : index
    %c0_107 = arith.constant 0 : index
    %c0_108 = arith.constant 0 : index
    %171 = vector.load %arg8[%c3_106, %c0_107, %c0_108] : memref<4x32x8xbf16, #tpu.memory_space<vmem>>, vector<1x32x8xbf16>
    %172 = vector.shape_cast %171 : vector<1x32x8xbf16> to vector<32x8xbf16>
    %cst_109 = arith.constant dense<0.000000e+00> : vector<16x8xf32>
    %173 = tpu.matmul %5, %172, %cst_109 {dimension_numbers = #tpu.dot_dimension_numbers<[1], [0], [0], [1], [0, 0, 1, 1], [], []>} : vector<16x32xbf16>, vector<32x8xbf16>, vector<16x8xf32> -> vector<16x8xf32>
    %c3_110 = arith.constant 3 : index
    %c0_111 = arith.constant 0 : index
    %c0_112 = arith.constant 0 : index
    %174 = vector.load %arg9[%c3_110, %c0_111, %c0_112] : memref<4x1x8xf32, #tpu.memory_space<vmem>>, vector<1x1x8xf32>
    %175 = vector.shape_cast %174 : vector<1x1x8xf32> to vector<1x8xf32>
    %176 = vector.broadcast %175 : vector<1x8xf32> to vector<16x8xf32>
    %177 = arith.addf %173, %176 : vector<16x8xf32>
    %178 = arith.truncf %177 : vector<16x8xf32> to vector<16x8xbf16>
    %179 = vector.shape_cast %178 : vector<16x8xbf16> to vector<2x8x8xbf16>
    "tpu.trace_start"() <{level = 10 : i32, message = "bqd,bkd->bqk"}> : () -> ()
    %cst_113 = arith.constant dense<0.000000e+00> : vector<2x8x8xf32>
    %180 = tpu.matmul %161, %170, %cst_113 {dimension_numbers = #tpu.dot_dimension_numbers<[2], [2], [1], [1], [0, 0, 0, 1, 1, 1], [0], [0]>} : vector<2x8x8xbf16>, vector<2x8x8xbf16>, vector<2x8x8xf32> -> vector<2x8x8xf32>
    "tpu.trace_stop"() : () -> ()
    %181 = vector.broadcast %7 : vector<1x8x8xf32> to vector<2x8x8xf32>
    %182 = arith.addf %180, %181 : vector<2x8x8xf32>
    %cst_114 = arith.constant dense<0xFF800000> : vector<2x8xf32>
    %183 = vector.multi_reduction <maximumf>, %182, %cst_114 [2] : vector<2x8x8xf32> to vector<2x8xf32>
    %184 = vector.shape_cast %183 : vector<2x8xf32> to vector<2x8x1xf32>
    %185 = vector.broadcast %184 : vector<2x8x1xf32> to vector<2x8x8xf32>
    %186 = arith.subf %182, %185 : vector<2x8x8xf32>
    %187 = math.exp %186 : vector<2x8x8xf32>
    %cst_115 = arith.constant dense<0.000000e+00> : vector<2x8xf32>
    %188 = vector.multi_reduction <add>, %187, %cst_115 [2] : vector<2x8x8xf32> to vector<2x8xf32>
    %189 = vector.shape_cast %188 : vector<2x8xf32> to vector<2x8x1xf32>
    %190 = tpu.reciprocal %189 {approx = true} : vector<2x8x1xf32> -> vector<2x8x1xf32>
    %191 = vector.broadcast %190 : vector<2x8x1xf32> to vector<2x8x8xf32>
    %192 = arith.mulf %187, %191 : vector<2x8x8xf32>
    %193 = arith.truncf %192 : vector<2x8x8xf32> to vector<2x8x8xbf16>
    "tpu.trace_start"() <{level = 10 : i32, message = "bqk,bkd->bqd"}> : () -> ()
    %cst_116 = arith.constant dense<0.000000e+00> : vector<2x8x8xf32>
    %194 = tpu.matmul %193, %179, %cst_116 {dimension_numbers = #tpu.dot_dimension_numbers<[2], [1], [1], [2], [0, 0, 0, 1, 1, 2], [0], [0]>} : vector<2x8x8xbf16>, vector<2x8x8xbf16>, vector<2x8x8xf32> -> vector<2x8x8xf32>
    "tpu.trace_stop"() : () -> ()
    %195 = vector.shape_cast %194 : vector<2x8x8xf32> to vector<16x8xf32>
    %196 = arith.truncf %195 : vector<16x8xf32> to vector<16x8xbf16>
    %c3_117 = arith.constant 3 : index
    %c0_118 = arith.constant 0 : index
    %c0_119 = arith.constant 0 : index
    %197 = vector.load %arg10[%c3_117, %c0_118, %c0_119] : memref<4x8x32xbf16, #tpu.memory_space<vmem>>, vector<1x8x32xbf16>
    %198 = vector.shape_cast %197 : vector<1x8x32xbf16> to vector<8x32xbf16>
    %cst_120 = arith.constant dense<0.000000e+00> : vector<16x32xf32>
    %199 = tpu.matmul %196, %198, %cst_120 {dimension_numbers = #tpu.dot_dimension_numbers<[1], [0], [0], [1], [0, 0, 1, 1], [], []>} : vector<16x8xbf16>, vector<8x32xbf16>, vector<16x32xf32> -> vector<16x32xf32>
    %200 = arith.addf %152, %199 : vector<16x32xf32>
    %c0_121 = arith.constant 0 : index
    %c0_122 = arith.constant 0 : index
    %201 = vector.load %arg11[%c0_121, %c0_122] : memref<1x32xf32, #tpu.memory_space<vmem>>, vector<1x32xf32>
    %202 = vector.broadcast %201 : vector<1x32xf32> to vector<16x32xf32>
    %203 = arith.addf %200, %202 : vector<16x32xf32>
    %204 = arith.addf %203, %1 : vector<16x32xf32>
    %cst_123 = arith.constant dense<0.000000e+00> : vector<16xf32>
    %205 = vector.multi_reduction <add>, %204, %cst_123 [1] : vector<16x32xf32> to vector<16xf32>
    %206 = vector.shape_cast %205 : vector<16xf32> to vector<16x1xf32>
    %cst_124 = arith.constant 3.200000e+01 : f32
    %207 = vector.broadcast %cst_124 : f32 to vector<16x1xf32>
    %208 = arith.divf %206, %207 : vector<16x1xf32>
    %209 = vector.broadcast %208 : vector<16x1xf32> to vector<16x32xf32>
    %210 = arith.subf %204, %209 : vector<16x32xf32>
    %211 = arith.mulf %210, %210 : vector<16x32xf32>
    %cst_125 = arith.constant dense<0.000000e+00> : vector<16xf32>
    %212 = vector.multi_reduction <add>, %211, %cst_125 [1] : vector<16x32xf32> to vector<16xf32>
    %213 = vector.shape_cast %212 : vector<16xf32> to vector<16x1xf32>
    %cst_126 = arith.constant 3.200000e+01 : f32
    %214 = vector.broadcast %cst_126 : f32 to vector<16x1xf32>
    %215 = arith.divf %213, %214 : vector<16x1xf32>
    %cst_127 = arith.constant 9.99999997E-7 : f32
    %216 = vector.broadcast %cst_127 : f32 to vector<16x1xf32>
    %217 = arith.addf %215, %216 : vector<16x1xf32>
    %218 = math.rsqrt %217 : vector<16x1xf32>
    %219 = vector.broadcast %218 : vector<16x1xf32> to vector<16x32xf32>
    %220 = arith.mulf %210, %219 : vector<16x32xf32>
    %c0_128 = arith.constant 0 : index
    %c0_129 = arith.constant 0 : index
    %221 = vector.load %arg12[%c0_128, %c0_129] : memref<1x32xf32, #tpu.memory_space<vmem>>, vector<1x32xf32>
    %222 = vector.broadcast %221 : vector<1x32xf32> to vector<16x32xf32>
    %223 = arith.mulf %220, %222 : vector<16x32xf32>
    %c0_130 = arith.constant 0 : index
    %c0_131 = arith.constant 0 : index
    %224 = vector.load %arg13[%c0_130, %c0_131] : memref<1x32xf32, #tpu.memory_space<vmem>>, vector<1x32xf32>
    %225 = vector.broadcast %224 : vector<1x32xf32> to vector<16x32xf32>
    %226 = arith.addf %223, %225 : vector<16x32xf32>
    %227 = arith.truncf %226 : vector<16x32xf32> to vector<16x32xbf16>
    %c0_132 = arith.constant 0 : index
    %c0_133 = arith.constant 0 : index
    %228 = vector.load %arg14[%c0_132, %c0_133] : memref<32x64xbf16, #tpu.memory_space<vmem>>, vector<32x64xbf16>
    %cst_134 = arith.constant dense<0.000000e+00> : vector<16x64xf32>
    %229 = tpu.matmul %227, %228, %cst_134 {dimension_numbers = #tpu.dot_dimension_numbers<[1], [0], [0], [1], [0, 0, 1, 1], [], []>} : vector<16x32xbf16>, vector<32x64xbf16>, vector<16x64xf32> -> vector<16x64xf32>
    %c0_135 = arith.constant 0 : index
    %c0_136 = arith.constant 0 : index
    %230 = vector.load %arg15[%c0_135, %c0_136] : memref<1x64xf32, #tpu.memory_space<vmem>>, vector<1x64xf32>
    %231 = vector.broadcast %230 : vector<1x64xf32> to vector<16x64xf32>
    %232 = arith.addf %229, %231 : vector<16x64xf32>
    %cst_137 = arith.constant 0.000000e+00 : f32
    %233 = vector.broadcast %cst_137 : f32 to vector<16x64xf32>
    %234 = arith.maximumf %232, %233 : vector<16x64xf32>
    %235 = arith.truncf %234 : vector<16x64xf32> to vector<16x64xbf16>
    %c0_138 = arith.constant 0 : index
    %c0_139 = arith.constant 0 : index
    %236 = vector.load %arg16[%c0_138, %c0_139] : memref<64x32xbf16, #tpu.memory_space<vmem>>, vector<64x32xbf16>
    %cst_140 = arith.constant dense<0.000000e+00> : vector<16x32xf32>
    %237 = tpu.matmul %235, %236, %cst_140 {dimension_numbers = #tpu.dot_dimension_numbers<[1], [0], [0], [1], [0, 0, 1, 1], [], []>} : vector<16x64xbf16>, vector<64x32xbf16>, vector<16x32xf32> -> vector<16x32xf32>
    %c0_141 = arith.constant 0 : index
    %c0_142 = arith.constant 0 : index
    %238 = vector.load %arg17[%c0_141, %c0_142] : memref<1x32xf32, #tpu.memory_space<vmem>>, vector<1x32xf32>
    %239 = vector.broadcast %238 : vector<1x32xf32> to vector<16x32xf32>
    %240 = arith.addf %237, %239 : vector<16x32xf32>
    %241 = arith.addf %240, %204 : vector<16x32xf32>
    %242 = vector.shape_cast %241 : vector<16x32xf32> to vector<2x8x32xf32>
    %c0_143 = arith.constant 0 : index
    %c0_144 = arith.constant 0 : index
    %c0_145 = arith.constant 0 : index
    %243 = vector.load %arg18[%c0_143, %c0_144, %c0_145] : memref<2x8x32xf32, #tpu.memory_space<vmem>>, vector<2x8x32xf32>
    tpu.vector_store %arg18[%c0_143, %c0_144, %c0_145], %242 {strides = array<i32>} : memref<2x8x32xf32, #tpu.memory_space<vmem>>, vector<2x8x32xf32>,
    return
  }
  func.func @transform_0(%arg0: i32) -> (i32, i32, i32) {
    %c0_i32 = arith.constant 0 : i32
    %c0_i32_0 = arith.constant 0 : i32
    %c0_i32_1 = arith.constant 0 : i32
    return %arg0, %c0_i32, %c0_i32_0 : i32, i32, i32
  }
  func.func @transform_1(%arg0: i32) -> (i32, i32, i32) {
    %c0_i32 = arith.constant 0 : i32
    %c0_i32_0 = arith.constant 0 : i32
    %c0_i32_1 = arith.constant 0 : i32
    return %arg0, %c0_i32, %c0_i32_0 : i32, i32, i32
  }
  func.func @transform_2(%arg0: i32) -> (i32, i32, i32) {
    %c0_i32 = arith.constant 0 : i32
    %c0_i32_0 = arith.constant 0 : i32
    %c0_i32_1 = arith.constant 0 : i32
    %c0_i32_2 = arith.constant 0 : i32
    return %c0_i32, %c0_i32_0, %c0_i32_1 : i32, i32, i32
  }
  func.func @transform_3(%arg0: i32) -> (i32, i32, i32) {
    %c0_i32 = arith.constant 0 : i32
    %c0_i32_0 = arith.constant 0 : i32
    %c0_i32_1 = arith.constant 0 : i32
    %c0_i32_2 = arith.constant 0 : i32
    return %c0_i32, %c0_i32_0, %c0_i32_1 : i32, i32, i32
  }
  func.func @transform_4(%arg0: i32) -> (i32, i32, i32) {
    %c0_i32 = arith.constant 0 : i32
    %c0_i32_0 = arith.constant 0 : i32
    %c0_i32_1 = arith.constant 0 : i32
    %c0_i32_2 = arith.constant 0 : i32
    return %c0_i32, %c0_i32_0, %c0_i32_1 : i32, i32, i32
  }
  func.func @transform_5(%arg0: i32) -> (i32, i32, i32) {
    %c0_i32 = arith.constant 0 : i32
    %c0_i32_0 = arith.constant 0 : i32
    %c0_i32_1 = arith.constant 0 : i32
    %c0_i32_2 = arith.constant 0 : i32
    return %c0_i32, %c0_i32_0, %c0_i32_1 : i32, i32, i32
  }
  func.func @transform_6(%arg0: i32) -> (i32, i32, i32) {
    %c0_i32 = arith.constant 0 : i32
    %c0_i32_0 = arith.constant 0 : i32
    %c0_i32_1 = arith.constant 0 : i32
    %c0_i32_2 = arith.constant 0 : i32
    return %c0_i32, %c0_i32_0, %c0_i32_1 : i32, i32, i32
  }
  func.func @transform_7(%arg0: i32) -> (i32, i32, i32) {
    %c0_i32 = arith.constant 0 : i32
    %c0_i32_0 = arith.constant 0 : i32
    %c0_i32_1 = arith.constant 0 : i32
    %c0_i32_2 = arith.constant 0 : i32
    return %c0_i32, %c0_i32_0, %c0_i32_1 : i32, i32, i32
  }
  func.func @transform_8(%arg0: i32) -> (i32, i32, i32) {
    %c0_i32 = arith.constant 0 : i32
    %c0_i32_0 = arith.constant 0 : i32
    %c0_i32_1 = arith.constant 0 : i32
    %c0_i32_2 = arith.constant 0 : i32
    return %c0_i32, %c0_i32_0, %c0_i32_1 : i32, i32, i32
  }
  func.func @transform_9(%arg0: i32) -> (i32, i32, i32) {
    %c0_i32 = arith.constant 0 : i32
    %c0_i32_0 = arith.constant 0 : i32
    %c0_i32_1 = arith.constant 0 : i32
    %c0_i32_2 = arith.constant 0 : i32
    return %c0_i32, %c0_i32_0, %c0_i32_1 : i32, i32, i32
  }
  func.func @transform_10(%arg0: i32) -> (i32, i32) {
    %c0_i32 = arith.constant 0 : i32
    %c0_i32_0 = arith.constant 0 : i32
    %c0_i32_1 = arith.constant 0 : i32
    return %c0_i32, %c0_i32_0 : i32, i32
  }
  func.func @transform_11(%arg0: i32) -> (i32, i32) {
    %c0_i32 = arith.constant 0 : i32
    %c0_i32_0 = arith.constant 0 : i32
    %c0_i32_1 = arith.constant 0 : i32
    return %c0_i32, %c0_i32_0 : i32, i32
  }
  func.func @transform_12(%arg0: i32) -> (i32, i32) {
    %c0_i32 = arith.constant 0 : i32
    %c0_i32_0 = arith.constant 0 : i32
    %c0_i32_1 = arith.constant 0 : i32
    return %c0_i32, %c0_i32_0 : i32, i32
  }
  func.func @transform_13(%arg0: i32) -> (i32, i32) {
    %c0_i32 = arith.constant 0 : i32
    %c0_i32_0 = arith.constant 0 : i32
    %c0_i32_1 = arith.constant 0 : i32
    return %c0_i32, %c0_i32_0 : i32, i32
  }
  func.func @transform_14(%arg0: i32) -> (i32, i32) {
    %c0_i32 = arith.constant 0 : i32
    %c0_i32_0 = arith.constant 0 : i32
    %c0_i32_1 = arith.constant 0 : i32
    return %c0_i32, %c0_i32_0 : i32, i32
  }
  func.func @transform_15(%arg0: i32) -> (i32, i32) {
    %c0_i32 = arith.constant 0 : i32
    %c0_i32_0 = arith.constant 0 : i32
    %c0_i32_1 = arith.constant 0 : i32
    return %c0_i32, %c0_i32_0 : i32, i32
  }
  func.func @transform_16(%arg0: i32) -> (i32, i32) {
    %c0_i32 = arith.constant 0 : i32
    %c0_i32_0 = arith.constant 0 : i32
    %c0_i32_1 = arith.constant 0 : i32
    return %c0_i32, %c0_i32_0 : i32, i32
  }
  func.func @transform_17(%arg0: i32) -> (i32, i32, i32) {
    %c0_i32 = arith.constant 0 : i32
    %c0_i32_0 = arith.constant 0 : i32
    %c0_i32_1 = arith.constant 0 : i32
    return %arg0, %c0_i32, %c0_i32_0 : i32, i32, i32
  }
}

module attributes {stable_mosaic.version = 11 : i64} {
  func.func @transformer_layer_kernel(%arg0: i32, %arg1: memref<2x8x32xf32, #tpu.memory_space<vmem>>, %arg2: memref<2x8x32xf32, #tpu.memory_space<vmem>>, %arg3: memref<1x8x8xbf16, #tpu.memory_space<vmem>>, %arg4: memref<4x32x8xbf16, #tpu.memory_space<vmem>>, %arg5: memref<4x1x8xf32, #tpu.memory_space<vmem>>, %arg6: memref<4x32x8xbf16, #tpu.memory_space<vmem>>, %arg7: memref<4x1x8xf32, #tpu.memory_space<vmem>>, %arg8: memref<4x32x8xbf16, #tpu.memory_space<vmem>>, %arg9: memref<4x1x8xf32, #tpu.memory_space<vmem>>, %arg10: memref<4x8x32xbf16, #tpu.memory_space<vmem>>, %arg11: memref<1x32xf32, #tpu.memory_space<vmem>>, %arg12: memref<1x32xf32, #tpu.memory_space<vmem>>, %arg13: memref<1x32xf32, #tpu.memory_space<vmem>>, %arg14: memref<32x64xbf16, #tpu.memory_space<vmem>>, %arg15: memref<1x64xf32, #tpu.memory_space<vmem>>, %arg16: memref<64x32xbf16, #tpu.memory_space<vmem>>, %arg17: memref<1x32xf32, #tpu.memory_space<vmem>>, %arg18: memref<2x8x32xf32, #tpu.memory_space<vmem>>) attributes {dimension_semantics = [#tpu.dimension_semantics<parallel>], iteration_bounds = array<i64: 1>, scalar_prefetch = 0 : i64, scratch_operands = 0 : i64, tpu.core_type = #tpu.core_type<tc>, window_params = [{transform_indices = @transform_0, window_bounds = array<i64: 2, 8, 32>}, {transform_indices = @transform_1, window_bounds = array<i64: 2, 8, 32>}, {pipeline_mode = #tpu.pipeline_mode<synchronous>, transform_indices = @transform_2, window_bounds = array<i64: 1, 8, 8>}, {pipeline_mode = #tpu.pipeline_mode<synchronous>, transform_indices = @transform_3, window_bounds = array<i64: 4, 32, 8>}, {pipeline_mode = #tpu.pipeline_mode<synchronous>, transform_indices = @transform_4, window_bounds = array<i64: 4, 1, 8>}, {pipeline_mode = #tpu.pipeline_mode<synchronous>, transform_indices = @transform_5, window_bounds = array<i64: 4, 32, 8>}, {pipeline_mode = #tpu.pipeline_mode<synchronous>, transform_indices = @transform_6, window_bounds = array<i64: 4, 1, 8>}, {pipeline_mode = #tpu.pipeline_mode<synchronous>, transform_indices = @transform_7, window_bounds = array<i64: 4, 32, 8>}, {pipeline_mode = #tpu.pipeline_mode<synchronous>, transform_indices = @transform_8, window_bounds = array<i64: 4, 1, 8>}, {pipeline_mode = #tpu.pipeline_mode<synchronous>, transform_indices = @transform_9, window_bounds = array<i64: 4, 8, 32>}, {pipeline_mode = #tpu.pipeline_mode<synchronous>, transform_indices = @transform_10, window_bounds = array<i64: 1, 32>}, {pipeline_mode = #tpu.pipeline_mode<synchronous>, transform_indices = @transform_11, window_bounds = array<i64: 1, 32>}, {pipeline_mode = #tpu.pipeline_mode<synchronous>, transform_indices = @transform_12, window_bounds = array<i64: 1, 32>}, {pipeline_mode = #tpu.pipeline_mode<synchronous>, transform_indices = @transform_13, window_bounds = array<i64: 32, 64>}, {pipeline_mode = #tpu.pipeline_mode<synchronous>, transform_indices = @transform_14, window_bounds = array<i64: 1, 64>}, {pipeline_mode = #tpu.pipeline_mode<synchronous>, transform_indices = @transform_15, window_bounds = array<i64: 64, 32>}, {pipeline_mode = #tpu.pipeline_mode<synchronous>, transform_indices = @transform_16, window_bounds = array<i64: 1, 32>}, {transform_indices = @transform_17, window_bounds = array<i64: 2, 8, 32>}]} {
    %c0 = arith.constant 0 : index
    %c0_0 = arith.constant 0 : index
    %c0_1 = arith.constant 0 : index
    %0 = vector.load %arg2[%c0, %c0_0, %c0_1] : memref<2x8x32xf32, #tpu.memory_space<vmem>>, vector<2x8x32xf32>
    %1 = vector.shape_cast %0 : vector<2x8x32xf32> to vector<16x32xf32>
    %2 = arith.truncf %1 : vector<16x32xf32> to vector<16x32xbf16>
    %c0_2 = arith.constant 0 : index
    %c0_3 = arith.constant 0 : index
    %c0_4 = arith.constant 0 : index
    %3 = vector.load %arg1[%c0_2, %c0_3, %c0_4] : memref<2x8x32xf32, #tpu.memory_space<vmem>>, vector<2x8x32xf32>
    %4 = vector.shape_cast %3 : vector<2x8x32xf32> to vector<16x32xf32>
    %5 = arith.truncf %4 : vector<16x32xf32> to vector<16x32xbf16>
    %c0_5 = arith.constant 0 : index
    %c0_6 = arith.constant 0 : index
    %c0_7 = arith.constant 0 : index
    %6 = vector.load %arg3[%c0_5, %c0_6, %c0_7] : memref<1x8x8xbf16, #tpu.memory_space<vmem>>, vector<1x8x8xbf16>
    %7 = arith.extf %6 : vector<1x8x8xbf16> to vector<1x8x8xf32>
    %cst = arith.constant 0.000000e+00 : f32
    %8 = vector.broadcast %cst : f32 to vector<16x32xf32>
    %c0_8 = arith.constant 0 : index
    %c0_9 = arith.constant 0 : index
    %c0_10 = arith.constant 0 : index
    %9 = vector.load %arg4[%c0_8, %c0_9, %c0_10] : memref<4x32x8xbf16, #tpu.memory_space<vmem>>, vector<1x32x8xbf16>
    %10 = vector.shape_cast %9 : vector<1x32x8xbf16> to vector<32x8xbf16>
    %cst_11 = arith.constant dense<0.000000e+00> : vector<16x8xf32>
    %11 = tpu.matmul %2, %10, %cst_11 {dimension_numbers = #tpu.dot_dimension_numbers<[1], [0], [0], [1], [0, 0, 1, 1], [], []>} : vector<16x32xbf16>, vector<32x8xbf16>, vector<16x8xf32> -> vector<16x8xf32>
    %c0_12 = arith.constant 0 : index
    %c0_13 = arith.constant 0 : index
    %c0_14 = arith.constant 0 : index
    %12 = vector.load %arg5[%c0_12, %c0_13, %c0_14] : memref<4x1x8xf32, #tpu.memory_space<vmem>>, vector<1x1x8xf32>
    %13 = vector.shape_cast %12 : vector<1x1x8xf32> to vector<1x8xf32>
    %14 = vector.broadcast %13 : vector<1x8xf32> to vector<16x8xf32>
    %15 = arith.addf %11, %14 : vector<16x8xf32>
    %16 = arith.truncf %15 : vector<16x8xf32> to vector<16x8xbf16>
    %17 = vector.shape_cast %16 : vector<16x8xbf16> to vector<2x8x8xbf16>
    %c0_15 = arith.constant 0 : index
    %c0_16 = arith.constant 0 : index
    %c0_17 = arith.constant 0 : index
    %18 = vector.load %arg6[%c0_15, %c0_16, %c0_17] : memref<4x32x8xbf16, #tpu.memory_space<vmem>>, vector<1x32x8xbf16>
    %19 = vector.shape_cast %18 : vector<1x32x8xbf16> to vector<32x8xbf16>
    %cst_18 = arith.constant dense<0.000000e+00> : vector<16x8xf32>
    %20 = tpu.matmul %5, %19, %cst_18 {dimension_numbers = #tpu.dot_dimension_numbers<[1], [0], [0], [1], [0, 0, 1, 1], [], []>} : vector<16x32xbf16>, vector<32x8xbf16>, vector<16x8xf32> -> vector<16x8xf32>
    %c0_19 = arith.constant 0 : index
    %c0_20 = arith.constant 0 : index
    %c0_21 = arith.constant 0 : index
    %21 = vector.load %arg7[%c0_19, %c0_20, %c0_21] : memref<4x1x8xf32, #tpu.memory_space<vmem>>, vector<1x1x8xf32>
    %22 = vector.shape_cast %21 : vector<1x1x8xf32> to vector<1x8xf32>
    %23 = vector.broadcast %22 : vector<1x8xf32> to vector<16x8xf32>
    %24 = arith.addf %20, %23 : vector<16x8xf32>
    %25 = arith.truncf %24 : vector<16x8xf32> to vector<16x8xbf16>
    %26 = vector.shape_cast %25 : vector<16x8xbf16> to vector<2x8x8xbf16>
    %c0_22 = arith.constant 0 : index
    %c0_23 = arith.constant 0 : index
    %c0_24 = arith.constant 0 : index
    %27 = vector.load %arg8[%c0_22, %c0_23, %c0_24] : memref<4x32x8xbf16, #tpu.memory_space<vmem>>, vector<1x32x8xbf16>
    %28 = vector.shape_cast %27 : vector<1x32x8xbf16> to vector<32x8xbf16>
    %cst_25 = arith.constant dense<0.000000e+00> : vector<16x8xf32>
    %29 = tpu.matmul %5, %28, %cst_25 {dimension_numbers = #tpu.dot_dimension_numbers<[1], [0], [0], [1], [0, 0, 1, 1], [], []>} : vector<16x32xbf16>, vector<32x8xbf16>, vector<16x8xf32> -> vector<16x8xf32>
    %c0_26 = arith.constant 0 : index
    %c0_27 = arith.constant 0 : index
    %c0_28 = arith.constant 0 : index
    %30 = vector.load %arg9[%c0_26, %c0_27, %c0_28] : memref<4x1x8xf32, #tpu.memory_space<vmem>>, vector<1x1x8xf32>
    %31 = vector.shape_cast %30 : vector<1x1x8xf32> to vector<1x8xf32>
    %32 = vector.broadcast %31 : vector<1x8xf32> to vector<16x8xf32>
    %33 = arith.addf %29, %32 : vector<16x8xf32>
    %34 = arith.truncf %33 : vector<16x8xf32> to vector<16x8xbf16>
    %35 = vector.shape_cast %34 : vector<16x8xbf16> to vector<2x8x8xbf16>
    "tpu.trace_start"() <{level = 10 : i32, message = "bqd,bkd->bqk"}> : () -> ()
    %cst_29 = arith.constant dense<0.000000e+00> : vector<2x8x8xf32>
    %36 = tpu.matmul %17, %26, %cst_29 {dimension_numbers = #tpu.dot_dimension_numbers<[2], [2], [1], [1], [0, 0, 0, 1, 1, 1], [0], [0]>} : vector<2x8x8xbf16>, vector<2x8x8xbf16>, vector<2x8x8xf32> -> vector<2x8x8xf32>
    "tpu.trace_stop"() : () -> ()
    %37 = vector.broadcast %7 : vector<1x8x8xf32> to vector<2x8x8xf32>
    %38 = arith.addf %36, %37 : vector<2x8x8xf32>
    %cst_30 = arith.constant dense<0xFF800000> : vector<2x8xf32>
    %39 = vector.multi_reduction <maximumf>, %38, %cst_30 [2] : vector<2x8x8xf32> to vector<2x8xf32>
    %40 = vector.shape_cast %39 : vector<2x8xf32> to vector<2x8x1xf32>
    %41 = vector.broadcast %40 : vector<2x8x1xf32> to vector<2x8x8xf32>
    %42 = arith.subf %38, %41 : vector<2x8x8xf32>
    %43 = math.exp %42 : vector<2x8x8xf32>
    %cst_31 = arith.constant dense<0.000000e+00> : vector<2x8xf32>
    %44 = vector.multi_reduction <add>, %43, %cst_31 [2] : vector<2x8x8xf32> to vector<2x8xf32>
    %45 = vector.shape_cast %44 : vector<2x8xf32> to vector<2x8x1xf32>
    %46 = tpu.reciprocal %45 {approx = true} : vector<2x8x1xf32> -> vector<2x8x1xf32>
    %47 = vector.broadcast %46 : vector<2x8x1xf32> to vector<2x8x8xf32>
    %48 = arith.mulf %43, %47 : vector<2x8x8xf32>
    %49 = arith.truncf %48 : vector<2x8x8xf32> to vector<2x8x8xbf16>
    "tpu.trace_start"() <{level = 10 : i32, message = "bqk,bkd->bqd"}> : () -> ()
    %cst_32 = arith.constant dense<0.000000e+00> : vector<2x8x8xf32>
    %50 = tpu.matmul %49, %35, %cst_32 {dimension_numbers = #tpu.dot_dimension_numbers<[2], [1], [1], [2], [0, 0, 0, 1, 1, 2], [0], [0]>} : vector<2x8x8xbf16>, vector<2x8x8xbf16>, vector<2x8x8xf32> -> vector<2x8x8xf32>
    "tpu.trace_stop"() : () -> ()
    %51 = vector.shape_cast %50 : vector<2x8x8xf32> to vector<16x8xf32>
    %52 = arith.truncf %51 : vector<16x8xf32> to vector<16x8xbf16>
    %c0_33 = arith.constant 0 : index
    %c0_34 = arith.constant 0 : index
    %c0_35 = arith.constant 0 : index
    %53 = vector.load %arg10[%c0_33, %c0_34, %c0_35] : memref<4x8x32xbf16, #tpu.memory_space<vmem>>, vector<1x8x32xbf16>
    %54 = vector.shape_cast %53 : vector<1x8x32xbf16> to vector<8x32xbf16>
    %cst_36 = arith.constant dense<0.000000e+00> : vector<16x32xf32>
    %55 = tpu.matmul %52, %54, %cst_36 {dimension_numbers = #tpu.dot_dimension_numbers<[1], [0], [0], [1], [0, 0, 1, 1], [], []>} : vector<16x8xbf16>, vector<8x32xbf16>, vector<16x32xf32> -> vector<16x32xf32>
    %56 = arith.addf %8, %55 : vector<16x32xf32>
    %c1 = arith.constant 1 : index
    %c0_37 = arith.constant 0 : index
    %c0_38 = arith.constant 0 : index
    %57 = vector.load %arg4[%c1, %c0_37, %c0_38] : memref<4x32x8xbf16, #tpu.memory_space<vmem>>, vector<1x32x8xbf16>
    %58 = vector.shape_cast %57 : vector<1x32x8xbf16> to vector<32x8xbf16>
    %cst_39 = arith.constant dense<0.000000e+00> : vector<16x8xf32>
    %59 = tpu.matmul %2, %58, %cst_39 {dimension_numbers = #tpu.dot_dimension_numbers<[1], [0], [0], [1], [0, 0, 1, 1], [], []>} : vector<16x32xbf16>, vector<32x8xbf16>, vector<16x8xf32> -> vector<16x8xf32>
    %c1_40 = arith.constant 1 : index
    %c0_41 = arith.constant 0 : index
    %c0_42 = arith.constant 0 : index
    %60 = vector.load %arg5[%c1_40, %c0_41, %c0_42] : memref<4x1x8xf32, #tpu.memory_space<vmem>>, vector<1x1x8xf32>
    %61 = vector.shape_cast %60 : vector<1x1x8xf32> to vector<1x8xf32>
    %62 = vector.broadcast %61 : vector<1x8xf32> to vector<16x8xf32>
    %63 = arith.addf %59, %62 : vector<16x8xf32>
    %64 = arith.truncf %63 : vector<16x8xf32> to vector<16x8xbf16>
    %65 = vector.shape_cast %64 : vector<16x8xbf16> to vector<2x8x8xbf16>
    %c1_43 = arith.constant 1 : index
    %c0_44 = arith.constant 0 : index
    %c0_45 = arith.constant 0 : index
    %66 = vector.load %arg6[%c1_43, %c0_44, %c0_45] : memref<4x32x8xbf16, #tpu.memory_space<vmem>>, vector<1x32x8xbf16>
    %67 = vector.shape_cast %66 : vector<1x32x8xbf16> to vector<32x8xbf16>
    %cst_46 = arith.constant dense<0.000000e+00> : vector<16x8xf32>
    %68 = tpu.matmul %5, %67, %cst_46 {dimension_numbers = #tpu.dot_dimension_numbers<[1], [0], [0], [1], [0, 0, 1, 1], [], []>} : vector<16x32xbf16>, vector<32x8xbf16>, vector<16x8xf32> -> vector<16x8xf32>
    %c1_47 = arith.constant 1 : index
    %c0_48 = arith.constant 0 : index
    %c0_49 = arith.constant 0 : index
    %69 = vector.load %arg7[%c1_47, %c0_48, %c0_49] : memref<4x1x8xf32, #tpu.memory_space<vmem>>, vector<1x1x8xf32>
    %70 = vector.shape_cast %69 : vector<1x1x8xf32> to vector<1x8xf32>
    %71 = vector.broadcast %70 : vector<1x8xf32> to vector<16x8xf32>
    %72 = arith.addf %68, %71 : vector<16x8xf32>
    %73 = arith.truncf %72 : vector<16x8xf32> to vector<16x8xbf16>
    %74 = vector.shape_cast %73 : vector<16x8xbf16> to vector<2x8x8xbf16>
    %c1_50 = arith.constant 1 : index
    %c0_51 = arith.constant 0 : index
    %c0_52 = arith.constant 0 : index
    %75 = vector.load %arg8[%c1_50, %c0_51, %c0_52] : memref<4x32x8xbf16, #tpu.memory_space<vmem>>, vector<1x32x8xbf16>
    %76 = vector.shape_cast %75 : vector<1x32x8xbf16> to vector<32x8xbf16>
    %cst_53 = arith.constant dense<0.000000e+00> : vector<16x8xf32>
    %77 = tpu.matmul %5, %76, %cst_53 {dimension_numbers = #tpu.dot_dimension_numbers<[1], [0], [0], [1], [0, 0, 1, 1], [], []>} : vector<16x32xbf16>, vector<32x8xbf16>, vector<16x8xf32> -> vector<16x8xf32>
    %c1_54 = arith.constant 1 : index
    %c0_55 = arith.constant 0 : index
    %c0_56 = arith.constant 0 : index
    %78 = vector.load %arg9[%c1_54, %c0_55, %c0_56] : memref<4x1x8xf32, #tpu.memory_space<vmem>>, vector<1x1x8xf32>
    %79 = vector.shape_cast %78 : vector<1x1x8xf32> to vector<1x8xf32>
    %80 = vector.broadcast %79 : vector<1x8xf32> to vector<16x8xf32>
    %81 = arith.addf %77, %80 : vector<16x8xf32>
    %82 = arith.truncf %81 : vector<16x8xf32> to vector<16x8xbf16>
    %83 = vector.shape_cast %82 : vector<16x8xbf16> to vector<2x8x8xbf16>
    "tpu.trace_start"() <{level = 10 : i32, message = "bqd,bkd->bqk"}> : () -> ()
    %cst_57 = arith.constant dense<0.000000e+00> : vector<2x8x8xf32>
    %84 = tpu.matmul %65, %74, %cst_57 {dimension_numbers = #tpu.dot_dimension_numbers<[2], [2], [1], [1], [0, 0, 0, 1, 1, 1], [0], [0]>} : vector<2x8x8xbf16>, vector<2x8x8xbf16>, vector<2x8x8xf32> -> vector<2x8x8xf32>
    "tpu.trace_stop"() : () -> ()
    %85 = vector.broadcast %7 : vector<1x8x8xf32> to vector<2x8x8xf32>
    %86 = arith.addf %84, %85 : vector<2x8x8xf32>
    %cst_58 = arith.constant dense<0xFF800000> : vector<2x8xf32>
    %87 = vector.multi_reduction <maximumf>, %86, %cst_58 [2] : vector<2x8x8xf32> to vector<2x8xf32>
    %88 = vector.shape_cast %87 : vector<2x8xf32> to vector<2x8x1xf32>
    %89 = vector.broadcast %88 : vector<2x8x1xf32> to vector<2x8x8xf32>
    %90 = arith.subf %86, %89 : vector<2x8x8xf32>
    %91 = math.exp %90 : vector<2x8x8xf32>
    %cst_59 = arith.constant dense<0.000000e+00> : vector<2x8xf32>
    %92 = vector.multi_reduction <add>, %91, %cst_59 [2] : vector<2x8x8xf32> to vector<2x8xf32>
    %93 = vector.shape_cast %92 : vector<2x8xf32> to vector<2x8x1xf32>
    %94 = tpu.reciprocal %93 {approx = true} : vector<2x8x1xf32> -> vector<2x8x1xf32>
    %95 = vector.broadcast %94 : vector<2x8x1xf32> to vector<2x8x8xf32>
    %96 = arith.mulf %91, %95 : vector<2x8x8xf32>
    %97 = arith.truncf %96 : vector<2x8x8xf32> to vector<2x8x8xbf16>
    "tpu.trace_start"() <{level = 10 : i32, message = "bqk,bkd->bqd"}> : () -> ()
    %cst_60 = arith.constant dense<0.000000e+00> : vector<2x8x8xf32>
    %98 = tpu.matmul %97, %83, %cst_60 {dimension_numbers = #tpu.dot_dimension_numbers<[2], [1], [1], [2], [0, 0, 0, 1, 1, 2], [0], [0]>} : vector<2x8x8xbf16>, vector<2x8x8xbf16>, vector<2x8x8xf32> -> vector<2x8x8xf32>
    "tpu.trace_stop"() : () -> ()
    %99 = vector.shape_cast %98 : vector<2x8x8xf32> to vector<16x8xf32>
    %100 = arith.truncf %99 : vector<16x8xf32> to vector<16x8xbf16>
    %c1_61 = arith.constant 1 : index
    %c0_62 = arith.constant 0 : index
    %c0_63 = arith.constant 0 : index
    %101 = vector.load %arg10[%c1_61, %c0_62, %c0_63] : memref<4x8x32xbf16, #tpu.memory_space<vmem>>, vector<1x8x32xbf16>
    %102 = vector.shape_cast %101 : vector<1x8x32xbf16> to vector<8x32xbf16>
    %cst_64 = arith.constant dense<0.000000e+00> : vector<16x32xf32>
    %103 = tpu.matmul %100, %102, %cst_64 {dimension_numbers = #tpu.dot_dimension_numbers<[1], [0], [0], [1], [0, 0, 1, 1], [], []>} : vector<16x8xbf16>, vector<8x32xbf16>, vector<16x32xf32> -> vector<16x32xf32>
    %104 = arith.addf %56, %103 : vector<16x32xf32>
    %c2 = arith.constant 2 : index
    %c0_65 = arith.constant 0 : index
    %c0_66 = arith.constant 0 : index
    %105 = vector.load %arg4[%c2, %c0_65, %c0_66] : memref<4x32x8xbf16, #tpu.memory_space<vmem>>, vector<1x32x8xbf16>
    %106 = vector.shape_cast %105 : vector<1x32x8xbf16> to vector<32x8xbf16>
    %cst_67 = arith.constant dense<0.000000e+00> : vector<16x8xf32>
    %107 = tpu.matmul %2, %106, %cst_67 {dimension_numbers = #tpu.dot_dimension_numbers<[1], [0], [0], [1], [0, 0, 1, 1], [], []>} : vector<16x32xbf16>, vector<32x8xbf16>, vector<16x8xf32> -> vector<16x8xf32>
    %c2_68 = arith.constant 2 : index
    %c0_69 = arith.constant 0 : index
    %c0_70 = arith.constant 0 : index
    %108 = vector.load %arg5[%c2_68, %c0_69, %c0_70] : memref<4x1x8xf32, #tpu.memory_space<vmem>>, vector<1x1x8xf32>
    %109 = vector.shape_cast %108 : vector<1x1x8xf32> to vector<1x8xf32>
    %110 = vector.broadcast %109 : vector<1x8xf32> to vector<16x8xf32>
    %111 = arith.addf %107, %110 : vector<16x8xf32>
    %112 = arith.truncf %111 : vector<16x8xf32> to vector<16x8xbf16>
    %113 = vector.shape_cast %112 : vector<16x8xbf16> to vector<2x8x8xbf16>
    %c2_71 = arith.constant 2 : index
    %c0_72 = arith.constant 0 : index
    %c0_73 = arith.constant 0 : index
    %114 = vector.load %arg6[%c2_71, %c0_72, %c0_73] : memref<4x32x8xbf16, #tpu.memory_space<vmem>>, vector<1x32x8xbf16>
    %115 = vector.shape_cast %114 : vector<1x32x8xbf16> to vector<32x8xbf16>
    %cst_74 = arith.constant dense<0.000000e+00> : vector<16x8xf32>
    %116 = tpu.matmul %5, %115, %cst_74 {dimension_numbers = #tpu.dot_dimension_numbers<[1], [0], [0], [1], [0, 0, 1, 1], [], []>} : vector<16x32xbf16>, vector<32x8xbf16>, vector<16x8xf32> -> vector<16x8xf32>
    %c2_75 = arith.constant 2 : index
    %c0_76 = arith.constant 0 : index
    %c0_77 = arith.constant 0 : index
    %117 = vector.load %arg7[%c2_75, %c0_76, %c0_77] : memref<4x1x8xf32, #tpu.memory_space<vmem>>, vector<1x1x8xf32>
    %118 = vector.shape_cast %117 : vector<1x1x8xf32> to vector<1x8xf32>
    %119 = vector.broadcast %118 : vector<1x8xf32> to vector<16x8xf32>
    %120 = arith.addf %116, %119 : vector<16x8xf32>
    %121 = arith.truncf %120 : vector<16x8xf32> to vector<16x8xbf16>
    %122 = vector.shape_cast %121 : vector<16x8xbf16> to vector<2x8x8xbf16>
    %c2_78 = arith.constant 2 : index
    %c0_79 = arith.constant 0 : index
    %c0_80 = arith.constant 0 : index
    %123 = vector.load %arg8[%c2_78, %c0_79, %c0_80] : memref<4x32x8xbf16, #tpu.memory_space<vmem>>, vector<1x32x8xbf16>
    %124 = vector.shape_cast %123 : vector<1x32x8xbf16> to vector<32x8xbf16>
    %cst_81 = arith.constant dense<0.000000e+00> : vector<16x8xf32>
    %125 = tpu.matmul %5, %124, %cst_81 {dimension_numbers = #tpu.dot_dimension_numbers<[1], [0], [0], [1], [0, 0, 1, 1], [], []>} : vector<16x32xbf16>, vector<32x8xbf16>, vector<16x8xf32> -> vector<16x8xf32>
    %c2_82 = arith.constant 2 : index
    %c0_83 = arith.constant 0 : index
    %c0_84 = arith.constant 0 : index
    %126 = vector.load %arg9[%c2_82, %c0_83, %c0_84] : memref<4x1x8xf32, #tpu.memory_space<vmem>>, vector<1x1x8xf32>
    %127 = vector.shape_cast %126 : vector<1x1x8xf32> to vector<1x8xf32>
    %128 = vector.broadcast %127 : vector<1x8xf32> to vector<16x8xf32>
    %129 = arith.addf %125, %128 : vector<16x8xf32>
    %130 = arith.truncf %129 : vector<16x8xf32> to vector<16x8xbf16>
    %131 = vector.shape_cast %130 : vector<16x8xbf16> to vector<2x8x8xbf16>
    "tpu.trace_start"() <{level = 10 : i32, message = "bqd,bkd->bqk"}> : () -> ()
    %cst_85 = arith.constant dense<0.000000e+00> : vector<2x8x8xf32>
    %132 = tpu.matmul %113, %122, %cst_85 {dimension_numbers = #tpu.dot_dimension_numbers<[2], [2], [1], [1], [0, 0, 0, 1, 1, 1], [0], [0]>} : vector<2x8x8xbf16>, vector<2x8x8xbf16>, vector<2x8x8xf32> -> vector<2x8x8xf32>
    "tpu.trace_stop"() : () -> ()
    %133 = vector.broadcast %7 : vector<1x8x8xf32> to vector<2x8x8xf32>
    %134 = arith.addf %132, %133 : vector<2x8x8xf32>
    %cst_86 = arith.constant dense<0xFF800000> : vector<2x8xf32>
    %135 = vector.multi_reduction <maximumf>, %134, %cst_86 [2] : vector<2x8x8xf32> to vector<2x8xf32>
    %136 = vector.shape_cast %135 : vector<2x8xf32> to vector<2x8x1xf32>
    %137 = vector.broadcast %136 : vector<2x8x1xf32> to vector<2x8x8xf32>
    %138 = arith.subf %134, %137 : vector<2x8x8xf32>
    %139 = math.exp %138 : vector<2x8x8xf32>
    %cst_87 = arith.constant dense<0.000000e+00> : vector<2x8xf32>
    %140 = vector.multi_reduction <add>, %139, %cst_87 [2] : vector<2x8x8xf32> to vector<2x8xf32>
    %141 = vector.shape_cast %140 : vector<2x8xf32> to vector<2x8x1xf32>
    %142 = tpu.reciprocal %141 {approx = true} : vector<2x8x1xf32> -> vector<2x8x1xf32>
    %143 = vector.broadcast %142 : vector<2x8x1xf32> to vector<2x8x8xf32>
    %144 = arith.mulf %139, %143 : vector<2x8x8xf32>
    %145 = arith.truncf %144 : vector<2x8x8xf32> to vector<2x8x8xbf16>
    "tpu.trace_start"() <{level = 10 : i32, message = "bqk,bkd->bqd"}> : () -> ()
    %cst_88 = arith.constant dense<0.000000e+00> : vector<2x8x8xf32>
    %146 = tpu.matmul %145, %131, %cst_88 {dimension_numbers = #tpu.dot_dimension_numbers<[2], [1], [1], [2], [0, 0, 0, 1, 1, 2], [0], [0]>} : vector<2x8x8xbf16>, vector<2x8x8xbf16>, vector<2x8x8xf32> -> vector<2x8x8xf32>
    "tpu.trace_stop"() : () -> ()
    %147 = vector.shape_cast %146 : vector<2x8x8xf32> to vector<16x8xf32>
    %148 = arith.truncf %147 : vector<16x8xf32> to vector<16x8xbf16>
    %c2_89 = arith.constant 2 : index
    %c0_90 = arith.constant 0 : index
    %c0_91 = arith.constant 0 : index
    %149 = vector.load %arg10[%c2_89, %c0_90, %c0_91] : memref<4x8x32xbf16, #tpu.memory_space<vmem>>, vector<1x8x32xbf16>
    %150 = vector.shape_cast %149 : vector<1x8x32xbf16> to vector<8x32xbf16>
    %cst_92 = arith.constant dense<0.000000e+00> : vector<16x32xf32>
    %151 = tpu.matmul %148, %150, %cst_92 {dimension_numbers = #tpu.dot_dimension_numbers<[1], [0], [0], [1], [0, 0, 1, 1], [], []>} : vector<16x8xbf16>, vector<8x32xbf16>, vector<16x32xf32> -> vector<16x32xf32>
    %152 = arith.addf %104, %151 : vector<16x32xf32>
    %c3 = arith.constant 3 : index
    %c0_93 = arith.constant 0 : index
    %c0_94 = arith.constant 0 : index
    %153 = vector.load %arg4[%c3, %c0_93, %c0_94] : memref<4x32x8xbf16, #tpu.memory_space<vmem>>, vector<1x32x8xbf16>
    %154 = vector.shape_cast %153 : vector<1x32x8xbf16> to vector<32x8xbf16>
    %cst_95 = arith.constant dense<0.000000e+00> : vector<16x8xf32>
    %155 = tpu.matmul %2, %154, %cst_95 {dimension_numbers = #tpu.dot_dimension_numbers<[1], [0], [0], [1], [0, 0, 1, 1], [], []>} : vector<16x32xbf16>, vector<32x8xbf16>, vector<16x8xf32> -> vector<16x8xf32>
    %c3_96 = arith.constant 3 : index
    %c0_97 = arith.constant 0 : index
    %c0_98 = arith.constant 0 : index
    %156 = vector.load %arg5[%c3_96, %c0_97, %c0_98] : memref<4x1x8xf32, #tpu.memory_space<vmem>>, vector<1x1x8xf32>
    %157 = vector.shape_cast %156 : vector<1x1x8xf32> to vector<1x8xf32>
    %158 = vector.broadcast %157 : vector<1x8xf32> to vector<16x8xf32>
    %159 = arith.addf %155, %158 : vector<16x8xf32>
    %160 = arith.truncf %159 : vector<16x8xf32> to vector<16x8xbf16>
    %161 = vector.shape_cast %160 : vector<16x8xbf16> to vector<2x8x8xbf16>
    %c3_99 = arith.constant 3 : index
    %c0_100 = arith.constant 0 : index
    %c0_101 = arith.constant 0 : index
    %162 = vector.load %arg6[%c3_99, %c0_100, %c0_101] : memref<4x32x8xbf16, #tpu.memory_space<vmem>>, vector<1x32x8xbf16>
    %163 = vector.shape_cast %162 : vector<1x32x8xbf16> to vector<32x8xbf16>
    %cst_102 = arith.constant dense<0.000000e+00> : vector<16x8xf32>
    %164 = tpu.matmul %5, %163, %cst_102 {dimension_numbers = #tpu.dot_dimension_numbers<[1], [0], [0], [1], [0, 0, 1, 1], [], []>} : vector<16x32xbf16>, vector<32x8xbf16>, vector<16x8xf32> -> vector<16x8xf32>
    %c3_103 = arith.constant 3 : index
    %c0_104 = arith.constant 0 : index
    %c0_105 = arith.constant 0 : index
    %165 = vector.load %arg7[%c3_103, %c0_104, %c0_105] : memref<4x1x8xf32, #tpu.memory_space<vmem>>, vector<1x1x8xf32>
    %166 = vector.shape_cast %165 : vector<1x1x8xf32> to vector<1x8xf32>
    %167 = vector.broadcast %166 : vector<1x8xf32> to vector<16x8xf32>
    %168 = arith.addf %164, %167 : vector<16x8xf32>
    %169 = arith.truncf %168 : vector<16x8xf32> to vector<16x8xbf16>
    %170 = vector.shape_cast %169 : vector<16x8xbf16> to vector<2x8x8xbf16>
    %c3_106 = arith.constant 3 : index
    %c0_107 = arith.constant 0 : index
    %c0_108 = arith.constant 0 : index
    %171 = vector.load %arg8[%c3_106, %c0_107, %c0_108] : memref<4x32x8xbf16, #tpu.memory_space<vmem>>, vector<1x32x8xbf16>
    %172 = vector.shape_cast %171 : vector<1x32x8xbf16> to vector<32x8xbf16>
    %cst_109 = arith.constant dense<0.000000e+00> : vector<16x8xf32>
    %173 = tpu.matmul %5, %172, %cst_109 {dimension_numbers = #tpu.dot_dimension_numbers<[1], [0], [0], [1], [0, 0, 1, 1], [], []>} : vector<16x32xbf16>, vector<32x8xbf16>, vector<16x8xf32> -> vector<16x8xf32>
    %c3_110 = arith.constant 3 : index
    %c0_111 = arith.constant 0 : index
    %c0_112 = arith.constant 0 : index
    %174 = vector.load %arg9[%c3_110, %c0_111, %c0_112] : memref<4x1x8xf32, #tpu.memory_space<vmem>>, vector<1x1x8xf32>
    %175 = vector.shape_cast %174 : vector<1x1x8xf32> to vector<1x8xf32>
    %176 = vector.broadcast %175 : vector<1x8xf32> to vector<16x8xf32>
    %177 = arith.addf %173, %176 : vector<16x8xf32>
    %178 = arith.truncf %177 : vector<16x8xf32> to vector<16x8xbf16>
    %179 = vector.shape_cast %178 : vector<16x8xbf16> to vector<2x8x8xbf16>
    "tpu.trace_start"() <{level = 10 : i32, message = "bqd,bkd->bqk"}> : () -> ()
    %cst_113 = arith.constant dense<0.000000e+00> : vector<2x8x8xf32>
    %180 = tpu.matmul %161, %170, %cst_113 {dimension_numbers = #tpu.dot_dimension_numbers<[2], [2], [1], [1], [0, 0, 0, 1, 1, 1], [0], [0]>} : vector<2x8x8xbf16>, vector<2x8x8xbf16>, vector<2x8x8xf32> -> vector<2x8x8xf32>
    "tpu.trace_stop"() : () -> ()
    %181 = vector.broadcast %7 : vector<1x8x8xf32> to vector<2x8x8xf32>
    %182 = arith.addf %180, %181 : vector<2x8x8xf32>
    %cst_114 = arith.constant dense<0xFF800000> : vector<2x8xf32>
    %183 = vector.multi_reduction <maximumf>, %182, %cst_114 [2] : vector<2x8x8xf32> to vector<2x8xf32>
    %184 = vector.shape_cast %183 : vector<2x8xf32> to vector<2x8x1xf32>
    %185 = vector.broadcast %184 : vector<2x8x1xf32> to vector<2x8x8xf32>
    %186 = arith.subf %182, %185 : vector<2x8x8xf32>
    %187 = math.exp %186 : vector<2x8x8xf32>
    %cst_115 = arith.constant dense<0.000000e+00> : vector<2x8xf32>
    %188 = vector.multi_reduction <add>, %187, %cst_115 [2] : vector<2x8x8xf32> to vector<2x8xf32>
    %189 = vector.shape_cast %188 : vector<2x8xf32> to vector<2x8x1xf32>
    %190 = tpu.reciprocal %189 {approx = true} : vector<2x8x1xf32> -> vector<2x8x1xf32>
    %191 = vector.broadcast %190 : vector<2x8x1xf32> to vector<2x8x8xf32>
    %192 = arith.mulf %187, %191 : vector<2x8x8xf32>
    %193 = arith.truncf %192 : vector<2x8x8xf32> to vector<2x8x8xbf16>
    "tpu.trace_start"() <{level = 10 : i32, message = "bqk,bkd->bqd"}> : () -> ()
    %cst_116 = arith.constant dense<0.000000e+00> : vector<2x8x8xf32>
    %194 = tpu.matmul %193, %179, %cst_116 {dimension_numbers = #tpu.dot_dimension_numbers<[2], [1], [1], [2], [0, 0, 0, 1, 1, 2], [0], [0]>} : vector<2x8x8xbf16>, vector<2x8x8xbf16>, vector<2x8x8xf32> -> vector<2x8x8xf32>
    "tpu.trace_stop"() : () -> ()
    %195 = vector.shape_cast %194 : vector<2x8x8xf32> to vector<16x8xf32>
    %196 = arith.truncf %195 : vector<16x8xf32> to vector<16x8xbf16>
    %c3_117 = arith.constant 3 : index
    %c0_118 = arith.constant 0 : index
    %c0_119 = arith.constant 0 : index
    %197 = vector.load %arg10[%c3_117, %c0_118, %c0_119] : memref<4x8x32xbf16, #tpu.memory_space<vmem>>, vector<1x8x32xbf16>
    %198 = vector.shape_cast %197 : vector<1x8x32xbf16> to vector<8x32xbf16>
    %cst_120 = arith.constant dense<0.000000e+00> : vector<16x32xf32>
    %199 = tpu.matmul %196, %198, %cst_120 {dimension_numbers = #tpu.dot_dimension_numbers<[1], [0], [0], [1], [0, 0, 1, 1], [], []>} : vector<16x8xbf16>, vector<8x32xbf16>, vector<16x32xf32> -> vector<16x32xf32>
    %200 = arith.addf %152, %199 : vector<16x32xf32>
    %c0_121 = arith.constant 0 : index
    %c0_122 = arith.constant 0 : index
    %201 = vector.load %arg11[%c0_121, %c0_122] : memref<1x32xf32, #tpu.memory_space<vmem>>, vector<1x32xf32>
    %202 = vector.broadcast %201 : vector<1x32xf32> to vector<16x32xf32>
    %203 = arith.addf %200, %202 : vector<16x32xf32>
    %204 = arith.addf %203, %1 : vector<16x32xf32>
    %cst_123 = arith.constant dense<0.000000e+00> : vector<16xf32>
    %205 = vector.multi_reduction <add>, %204, %cst_123 [1] : vector<16x32xf32> to vector<16xf32>
    %206 = vector.shape_cast %205 : vector<16xf32> to vector<16x1xf32>
    %cst_124 = arith.constant 3.200000e+01 : f32
    %207 = vector.broadcast %cst_124 : f32 to vector<16x1xf32>
    %208 = arith.divf %206, %207 : vector<16x1xf32>
    %209 = vector.broadcast %208 : vector<16x1xf32> to vector<16x32xf32>
    %210 = arith.subf %204, %209 : vector<16x32xf32>
    %211 = arith.mulf %210, %210 : vector<16x32xf32>
    %cst_125 = arith.constant dense<0.000000e+00> : vector<16xf32>
    %212 = vector.multi_reduction <add>, %211, %cst_125 [1] : vector<16x32xf32> to vector<16xf32>
    %213 = vector.shape_cast %212 : vector<16xf32> to vector<16x1xf32>
    %cst_126 = arith.constant 3.200000e+01 : f32
    %214 = vector.broadcast %cst_126 : f32 to vector<16x1xf32>
    %215 = arith.divf %213, %214 : vector<16x1xf32>
    %cst_127 = arith.constant 9.99999997E-7 : f32
    %216 = vector.broadcast %cst_127 : f32 to vector<16x1xf32>
    %217 = arith.addf %215, %216 : vector<16x1xf32>
    %218 = math.rsqrt %217 : vector<16x1xf32>
    %219 = vector.broadcast %218 : vector<16x1xf32> to vector<16x32xf32>
    %220 = arith.mulf %210, %219 : vector<16x32xf32>
    %c0_128 = arith.constant 0 : index
    %c0_129 = arith.constant 0 : index
    %221 = vector.load %arg12[%c0_128, %c0_129] : memref<1x32xf32, #tpu.memory_space<vmem>>, vector<1x32xf32>
    %222 = vector.broadcast %221 : vector<1x32xf32> to vector<16x32xf32>
    %223 = arith.mulf %220, %222 : vector<16x32xf32>
    %c0_130 = arith.constant 0 : index
    %c0_131 = arith.constant 0 : index
    %224 = vector.load %arg13[%c0_130, %c0_131] : memref<1x32xf32, #tpu.memory_space<vmem>>, vector<1x32xf32>
    %225 = vector.broadcast %224 : vector<1x32xf32> to vector<16x32xf32>
    %226 = arith.addf %223, %225 : vector<16x32xf32>
    %227 = arith.truncf %226 : vector<16x32xf32> to vector<16x32xbf16>
    %c0_132 = arith.constant 0 : index
    %c0_133 = arith.constant 0 : index
    %228 = vector.load %arg14[%c0_132, %c0_133] : memref<32x64xbf16, #tpu.memory_space<vmem>>, vector<32x64xbf16>
    %cst_134 = arith.constant dense<0.000000e+00> : vector<16x64xf32>
    %229 = tpu.matmul %227, %228, %cst_134 {dimension_numbers = #tpu.dot_dimension_numbers<[1], [0], [0], [1], [0, 0, 1, 1], [], []>} : vector<16x32xbf16>, vector<32x64xbf16>, vector<16x64xf32> -> vector<16x64xf32>
    %c0_135 = arith.constant 0 : index
    %c0_136 = arith.constant 0 : index
    %230 = vector.load %arg15[%c0_135, %c0_136] : memref<1x64xf32, #tpu.memory_space<vmem>>, vector<1x64xf32>
    %231 = vector.broadcast %230 : vector<1x64xf32> to vector<16x64xf32>
    %232 = arith.addf %229, %231 : vector<16x64xf32>
    %cst_137 = arith.constant 0.000000e+00 : f32
    %233 = vector.broadcast %cst_137 : f32 to vector<16x64xf32>
    %234 = arith.maximumf %232, %233 : vector<16x64xf32>
    %235 = arith.truncf %234 : vector<16x64xf32> to vector<16x64xbf16>
    %c0_138 = arith.constant 0 : index
    %c0_139 = arith.constant 0 : index
    %236 = vector.load %arg16[%c0_138, %c0_139] : memref<64x32xbf16, #tpu.memory_space<vmem>>, vector<64x32xbf16>
    %cst_140 = arith.constant dense<0.000000e+00> : vector<16x32xf32>
    %237 = tpu.matmul %235, %236, %cst_140 {dimension_numbers = #tpu.dot_dimension_numbers<[1], [0], [0], [1], [0, 0, 1, 1], [], []>} : vector<16x64xbf16>, vector<64x32xbf16>, vector<16x32xf32> -> vector<16x32xf32>
    %c0_141 = arith.constant 0 : index
    %c0_142 = arith.constant 0 : index
    %238 = vector.load %arg17[%c0_141, %c0_142] : memref<1x32xf32, #tpu.memory_space<vmem>>, vector<1x32xf32>
    %239 = vector.broadcast %238 : vector<1x32xf32> to vector<16x32xf32>
    %240 = arith.addf %237, %239 : vector<16x32xf32>
    %241 = arith.addf %240, %204 : vector<16x32xf32>
    %242 = vector.shape_cast %241 : vector<16x32xf32> to vector<2x8x32xf32>
    %c0_143 = arith.constant 0 : index
    %c0_144 = arith.constant 0 : index
    %c0_145 = arith.constant 0 : index
    %243 = vector.load %arg18[%c0_143, %c0_144, %c0_145] : memref<2x8x32xf32, #tpu.memory_space<vmem>>, vector<2x8x32xf32>
    tpu.vector_store %arg18[%c0_143, %c0_144, %c0_145], %242 {strides = array<i32>} : memref<2x8x32xf32, #tpu.memory_space<vmem>>, vector<2x8x32xf32>,
    return
  }
  func.func @transform_0(%arg0: i32) -> (i32, i32, i32) {
    %c0_i32 = arith.constant 0 : i32
    %c0_i32_0 = arith.constant 0 : i32
    %c0_i32_1 = arith.constant 0 : i32
    return %arg0, %c0_i32, %c0_i32_0 : i32, i32, i32
  }
  func.func @transform_1(%arg0: i32) -> (i32, i32, i32) {
    %c0_i32 = arith.constant 0 : i32
    %c0_i32_0 = arith.constant 0 : i32
    %c0_i32_1 = arith.constant 0 : i32
    return %arg0, %c0_i32, %c0_i32_0 : i32, i32, i32
  }
  func.func @transform_2(%arg0: i32) -> (i32, i32, i32) {
    %c0_i32 = arith.constant 0 : i32
    %c0_i32_0 = arith.constant 0 : i32
    %c0_i32_1 = arith.constant 0 : i32
    %c0_i32_2 = arith.constant 0 : i32
    return %c0_i32, %c0_i32_0, %c0_i32_1 : i32, i32, i32
  }
  func.func @transform_3(%arg0: i32) -> (i32, i32, i32) {
    %c0_i32 = arith.constant 0 : i32
    %c0_i32_0 = arith.constant 0 : i32
    %c0_i32_1 = arith.constant 0 : i32
    %c0_i32_2 = arith.constant 0 : i32
    return %c0_i32, %c0_i32_0, %c0_i32_1 : i32, i32, i32
  }
  func.func @transform_4(%arg0: i32) -> (i32, i32, i32) {
    %c0_i32 = arith.constant 0 : i32
    %c0_i32_0 = arith.constant 0 : i32
    %c0_i32_1 = arith.constant 0 : i32
    %c0_i32_2 = arith.constant 0 : i32
    return %c0_i32, %c0_i32_0, %c0_i32_1 : i32, i32, i32
  }
  func.func @transform_5(%arg0: i32) -> (i32, i32, i32) {
    %c0_i32 = arith.constant 0 : i32
    %c0_i32_0 = arith.constant 0 : i32
    %c0_i32_1 = arith.constant 0 : i32
    %c0_i32_2 = arith.constant 0 : i32
    return %c0_i32, %c0_i32_0, %c0_i32_1 : i32, i32, i32
  }
  func.func @transform_6(%arg0: i32) -> (i32, i32, i32) {
    %c0_i32 = arith.constant 0 : i32
    %c0_i32_0 = arith.constant 0 : i32
    %c0_i32_1 = arith.constant 0 : i32
    %c0_i32_2 = arith.constant 0 : i32
    return %c0_i32, %c0_i32_0, %c0_i32_1 : i32, i32, i32
  }
  func.func @transform_7(%arg0: i32) -> (i32, i32, i32) {
    %c0_i32 = arith.constant 0 : i32
    %c0_i32_0 = arith.constant 0 : i32
    %c0_i32_1 = arith.constant 0 : i32
    %c0_i32_2 = arith.constant 0 : i32
    return %c0_i32, %c0_i32_0, %c0_i32_1 : i32, i32, i32
  }
  func.func @transform_8(%arg0: i32) -> (i32, i32, i32) {
    %c0_i32 = arith.constant 0 : i32
    %c0_i32_0 = arith.constant 0 : i32
    %c0_i32_1 = arith.constant 0 : i32
    %c0_i32_2 = arith.constant 0 : i32
    return %c0_i32, %c0_i32_0, %c0_i32_1 : i32, i32, i32
  }
  func.func @transform_9(%arg0: i32) -> (i32, i32, i32) {
    %c0_i32 = arith.constant 0 : i32
    %c0_i32_0 = arith.constant 0 : i32
    %c0_i32_1 = arith.constant 0 : i32
    %c0_i32_2 = arith.constant 0 : i32
    return %c0_i32, %c0_i32_0, %c0_i32_1 : i32, i32, i32
  }
  func.func @transform_10(%arg0: i32) -> (i32, i32) {
    %c0_i32 = arith.constant 0 : i32
    %c0_i32_0 = arith.constant 0 : i32
    %c0_i32_1 = arith.constant 0 : i32
    return %c0_i32, %c0_i32_0 : i32, i32
  }
  func.func @transform_11(%arg0: i32) -> (i32, i32) {
    %c0_i32 = arith.constant 0 : i32
    %c0_i32_0 = arith.constant 0 : i32
    %c0_i32_1 = arith.constant 0 : i32
    return %c0_i32, %c0_i32_0 : i32, i32
  }
  func.func @transform_12(%arg0: i32) -> (i32, i32) {
    %c0_i32 = arith.constant 0 : i32
    %c0_i32_0 = arith.constant 0 : i32
    %c0_i32_1 = arith.constant 0 : i32
    return %c0_i32, %c0_i32_0 : i32, i32
  }
  func.func @transform_13(%arg0: i32) -> (i32, i32) {
    %c0_i32 = arith.constant 0 : i32
    %c0_i32_0 = arith.constant 0 : i32
    %c0_i32_1 = arith.constant 0 : i32
    return %c0_i32, %c0_i32_0 : i32, i32
  }
  func.func @transform_14(%arg0: i32) -> (i32, i32) {
    %c0_i32 = arith.constant 0 : i32
    %c0_i32_0 = arith.constant 0 : i32
    %c0_i32_1 = arith.constant 0 : i32
    return %c0_i32, %c0_i32_0 : i32, i32
  }
  func.func @transform_15(%arg0: i32) -> (i32, i32) {
    %c0_i32 = arith.constant 0 : i32
    %c0_i32_0 = arith.constant 0 : i32
    %c0_i32_1 = arith.constant 0 : i32
    return %c0_i32, %c0_i32_0 : i32, i32
  }
  func.func @transform_16(%arg0: i32) -> (i32, i32) {
    %c0_i32 = arith.constant 0 : i32
    %c0_i32_0 = arith.constant 0 : i32
    %c0_i32_1 = arith.constant 0 : i32
    return %c0_i32, %c0_i32_0 : i32, i32
  }
  func.func @transform_17(%arg0: i32) -> (i32, i32, i32) {
    %c0_i32 = arith.constant 0 : i32
    %c0_i32_0 = arith.constant 0 : i32
    %c0_i32_1 = arith.constant 0 : i32
    return %arg0, %c0_i32, %c0_i32_0 : i32, i32, i32
  }
}

</mosaic_0001>

<bundles_post_ra>
// kernel: tpu_custom_call.1
= control target key start
LH: loop header
LB: loop body
LE: loop exit
PB: predicated region body
PF: predicated region fallthrough
CT: control target
= control target key end

     0   :  { %s3324_s0 = inlined_call_operand.vmem [shape: f32[2,8,32], index: 0, kind: input, shape index: {}]   ;;  %s3325_s1 = inlined_call_operand.vmem [shape: f32[2,8,32], index: 1, kind: input, shape index: {}]   ;;  %s3326_s2 = inlined_call_operand.vmem [shape: bf16[1,8,8], index: 2, kind: input, shape index: {}]   ;;  %s3327_s3 = inlined_call_operand.vmem [shape: bf16[4,32,8], index: 3, kind: input, shape index: {}]   ;;  %s3328_s4 = inlined_call_operand.vmem [shape: f32[4,1,8], index: 4, kind: input, shape index: {}]   ;;  %s3329_s5 = inlined_call_operand.vmem [shape: bf16[4,32,8], index: 5, kind: input, shape index: {}]   ;;  %s3330_s6 = inlined_call_operand.vmem [shape: f32[4,1,8], index: 6, kind: input, shape index: {}]   ;;  %s3331_s7 = inlined_call_operand.vmem [shape: bf16[4,32,8], index: 7, kind: input, shape index: {}]   ;;  %s3332_s8 = inlined_call_operand.vmem [shape: f32[4,1,8], index: 8, kind: input, shape index: {}]   ;;  %s3333_s9 = inlined_call_operand.vmem [shape: bf16[4,8,32], index: 9, kind: input, shape index: {}]   ;;  %s3334_s10 = inlined_call_operand.vmem [shape: f32[1,32], index: 10, kind: input, shape index: {}]   ;;  %s3335_s11 = inlined_call_operand.vmem [shape: f32[1,32], index: 11, kind: input, shape index: {}]   ;;  %s3336_s12 = inlined_call_operand.vmem [shape: f32[1,32], index: 12, kind: input, shape index: {}]   ;;  %s3337_s13 = inlined_call_operand.vmem [shape: bf16[32,64], index: 13, kind: input, shape index: {}]   ;;  %s3338_s14 = inlined_call_operand.vmem [shape: f32[1,64], index: 14, kind: input, shape index: {}]   ;;  %s3339_s15 = inlined_call_operand.vmem [shape: bf16[64,32], index: 15, kind: input, shape index: {}]   ;;  %s3340_s16 = inlined_call_operand.vmem [shape: f32[1,32], index: 16, kind: input, shape index: {}]   ;;  %s3341_s17 = inlined_call_operand.hbm [shape: f32[2,8,32], index: 17, kind: output, shape index: {}]  }
   0x1   :  { %3344 = sst [smem:[#allocation5_spill]] %s3324_s0 }
   0x2   :  { %3345 = sst [smem:[#allocation6_spill]] %s3325_s1 }
   0x3   :  { %v2701_v0 = vld [vmem:[%s3329_s5] sm:$0xff]   ;;  %v2793_v1 = vmov 0.0   ;;  %v2702_v2 = vld [vmem:[%s3329_s5 + $0x8] sm:$0xff]   ;;  %vm2794_vm0 = vmmov 0   ;;  %s3346_s18 = sld [smem:[#allocation5_spill]]  ;;  %s3347_s24 = sld [smem:[#allocation6_spill]] }
   0x4   :  { %2468 = vmatprep.subr.bf16.mxu1 %v2793_v1  ;;  %2460 = vmatprep.subr.bf16.mxu0 %v2793_v1  ;;  %v2703_v3 = vld [vmem:[%s3327_s3] sm:$0xff]   ;;  %v2704_v6 = vld [vmem:[%s3327_s3 + $0x8] sm:$0xff]   ;;  %vm89_vm1 = vcmask 261120  }
   0x5   :  { %2469 = vmatpush3.bf16.msra.mxu1 %v2701_v0  ;;  %2472 = vmatprep.mubr.msk.bf16.mxu1 %vm2794_vm0, %v2793_v1  ;;  %v2705_v11 = vld [vmem:[%s3331_s7] sm:$0xff]   ;;  %v2706_v12 = vld [vmem:[%s3331_s7 + $0x8] sm:$0xff]  }
   0x6   :  { %2470 = vmatprep.subr.bf16.mxu1 %v2793_v1  ;;  %2464 = vmatprep.mubr.msk.bf16.mxu0 %vm2794_vm0, %v2793_v1 }
   0x7   :  { %2461 = vmatpush3.bf16.msra.mxu0 %v2703_v3 }
   0x8   :  { %2462 = vmatprep.subr.bf16.mxu0 %v2793_v1 }
   0x9   :  { %v61_v4 = vld [vmem:[%s3346_s18] sm:$0xff]  ;;  %v62_v5 = vld [vmem:[%s3346_s18 + $0x8] sm:$0xff]  ;;  %2471 = vmatpush3.bf16.msra.mxu1 %v2702_v2 }
   0xa   :  { %v58_v7 = vld [vmem:[%s3347_s24] sm:$0xff]  ;;  %v2916_v8 = vpack.c.bf16 %v62_v5, %v61_v4  ;;  %v59_v9 = vld [vmem:[%s3347_s24 + $0x8] sm:$0xff]  ;;  %2484 = vmatprep.subr.bf16.mxu1 %v2793_v1 }
   0xb   :  { %v2922_v10 = vpack.c.bf16 %v59_v9, %v58_v7  ;;  %2463 = vmatpush3.bf16.msra.mxu0 %v2704_v6 }
   0xc   :  { %2473 = vmatmul.mubr.msk.bf16.vlgmr.msra.gmra.mrb[0].mxu1 %vm89_vm1, %v2916_v8  ;;  %2476 = vmatprep.subr.bf16.mxu0 %v2793_v1 }
   0xd   :  { %2486 = vmatprep.mubr.msk.bf16.mxu1 %vm2794_vm0, %v2793_v1 }
   0xe   :  { %2465 = vmatmul.mubr.msk.bf16.vlgmr.msra.gmra.mrb[0].mxu0 %vm89_vm1, %v2922_v10 }
   0xf   :  { %2477 = vmatpush3.bf16.msra.mxu0 %v2705_v11  ;;  %2480 = vmatprep.mubr.msk.bf16.mxu0 %vm2794_vm0, %v2793_v1 }
  0x10   :  { %2478 = vmatprep.subr.bf16.mxu0 %v2793_v1 }
  0x13   :  { %2479 = vmatpush3.bf16.msra.mxu0 %v2706_v12 }
  0x14   :  { %2490 = vmatprep.subr.bf16.mxu0 %v2793_v1 }
  0x16   :  { %2481 = vmatmul.mubr.msk.bf16.vlgmr.msra.gmra.mrb[4].mxu0 %vm89_vm1, %v2916_v8 }
  0x17   :  { %2492 = vmatprep.mubr.msk.bf16.mxu0 %vm2794_vm0, %v2793_v1 }
  0x18   :  { %22 = vsyncpa [#allocation3], 0  ;;  %v2205_v13 = vld [vmem:[%s3330_s6] ss:$0 sm:$0xff]  ;;  %vm283_vm2 = vcmask 64512   ;;  %vm403_vm3 = vcmask 1043456  }
  0x19   :  { %v2199_v18 = vld [vmem:[%s3328_s4] ss:$0 sm:$0xff]  ;;  %v2707_v11 = vld [vmem:[%s3329_s5 + $0x10] sm:$0xff]   ;;  %vm2134_vm4 = vcmask 523264  }
  0x1a   :  { %v2211_v30 = vld [vmem:[%s3332_s8] ss:$0 sm:$0xff] }
  0x1b   :  { %v64_v44 = vld [vmem:[%s3326_s2] sm:$0xf] }
  0x1c   :  { %v2972_v46 = vunpack.c.l.bf16 %v64_v44 }
  0xdf   :  { %v200_v14 = vpop.f32.mrb[0].mxu1 }
  0xe0   :  { %v201_v15 = vadd.f32 %v2205_v13, %v200_v14  ;;  %v2474_v16 = vpop.f32.mrb[1].mxu1 }
  0xe1   :  { %v203_v17 = vpop.f32.mrb[2].mxu1  ;;  %v127_v19 = vpop.f32.mrb[0].mxu0  ;;  %v2709_v16 = vld [vmem:[%s3327_s3 + $0x10] sm:$0xff]  }
  0xe2   :  { %v2354_v20 = vpack.c.bf16 %v201_v15, %v201_v15  ;;  %v204_v21 = vadd.f32 %v2205_v13, %v203_v17  ;;  %v2475_v22 = vpop.f32.mrb[3].mxu1  ;;  %v2466_v23 = vpop.f32.mrb[1].mxu0  ;;  %v128_v27 = vadd.f32 %v2199_v18, %v127_v19  ;;  %v2708_v15 = vld [vmem:[%s3329_s5 + $0x18] sm:$0xff]   ;;  %v2711_v19 = vld [vmem:[%s3331_s7 + $0x10] sm:$0xff]  }
  0xe3   :  { %v130_v24 = vpop.f32.mrb[2].mxu0 }
  0xe4   :  { %v288_v25 = vsel %vm283_vm2, %v2354_v20, 0  ;;  %v2355_v26 = vpack.c.bf16 %v204_v21, %v204_v21  ;;  %v2467_v28 = vpop.f32.mrb[3].mxu0  ;;  %v2352_v31 = vpack.c.bf16 %v128_v27, %v128_v27  ;;  %v131_v32 = vadd.f32 %v2199_v18, %v130_v24  ;;  %v2710_v18 = vld [vmem:[%s3327_s3 + $0x18] sm:$0xff]  }
  0xe5   :  { %2485 = vmatpush3.bf16.xpose.msra.mxu1 %v288_v25  ;;  %v2712_v20 = vld [vmem:[%s3331_s7 + $0x18] sm:$0xff]  }
  0xe6   :  { %v334_v29 = vsel %vm283_vm2, %v2355_v26, 0  ;;  %2496 = vmatprep.subr.bf16.mxu1 %v2793_v1  ;;  %v2353_v37 = vpack.c.bf16 %v131_v32, %v131_v32 }
  0xe7   :  { %2491 = vmatpush3.bf16.xpose.msra.mxu0 %v334_v29  ;;  %v2237_v29 = vld [vmem:[%s3330_s6 + $0x1] ss:$0 sm:$0xff] }
  0xe8   :  { %2502 = vmatprep.subr.bf16.mxu0 %v2793_v1 }
  0xe9   :  { %v270_v33 = vpop.f32.mrb[4].mxu0 }
  0xea   :  { %v271_v34 = vadd.f32 %v2211_v30, %v270_v33  ;;  %v2482_v35 = vpop.f32.mrb[5].mxu0 }
  0xeb   :  { %v273_v36 = vpop.f32.mrb[6].mxu0  ;;  %v2226_v35 = vld [vmem:[%s3328_s4 + $0x1] ss:$0 sm:$0xff] }
  0xec   :  { %2487 = vmatmul.mubr.msk.bf16.vlgmr.msra.gmra.mrb[4].mxu1 %vm283_vm2, %v2352_v31  ;;  %v2356_v38 = vpack.c.bf16 %v271_v34, %v271_v34  ;;  %v274_v39 = vadd.f32 %v2211_v30, %v273_v36  ;;  %v2483_v40 = vpop.f32.mrb[7].mxu0 }
  0xed   :  { %2498 = vmatprep.mubr.msk.bf16.mxu1 %vm2794_vm0, %v2793_v1 }
  0xee   :  { %2493 = vmatmul.mubr.msk.bf16.vlgmr.msra.gmra.mrb[8].mxu0 %vm283_vm2, %v2353_v37  ;;  %v405_v41 = vsel %vm403_vm3, %v2356_v38, 0  ;;  %v2357_v42 = vpack.c.bf16 %v274_v39, %v274_v39 }
  0xef   :  { %2497 = vmatpush3.bf16.msra.mxu1 %v405_v41  ;;  %2504 = vmatprep.mubr.msk.bf16.mxu0 %vm2794_vm0, %v2793_v1 }
  0xf0   :  { %v451_v43 = vsel %vm403_vm3, %v2357_v42, 0  ;;  %2508 = vmatprep.subr.bf16.mxu1 %v2793_v1 }
  0xf1   :  { %2503 = vmatpush3.bf16.msra.mxu0 %v451_v43 }
  0xf2   :  { %2516 = vmatprep.subr.bf16.mxu0 %v2793_v1 }
 0x1bf   :  { %v324_v45 = vpop.f32.mrb[4].mxu1 }
 0x1c0   :  { %v2488_v47 = vpop.f32.mrb[5].mxu1  ;;  %v325_v54 = vadd.f32 %v324_v45, %v2972_v46 }
 0x1c1   :  { %v327_v48 = vpop.f32.mrb[6].mxu1  ;;  %v370_v49 = vpop.f32.mrb[8].mxu0 }
 0x1c2   :  { %v371_v50 = vadd.f32 %v370_v49, %v2972_v46  ;;  %v2489_v51 = vpop.f32.mrb[7].mxu1  ;;  %v2494_v52 = vpop.f32.mrb[9].mxu0  ;;  %v376_v57 = vsel %vm283_vm2, %v325_v54, -inf }
 0x1c3   :  { %v373_v53 = vpop.f32.mrb[10].mxu0  ;;  %v2248_v51 = vld [vmem:[%s3332_s8 + $0x1] ss:$0 sm:$0xff] }
 0x1c4   :  { %v2495_v55 = vpop.f32.mrb[11].mxu0  ;;  %v379_v56 = vsel %vm283_vm2, %v371_v50, -inf }
 0x1c5   :  { %380 = vmax.xlane.f32.xlu0 %v379_v56 }
 0x1c9   :  { %377 = vmax.xlane.f32.xlu0 %v376_v57 }
 0x252   :  { %v381_v58 = vpop.xlane.xlu0 %380 }
 0x253   :  { %v383_v59 = vsub.f32 %v371_v50, %v381_v58 }
 0x255   :  { %v386_v60 = vmul.f32 1.442695, %v383_v59 }
 0x256   :  { %v378_v61 = vpop.xlane.xlu0 %377 }
 0x257   :  { %2731 = vpow2.f32 %v386_v60  ;;  %v382_v62 = vsub.f32 %v325_v54, %v378_v61 }
 0x259   :  { %v384_v63 = vmul.f32 1.442695, %v382_v62 }
 0x25b   :  { %2733 = vpow2.f32 %v384_v63 }
 0x261   :  { %v2732_v0 = vpop.eup %2731 }
 0x262   :  { %v391_v2 = vsel %vm283_vm2, %v2732_v0, 0.0 }
 0x263   :  { %392 = vadd.xlane.f32.xlu1 %v391_v2 }
 0x265   :  { %v2734_v3 = vpop.eup %2733 }
 0x266   :  { %v388_v4 = vsel %vm283_vm2, %v2734_v3, 0.0 }
 0x267   :  { %389 = vadd.xlane.f32.xlu1 %v388_v4 }
 0x2f0   :  { %v393_v5 = vpop.xlane.xlu1 %392 }
 0x2f1   :  { %2735 = vrcp.f32 %v393_v5 }
 0x2f4   :  { %v390_v6 = vpop.xlane.xlu1 %389 }
 0x2f5   :  { %2737 = vrcp.f32 %v390_v6 }
 0x2fb   :  { %v2736_v7 = vpop.eup %2735 }
 0x2fc   :  { %v397_v9 = vmul.f32 %v2736_v7, %v2732_v0 }
 0x2fe   :  { %v399_v12 = vpack.c.bf16 %v397_v9, %v397_v9 }
 0x2ff   :  { %v2738_v13 = vpop.eup %2737 }
 0x300   :  { %v396_v14 = vmul.f32 %v2738_v13, %v2734_v3  ;;  %2505 = vmatmul.mubr.msk.bf16.vlgmr.msra.gmra.mrb[12].mxu0 %vm283_vm2, %v399_v12 }
 0x301   :  { %2517 = vmatpush3.bf16.msra.mxu0 %v2707_v11  ;;  %2520 = vmatprep.mubr.msk.bf16.mxu0 %vm2794_vm0, %v2793_v1 }
 0x302   :  { %v398_v17 = vpack.c.bf16 %v396_v14, %v396_v14  ;;  %2518 = vmatprep.subr.bf16.mxu0 %v2793_v1 }
 0x304   :  { %2499 = vmatmul.mubr.msk.bf16.vlgmr.msra.gmra.mrb[8].mxu1 %vm283_vm2, %v398_v17 }
 0x305   :  { %2519 = vmatpush3.bf16.msra.mxu0 %v2708_v15  ;;  %2509 = vmatpush3.bf16.msra.mxu1 %v2709_v16 }
 0x306   :  { %2510 = vmatprep.subr.bf16.mxu1 %v2793_v1  ;;  %2512 = vmatprep.mubr.msk.bf16.mxu1 %vm2794_vm0, %v2793_v1 }
 0x307   :  { %2532 = vmatprep.subr.bf16.mxu0 %v2793_v1 }
 0x308   :  { %2521 = vmatmul.mubr.msk.bf16.vlgmr.msra.gmra.mrb[16].mxu0 %vm89_vm1, %v2916_v8 }
 0x309   :  { %2511 = vmatpush3.bf16.msra.mxu1 %v2710_v18  ;;  %2534 = vmatprep.mubr.msk.bf16.mxu0 %vm2794_vm0, %v2793_v1 }
 0x30a   :  { %2524 = vmatprep.subr.bf16.mxu1 %v2793_v1 }
 0x30c   :  { %2513 = vmatmul.mubr.msk.bf16.vlgmr.msra.gmra.mrb[12].mxu1 %vm89_vm1, %v2922_v10 }
 0x30d   :  { %2528 = vmatprep.mubr.msk.bf16.mxu1 %vm2794_vm0, %v2793_v1  ;;  %2525 = vmatpush3.bf16.msra.mxu1 %v2711_v19 }
 0x30e   :  { %2526 = vmatprep.subr.bf16.mxu1 %v2793_v1 }
 0x311   :  { %2527 = vmatpush3.bf16.msra.mxu1 %v2712_v20 }
 0x312   :  { %2538 = vmatprep.subr.bf16.mxu1 %v2793_v1 }
 0x314   :  { %2529 = vmatmul.mubr.msk.bf16.vlgmr.msra.gmra.mrb[16].mxu1 %vm89_vm1, %v2916_v8 }
 0x315   :  { %2540 = vmatprep.mubr.msk.bf16.mxu1 %vm2794_vm0, %v2793_v1 }
 0x3d3   :  { %v3022_v21 = vpop.f32.mrb[12].mxu0 }
 0x3d4   :  { %v2506_v22 = vpop.f32.mrb[13].mxu0 }
 0x3d5   :  { %v490_v23 = vpop.f32.mrb[14].mxu0 }
 0x3d6   :  { %v2507_v24 = vpop.f32.mrb[15].mxu0 }
 0x3d7   :  { %v3024_v25 = vpop.f32.mrb[8].mxu1 }
 0x3d8   :  { %v493_v26 = vpack.c.bf16 %v3022_v21, %v3024_v25  ;;  %v2500_v27 = vpop.f32.mrb[9].mxu1 }
 0x3d9   :  { %v444_v28 = vpop.f32.mrb[10].mxu1 }
 0x3da   :  { %v2501_v30 = vpop.f32.mrb[11].mxu1 }
 0x3db   :  { %v626_v31 = vpop.f32.mrb[16].mxu0 }
 0x3dc   :  { %v627_v32 = vadd.f32 %v2237_v29, %v626_v31  ;;  %v2522_v33 = vpop.f32.mrb[17].mxu0 }
 0x3dd   :  { %v629_v34 = vpop.f32.mrb[18].mxu0 }
 0x3de   :  { %v2360_v36 = vpack.c.bf16 %v627_v32, %v627_v32  ;;  %v630_v37 = vadd.f32 %v2237_v29, %v629_v34  ;;  %v2523_v38 = vpop.f32.mrb[19].mxu0  ;;  %v2258_v29 = vld [vmem:[%s3333_s9 + $0x4] sm:$0xf]  ;;  %v494_v32 = vld [vmem:[%s3333_s9] sm:$0xf] }
 0x3df   :  { %v554_v39 = vpop.f32.mrb[12].mxu1  ;;  %v2713_v38 = vld [vmem:[%s3329_s5 + $0x20] sm:$0xff]  }
 0x3e0   :  { %v715_v40 = vsel %vm283_vm2, %v2360_v36, 0  ;;  %v2361_v41 = vpack.c.bf16 %v630_v37, %v630_v37  ;;  %v555_v42 = vadd.f32 %v2226_v35, %v554_v39  ;;  %v2514_v43 = vpop.f32.mrb[13].mxu1  ;;  %v973_v37 = vsel %vm403_vm3, %v494_v32, 0  ;;  %v2714_v39 = vld [vmem:[%s3329_s5 + $0x28] sm:$0xff]  }
 0x3e1   :  { %2533 = vmatpush3.bf16.xpose.msra.mxu0 %v715_v40  ;;  %v557_v44 = vpop.f32.mrb[14].mxu1 }
 0x3e2   :  { %v761_v45 = vsel %vm283_vm2, %v2361_v41, 0  ;;  %v2515_v47 = vpop.f32.mrb[15].mxu1  ;;  %2544 = vmatprep.subr.bf16.mxu0 %v2793_v1  ;;  %v2358_v48 = vpack.c.bf16 %v555_v42, %v555_v42  ;;  %v558_v49 = vadd.f32 %v2226_v35, %v557_v44  ;;  %v926_v35 = vsel %vm403_vm3, %v2258_v29, 0  ;;  %v2715_v41 = vld [vmem:[%s3327_s3 + $0x20] sm:$0xff]  }
 0x3e3   :  { %2539 = vmatpush3.bf16.xpose.msra.mxu1 %v761_v45 }
 0x3e4   :  { %2550 = vmatprep.subr.bf16.mxu1 %v2793_v1  ;;  %v2359_v50 = vpack.c.bf16 %v558_v49, %v558_v49 }
 0x3e7   :  { %v698_v52 = vpop.f32.mrb[16].mxu1 }
 0x3e8   :  { %2535 = vmatmul.mubr.msk.bf16.vlgmr.msra.gmra.mrb[20].mxu0 %vm283_vm2, %v2358_v48  ;;  %v699_v53 = vadd.f32 %v2248_v51, %v698_v52  ;;  %v2530_v54 = vpop.f32.mrb[17].mxu1  ;;  %v2716_v48 = vld [vmem:[%s3327_s3 + $0x28] sm:$0xff]  }
 0x3e9   :  { %2546 = vmatprep.mubr.msk.bf16.mxu0 %vm2794_vm0, %v2793_v1  ;;  %v701_v55 = vpop.f32.mrb[18].mxu1  ;;  %v2718_v54 = vld [vmem:[%s3331_s7 + $0x28] sm:$0xff]  }
 0x3ea   :  { %2541 = vmatmul.mubr.msk.bf16.vlgmr.msra.gmra.mrb[20].mxu1 %vm283_vm2, %v2359_v50  ;;  %v2362_v56 = vpack.c.bf16 %v699_v53, %v699_v53  ;;  %v702_v57 = vadd.f32 %v2248_v51, %v701_v55  ;;  %v2531_v58 = vpop.f32.mrb[19].mxu1  ;;  %v2717_v50 = vld [vmem:[%s3331_s7 + $0x20] sm:$0xff]  }
 0x3eb   :  { %2552 = vmatprep.mubr.msk.bf16.mxu1 %vm2794_vm0, %v2793_v1  ;;  %v2277_v55 = vld [vmem:[%s3330_s6 + $0x2] ss:$0 sm:$0xff] }
 0x3ec   :  { %v831_v59 = vsel %vm403_vm3, %v2362_v56, 0  ;;  %v2363_v60 = vpack.c.bf16 %v702_v57, %v702_v57 }
 0x3ed   :  { %2545 = vmatpush3.bf16.msra.mxu0 %v831_v59 }
 0x3ee   :  { %v877_v61 = vsel %vm403_vm3, %v2363_v60, 0  ;;  %2556 = vmatprep.subr.bf16.mxu0 %v2793_v1 }
 0x3ef   :  { %2551 = vmatpush3.bf16.msra.mxu1 %v877_v61 }
 0x3f0   :  { %2562 = vmatprep.subr.bf16.mxu1 %v2793_v1 }
 0x4bb   :  { %v751_v62 = vpop.f32.mrb[20].mxu0 }
 0x4bc   :  { %v752_v63 = vadd.f32 %v751_v62, %v2972_v46  ;;  %v2536_v0 = vpop.f32.mrb[21].mxu0 }
 0x4bd   :  { %v754_v2 = vpop.f32.mrb[22].mxu0  ;;  %v797_v3 = vpop.f32.mrb[20].mxu1 }
 0x4be   :  { %v798_v4 = vadd.f32 %v797_v3, %v2972_v46  ;;  %v2537_v5 = vpop.f32.mrb[23].mxu0  ;;  %v2542_v6 = vpop.f32.mrb[21].mxu1  ;;  %v803_v7 = vsel %vm283_vm2, %v752_v63, -inf }
 0x4bf   :  { %v800_v9 = vpop.f32.mrb[22].mxu1  ;;  %804 = vmax.xlane.f32.xlu0 %v803_v7 }
 0x4c0   :  { %v2543_v11 = vpop.f32.mrb[23].mxu1  ;;  %v806_v12 = vsel %vm283_vm2, %v798_v4, -inf }
 0x4c1   :  { %807 = vmax.xlane.f32.xlu1 %v806_v12  ;;  %v2266_v11 = vld [vmem:[%s3328_s4 + $0x2] ss:$0 sm:$0xff] }
 0x54c   :  { %v805_v13 = vpop.xlane.xlu0 %804 }
 0x54d   :  { %v809_v14 = vsub.f32 %v752_v63, %v805_v13 }
 0x54e   :  { %v808_v15 = vpop.xlane.xlu1 %807 }
 0x54f   :  { %v811_v16 = vmul.f32 1.442695, %v809_v14  ;;  %v810_v17 = vsub.f32 %v798_v4, %v808_v15 }
 0x551   :  { %2739 = vpow2.f32 %v811_v16  ;;  %v813_v18 = vmul.f32 1.442695, %v810_v17 }
 0x553   :  { %2741 = vpow2.f32 %v813_v18 }
 0x55b   :  { %v2740_v19 = vpop.eup %2739 }
 0x55c   :  { %v815_v20 = vsel %vm283_vm2, %v2740_v19, 0.0 }
 0x55d   :  { %v2742_v22 = vpop.eup %2741  ;;  %816 = vadd.xlane.f32.xlu0 %v815_v20  ;;  %v2288_v20 = vld [vmem:[%s3332_s8 + $0x2] ss:$0 sm:$0xff] }
 0x55e   :  { %v818_v23 = vsel %vm283_vm2, %v2742_v22, 0.0 }
 0x55f   :  { %819 = vadd.xlane.f32.xlu1 %v818_v23 }
 0x5ea   :  { %v817_v24 = vpop.xlane.xlu0 %816 }
 0x5eb   :  { %2743 = vrcp.f32 %v817_v24 }
 0x5ec   :  { %v820_v27 = vpop.xlane.xlu1 %819 }
 0x5ed   :  { %2745 = vrcp.f32 %v820_v27 }
 0x5f5   :  { %v2744_v28 = vpop.eup %2743 }
 0x5f6   :  { %v823_v30 = vmul.f32 %v2744_v28, %v2740_v19 }
 0x5f7   :  { %v2746_v31 = vpop.eup %2745 }
 0x5f8   :  { %v824_v33 = vmul.f32 %v2746_v31, %v2742_v22  ;;  %v825_v34 = vpack.c.bf16 %v823_v30, %v823_v30 }
 0x5fa   :  { %2547 = vmatmul.mubr.msk.bf16.vlgmr.msra.gmra.mrb[24].mxu0 %vm283_vm2, %v825_v34  ;;  %v826_v36 = vpack.c.bf16 %v824_v33, %v824_v33 }
 0x5fb   :  { %2557 = vmatpush3.bf16.msra.mxu0 %v926_v35  ;;  %2558 = vmatprep.mubr.msk.bf16.mxu0 %vm2794_vm0, %v2793_v1 }
 0x5fc   :  { %2553 = vmatmul.mubr.msk.bf16.vlgmr.msra.gmra.mrb[24].mxu1 %vm283_vm2, %v826_v36  ;;  %2568 = vmatprep.subr.bf16.mxu0 %v2793_v1 }
 0x5fd   :  { %2563 = vmatpush3.bf16.msra.mxu1 %v973_v37  ;;  %2564 = vmatprep.mubr.msk.bf16.mxu1 %vm2794_vm0, %v2793_v1 }
 0x5fe   :  { %2576 = vmatprep.subr.bf16.mxu1 %v2793_v1 }
 0x604   :  { %2565 = vmatmul.mubr.msk.bf16.vlgmr.msra.gmra.mrb[28].mxu1 %vm283_vm2, %v493_v26 }
 0x605   :  { %2577 = vmatpush3.bf16.msra.mxu1 %v2713_v38  ;;  %2580 = vmatprep.mubr.msk.bf16.mxu1 %vm2794_vm0, %v2793_v1 }
 0x606   :  { %2578 = vmatprep.subr.bf16.mxu1 %v2793_v1 }
 0x609   :  { %2579 = vmatpush3.bf16.msra.mxu1 %v2714_v39 }
 0x60a   :  { %2592 = vmatprep.subr.bf16.mxu1 %v2793_v1 }
 0x60c   :  { %2581 = vmatmul.mubr.msk.bf16.vlgmr.msra.gmra.mrb[32].mxu1 %vm89_vm1, %v2916_v8 }
 0x60d   :  { %2594 = vmatprep.mubr.msk.bf16.mxu1 %vm2794_vm0, %v2793_v1 }
 0x6cd   :  { %v867_v21 = vpop.f32.mrb[24].mxu0 }
 0x6ce   :  { %v2548_v25 = vpop.f32.mrb[25].mxu0 }
 0x6cf   :  { %v870_v26 = vpop.f32.mrb[26].mxu0  ;;  %v913_v40 = vpop.f32.mrb[24].mxu1 }
 0x6d0   :  { %v919_v42 = vpack.c.bf16 %v913_v40, %v867_v21  ;;  %v2549_v43 = vpop.f32.mrb[27].mxu0  ;;  %v2554_v44 = vpop.f32.mrb[25].mxu1 }
 0x6d1   :  { %v916_v45 = vpop.f32.mrb[26].mxu1 }
 0x6d2   :  { %v2555_v47 = vpop.f32.mrb[27].mxu1  ;;  %2559 = vmatmul.mubr.msk.bf16.vlgmr.msra.gmra.mrb[28].mxu0 %vm283_vm2, %v919_v42 }
 0x6d3   :  { %2569 = vmatpush3.bf16.msra.mxu0 %v2715_v41  ;;  %2572 = vmatprep.mubr.msk.bf16.mxu0 %vm2794_vm0, %v2793_v1 }
 0x6d4   :  { %2570 = vmatprep.subr.bf16.mxu0 %v2793_v1 }
 0x6d7   :  { %v1009_v49 = vpop.f32.mrb[28].mxu1  ;;  %2571 = vmatpush3.bf16.msra.mxu0 %v2716_v48 }
 0x6d8   :  { %v2566_v51 = vpop.f32.mrb[29].mxu1  ;;  %2584 = vmatprep.subr.bf16.mxu0 %v2793_v1 }
 0x6d9   :  { %v1012_v52 = vpop.f32.mrb[30].mxu1 }
 0x6da   :  { %v2567_v53 = vpop.f32.mrb[31].mxu1  ;;  %2573 = vmatmul.mubr.msk.bf16.vlgmr.msra.gmra.mrb[32].mxu0 %vm89_vm1, %v2922_v10 }
 0x6db   :  { %2585 = vmatpush3.bf16.msra.mxu0 %v2717_v50  ;;  %2588 = vmatprep.mubr.msk.bf16.mxu0 %vm2794_vm0, %v2793_v1 }
 0x6dc   :  { %2586 = vmatprep.subr.bf16.mxu0 %v2793_v1 }
 0x6df   :  { %v1147_v56 = vpop.f32.mrb[32].mxu1  ;;  %2587 = vmatpush3.bf16.msra.mxu0 %v2718_v54 }
 0x6e0   :  { %v1148_v57 = vadd.f32 %v2277_v55, %v1147_v56  ;;  %v2582_v58 = vpop.f32.mrb[33].mxu1  ;;  %2598 = vmatprep.subr.bf16.mxu0 %v2793_v1 }
 0x6e1   :  { %v1150_v59 = vpop.f32.mrb[34].mxu1 }
 0x6e2   :  { %v2366_v60 = vpack.c.bf16 %v1148_v57, %v1148_v57  ;;  %v1151_v61 = vadd.f32 %v2277_v55, %v1150_v59  ;;  %v2583_v62 = vpop.f32.mrb[35].mxu1  ;;  %2589 = vmatmul.mubr.msk.bf16.vlgmr.msra.gmra.mrb[36].mxu0 %vm89_vm1, %v2916_v8  ;;  %v2298_v57 = vld [vmem:[%s3333_s9 + $0x8] sm:$0xf] }
 0x6e3   :  { %2600 = vmatprep.mubr.msk.bf16.mxu0 %vm2794_vm0, %v2793_v1  ;;  %v1447_v62 = vsel %vm403_vm3, %v2298_v57, 0 }
 0x6e4   :  { %v1236_v63 = vsel %vm283_vm2, %v2366_v60, 0  ;;  %v2367_v0 = vpack.c.bf16 %v1151_v61, %v1151_v61 }
 0x6e5   :  { %2593 = vmatpush3.bf16.xpose.msra.mxu1 %v1236_v63 }
 0x6e6   :  { %v1282_v2 = vsel %vm283_vm2, %v2367_v0, 0  ;;  %2604 = vmatprep.subr.bf16.mxu1 %v2793_v1  ;;  %v2721_v0 = vld [vmem:[%s3327_s3 + $0x30] sm:$0xff]  }
 0x6e8   :  { %2599 = vmatpush3.bf16.xpose.msra.mxu0 %v1282_v2  ;;  %v2722_v2 = vld [vmem:[%s3327_s3 + $0x38] sm:$0xff]  }
 0x6e9   :  { %2610 = vmatprep.subr.bf16.mxu0 %v2793_v1 }
 0x7a5   :  { %v962_v3 = vpop.f32.mrb[28].mxu0 }
 0x7a6   :  { %v3125_v4 = vadd.f32 %v1009_v49, %v962_v3  ;;  %v2560_v5 = vpop.f32.mrb[29].mxu0 }
 0x7a7   :  { %v965_v6 = vpop.f32.mrb[30].mxu0 }
 0x7a8   :  { %v3127_v7 = vadd.f32 %v1012_v52, %v965_v6  ;;  %v2561_v9 = vpop.f32.mrb[31].mxu0 }
 0x7ad   :  { %v1075_v12 = vpop.f32.mrb[32].mxu0 }
 0x7ae   :  { %v1076_v13 = vadd.f32 %v2266_v11, %v1075_v12  ;;  %v2574_v14 = vpop.f32.mrb[33].mxu0 }
 0x7af   :  { %v1078_v15 = vpop.f32.mrb[34].mxu0 }
 0x7b0   :  { %v2364_v16 = vpack.c.bf16 %v1076_v13, %v1076_v13  ;;  %v1079_v17 = vadd.f32 %v2266_v11, %v1078_v15  ;;  %v2575_v18 = vpop.f32.mrb[35].mxu0  ;;  %v2719_v11 = vld [vmem:[%s3329_s5 + $0x30] sm:$0xff]  }
 0x7b1   :  { %v2724_v18 = vld [vmem:[%s3331_s7 + $0x38] sm:$0xff]  }
 0x7b2   :  { %v2365_v19 = vpack.c.bf16 %v1079_v17, %v1079_v17  ;;  %2595 = vmatmul.mubr.msk.bf16.vlgmr.msra.gmra.mrb[36].mxu1 %vm283_vm2, %v2364_v16  ;;  %v2723_v17 = vld [vmem:[%s3331_s7 + $0x30] sm:$0xff]  }
 0x7b3   :  { %2606 = vmatprep.mubr.msk.bf16.mxu1 %vm2794_vm0, %v2793_v1 }
 0x7b4   :  { %2601 = vmatmul.mubr.msk.bf16.vlgmr.msra.gmra.mrb[40].mxu0 %vm283_vm2, %v2365_v19 }
 0x7b5   :  { %v1219_v22 = vpop.f32.mrb[36].mxu0  ;;  %2612 = vmatprep.mubr.msk.bf16.mxu0 %vm2794_vm0, %v2793_v1 }
 0x7b6   :  { %v1220_v23 = vadd.f32 %v2288_v20, %v1219_v22  ;;  %v2590_v24 = vpop.f32.mrb[37].mxu0 }
 0x7b7   :  { %v1222_v27 = vpop.f32.mrb[38].mxu0 }
 0x7b8   :  { %v2368_v28 = vpack.c.bf16 %v1220_v23, %v1220_v23  ;;  %v1223_v29 = vadd.f32 %v2288_v20, %v1222_v27  ;;  %v2591_v30 = vpop.f32.mrb[39].mxu0 }
 0x7ba   :  { %v1352_v31 = vsel %vm403_vm3, %v2368_v28, 0  ;;  %v2369_v32 = vpack.c.bf16 %v1223_v29, %v1223_v29 }
 0x7bb   :  { %2605 = vmatpush3.bf16.msra.mxu1 %v1352_v31 }
 0x7bc   :  { %v1398_v33 = vsel %vm403_vm3, %v2369_v32, 0  ;;  %2616 = vmatprep.subr.bf16.mxu1 %v2793_v1 }
 0x7bd   :  { %2611 = vmatpush3.bf16.msra.mxu0 %v1398_v33 }
 0x7be   :  { %2622 = vmatprep.subr.bf16.mxu0 %v2793_v1 }
 0x885   :  { %v1272_v34 = vpop.f32.mrb[36].mxu1 }
 0x886   :  { %v1273_v35 = vadd.f32 %v1272_v34, %v2972_v46  ;;  %v2596_v36 = vpop.f32.mrb[37].mxu1 }
 0x887   :  { %v1275_v37 = vpop.f32.mrb[38].mxu1  ;;  %v1318_v38 = vpop.f32.mrb[40].mxu0  ;;  %v2305_v36 = vld [vmem:[%s3328_s4 + $0x3] ss:$0 sm:$0xff] }
 0x888   :  { %v1319_v39 = vadd.f32 %v1318_v38, %v2972_v46  ;;  %v2597_v21 = vpop.f32.mrb[39].mxu1  ;;  %v2602_v25 = vpop.f32.mrb[41].mxu0  ;;  %v1324_v26 = vsel %vm283_vm2, %v1273_v35, -inf }
 0x889   :  { %1325 = vmax.xlane.f32.xlu0 %v1324_v26  ;;  %v1321_v40 = vpop.f32.mrb[42].mxu0 }
 0x88a   :  { %v2603_v41 = vpop.f32.mrb[43].mxu0  ;;  %v1327_v42 = vsel %vm283_vm2, %v1319_v39, -inf }
 0x88b   :  { %1328 = vmax.xlane.f32.xlu1 %v1327_v42  ;;  %v2327_v42 = vld [vmem:[%s3332_s8 + $0x3] ss:$0 sm:$0xff] }
 0x916   :  { %v1326_v43 = vpop.xlane.xlu0 %1325 }
 0x917   :  { %v1330_v44 = vsub.f32 %v1273_v35, %v1326_v43 }
 0x918   :  { %v1329_v45 = vpop.xlane.xlu1 %1328 }
 0x919   :  { %v1332_v47 = vmul.f32 1.442695, %v1330_v44  ;;  %v1331_v48 = vsub.f32 %v1319_v39, %v1329_v45 }
 0x91b   :  { %2747 = vpow2.f32 %v1332_v47  ;;  %v1334_v49 = vmul.f32 1.442695, %v1331_v48 }
 0x91d   :  { %2749 = vpow2.f32 %v1334_v49 }
 0x925   :  { %v2748_v50 = vpop.eup %2747 }
 0x926   :  { %v1336_v51 = vsel %vm283_vm2, %v2748_v50, 0.0 }
 0x927   :  { %v2750_v52 = vpop.eup %2749  ;;  %1337 = vadd.xlane.f32.xlu0 %v1336_v51 }
 0x928   :  { %v1339_v53 = vsel %vm283_vm2, %v2750_v52, 0.0 }
 0x929   :  { %1340 = vadd.xlane.f32.xlu1 %v1339_v53 }
 0x9b4   :  { %v1338_v54 = vpop.xlane.xlu0 %1337 }
 0x9b5   :  { %2751 = vrcp.f32 %v1338_v54 }
 0x9b6   :  { %v1341_v55 = vpop.xlane.xlu1 %1340 }
 0x9b7   :  { %2753 = vrcp.f32 %v1341_v55 }
 0x9bf   :  { %v2752_v56 = vpop.eup %2751 }
 0x9c0   :  { %v1344_v58 = vmul.f32 %v2752_v56, %v2748_v50 }
 0x9c1   :  { %v2754_v59 = vpop.eup %2753 }
 0x9c2   :  { %v1345_v60 = vmul.f32 %v2754_v59, %v2750_v52  ;;  %v1346_v61 = vpack.c.bf16 %v1344_v58, %v1344_v58 }
 0x9c4   :  { %2607 = vmatmul.mubr.msk.bf16.vlgmr.msra.gmra.mrb[40].mxu1 %vm283_vm2, %v1346_v61  ;;  %v1347_v63 = vpack.c.bf16 %v1345_v60, %v1345_v60 }
 0x9c5   :  { %2617 = vmatpush3.bf16.msra.mxu1 %v1447_v62  ;;  %2618 = vmatprep.mubr.msk.bf16.mxu1 %vm2794_vm0, %v2793_v1 }
 0x9c6   :  { %2613 = vmatmul.mubr.msk.bf16.vlgmr.msra.gmra.mrb[44].mxu0 %vm283_vm2, %v1347_v63  ;;  %2630 = vmatprep.subr.bf16.mxu1 %v2793_v1 }
 0x9c7   :  { %2626 = vmatprep.mubr.msk.bf16.mxu0 %vm2794_vm0, %v2793_v1  ;;  %2623 = vmatpush3.bf16.msra.mxu0 %v2721_v0 }
 0x9c8   :  { %2624 = vmatprep.subr.bf16.mxu0 %v2793_v1 }
 0x9cb   :  { %2625 = vmatpush3.bf16.msra.mxu0 %v2722_v2 }
 0x9cc   :  { %2638 = vmatprep.subr.bf16.mxu0 %v2793_v1 }
 0x9ce   :  { %2627 = vmatmul.mubr.msk.bf16.vlgmr.msra.gmra.mrb[48].mxu0 %vm89_vm1, %v2922_v10  ;;  %v2720_v10 = vld [vmem:[%s3329_s5 + $0x38] sm:$0xff]  }
 0x9cf   :  { %2642 = vmatprep.mubr.msk.bf16.mxu0 %vm2794_vm0, %v2793_v1  ;;  %2639 = vmatpush3.bf16.msra.mxu0 %v2723_v17 }
 0x9d0   :  { %2640 = vmatprep.subr.bf16.mxu0 %v2793_v1 }
 0x9d3   :  { %2641 = vmatpush3.bf16.msra.mxu0 %v2724_v18  ;;  %v2337_v18 = vld [vmem:[%s3333_s9 + $0xc] sm:$0xf] }
 0x9d4   :  { %2652 = vmatprep.subr.bf16.mxu0 %v2793_v1 }
 0x9d6   :  { %2643 = vmatmul.mubr.msk.bf16.vlgmr.msra.gmra.mrb[52].mxu0 %vm89_vm1, %v2916_v8 }
 0x9d7   :  { %2654 = vmatprep.mubr.msk.bf16.mxu0 %vm2794_vm0, %v2793_v1 }
 0xa97   :  { %v1388_v3 = vpop.f32.mrb[40].mxu1 }
 0xa98   :  { %v2608_v5 = vpop.f32.mrb[41].mxu1 }
 0xa99   :  { %v1391_v6 = vpop.f32.mrb[42].mxu1  ;;  %v1434_v9 = vpop.f32.mrb[44].mxu0 }
 0xa9a   :  { %v1440_v12 = vpack.c.bf16 %v1434_v9, %v1388_v3  ;;  %v2609_v13 = vpop.f32.mrb[43].mxu1  ;;  %v2614_v14 = vpop.f32.mrb[45].mxu0 }
 0xa9b   :  { %v1437_v15 = vpop.f32.mrb[46].mxu0 }
 0xa9c   :  { %v2615_v16 = vpop.f32.mrb[47].mxu0  ;;  %2619 = vmatmul.mubr.msk.bf16.vlgmr.msra.gmra.mrb[44].mxu1 %vm283_vm2, %v1440_v12 }
 0xa9d   :  { %2631 = vmatpush3.bf16.msra.mxu1 %v2719_v11  ;;  %2634 = vmatprep.mubr.msk.bf16.mxu1 %vm2794_vm0, %v2793_v1 }
 0xa9e   :  { %2632 = vmatprep.subr.bf16.mxu1 %v2793_v1 }
 0xaa1   :  { %2633 = vmatpush3.bf16.msra.mxu1 %v2720_v10  ;;  %v1551_v19 = vpop.f32.mrb[48].mxu0 }
 0xaa2   :  { %2646 = vmatprep.subr.bf16.mxu1 %v2793_v1  ;;  %v2628_v20 = vpop.f32.mrb[49].mxu0  ;;  %v1552_v21 = vadd.f32 %v2305_v36, %v1551_v19 }
 0xaa3   :  { %v1554_v22 = vpop.f32.mrb[50].mxu0 }
 0xaa4   :  { %2635 = vmatmul.mubr.msk.bf16.vlgmr.msra.gmra.mrb[48].mxu1 %vm89_vm1, %v2916_v8  ;;  %v2629_v23 = vpop.f32.mrb[51].mxu0  ;;  %v2316_v8 = vld [vmem:[%s3330_s6 + $0x3] ss:$0 sm:$0xff]  ;;  %v2370_v26 = vpack.c.bf16 %v1552_v21, %v1552_v21  ;;  %v1555_v40 = vadd.f32 %v2305_v36, %v1554_v22 }
 0xaa5   :  { %2648 = vmatprep.mubr.msk.bf16.mxu1 %vm2794_vm0, %v2793_v1 }
 0xaa6   :  { %v2371_v41 = vpack.c.bf16 %v1555_v40, %v1555_v40 }
 0xaa9   :  { %v1695_v43 = vpop.f32.mrb[52].mxu0 }
 0xaaa   :  { %v1696_v44 = vadd.f32 %v2327_v42, %v1695_v43  ;;  %v2644_v45 = vpop.f32.mrb[53].mxu0 }
 0xaab   :  { %v1698_v47 = vpop.f32.mrb[54].mxu0 }
 0xaac   :  { %v2374_v48 = vpack.c.bf16 %v1696_v44, %v1696_v44  ;;  %v1699_v49 = vadd.f32 %v2327_v42, %v1698_v47  ;;  %v2645_v50 = vpop.f32.mrb[55].mxu0  ;;  %v2768_v44 = vld [vmem:[%s3347_s24 + $0x8] sm:$0xff] }
 0xaae   :  { %v1828_v51 = vsel %vm403_vm3, %v2374_v48, 0  ;;  %v2375_v52 = vpack.c.bf16 %v1699_v49, %v1699_v49 }
 0xab0   :  { %v1874_v53 = vsel %vm403_vm3, %v2375_v52, 0 }
 0xb6f   :  { %v1483_v24 = vpop.f32.mrb[44].mxu1 }
 0xb70   :  { %v3202_v27 = vadd.f32 %v1483_v24, %v3125_v4  ;;  %v2620_v28 = vpop.f32.mrb[45].mxu1  ;;  %v1923_v24 = vsel %vm403_vm3, %v2337_v18, 0  ;;  %v2730_v18 = vld [vmem:[%s3339_s15 + $0x18] sm:$0xff]  }
 0xb71   :  { %v1486_v29 = vpop.f32.mrb[46].mxu1 }
 0xb72   :  { %v3205_v30 = vadd.f32 %v1486_v29, %v3127_v7  ;;  %v2621_v31 = vpop.f32.mrb[47].mxu1 }
 0xb77   :  { %v1623_v32 = vpop.f32.mrb[48].mxu1 }
 0xb78   :  { %v1624_v33 = vadd.f32 %v2316_v8, %v1623_v32  ;;  %v2636_v34 = vpop.f32.mrb[49].mxu1 }
 0xb79   :  { %v1626_v35 = vpop.f32.mrb[50].mxu1 }
 0xb7a   :  { %v2372_v4 = vpack.c.bf16 %v1624_v33, %v1624_v33  ;;  %v1627_v37 = vadd.f32 %v2316_v8, %v1626_v35  ;;  %v2637_v38 = vpop.f32.mrb[51].mxu1 }
 0xb7b   :  { %v2339_v38 = vld [vmem:[%s3334_s10] ss:$0 sm:$0xff] }
 0xb7c   :  { %v1712_v39 = vsel %vm283_vm2, %v2372_v4, 0  ;;  %v2373_v7 = vpack.c.bf16 %v1627_v37, %v1627_v37 }
 0xb7d   :  { %2647 = vmatpush3.bf16.xpose.msra.mxu1 %v1712_v39 }
 0xb7e   :  { %v1758_v25 = vsel %vm283_vm2, %v2373_v7, 0  ;;  %2658 = vmatprep.subr.bf16.mxu1 %v2793_v1 }
 0xb7f   :  { %2653 = vmatpush3.bf16.xpose.msra.mxu0 %v1758_v25 }
 0xb80   :  { %2664 = vmatprep.subr.bf16.mxu0 %v2793_v1 }
 0xb84   :  { %2649 = vmatmul.mubr.msk.bf16.vlgmr.msra.gmra.mrb[52].mxu1 %vm283_vm2, %v2370_v26 }
 0xb85   :  { %2660 = vmatprep.mubr.msk.bf16.mxu1 %vm2794_vm0, %v2793_v1  ;;  %2659 = vmatpush3.bf16.msra.mxu1 %v1828_v51 }
 0xb86   :  { %2655 = vmatmul.mubr.msk.bf16.vlgmr.msra.gmra.mrb[56].mxu0 %vm283_vm2, %v2371_v41  ;;  %2670 = vmatprep.subr.bf16.mxu1 %v2793_v1  ;;  %v2767_v41 = vld [vmem:[%s3347_s24] sm:$0xff] }
 0xb87   :  { %2666 = vmatprep.mubr.msk.bf16.mxu0 %vm2794_vm0, %v2793_v1  ;;  %2665 = vmatpush3.bf16.msra.mxu0 %v1874_v53 }
 0xb88   :  { %2676 = vmatprep.subr.bf16.mxu0 %v2793_v1 }
 0xc57   :  { %v1748_v54 = vpop.f32.mrb[52].mxu1 }
 0xc58   :  { %v1749_v55 = vadd.f32 %v1748_v54, %v2972_v46  ;;  %v2650_v56 = vpop.f32.mrb[53].mxu1 }
 0xc59   :  { %v1751_v57 = vpop.f32.mrb[54].mxu1  ;;  %v1794_v58 = vpop.f32.mrb[56].mxu0 }
 0xc5a   :  { %v1795_v59 = vadd.f32 %v1794_v58, %v2972_v46  ;;  %v2651_v60 = vpop.f32.mrb[55].mxu1  ;;  %v2656_v61 = vpop.f32.mrb[57].mxu0  ;;  %v1800_v62 = vsel %vm283_vm2, %v1749_v55, -inf  ;;  %v2725_v57 = vld [vmem:[%s3337_s13] sm:$0xff]   ;;  %v2726_v58 = vld [vmem:[%s3337_s13 + $0x8] sm:$0xff]  }
 0xc5b   :  { %1801 = vmax.xlane.f32.xlu0 %v1800_v62  ;;  %v1797_v63 = vpop.f32.mrb[58].mxu0  ;;  %v2728_v60 = vld [vmem:[%s3339_s15 + $0x8] sm:$0xff]  }
 0xc5c   :  { %v2657_v0 = vpop.f32.mrb[59].mxu0  ;;  %v1803_v2 = vsel %vm283_vm2, %v1795_v59, -inf }
 0xc5d   :  { %1804 = vmax.xlane.f32.xlu1 %v1803_v2 }
 0xce8   :  { %v1802_v3 = vpop.xlane.xlu0 %1801 }
 0xce9   :  { %v1806_v5 = vsub.f32 %v1749_v55, %v1802_v3 }
 0xcea   :  { %v1805_v6 = vpop.xlane.xlu1 %1804 }
 0xceb   :  { %v1808_v9 = vmul.f32 1.442695, %v1806_v5  ;;  %v1807_v11 = vsub.f32 %v1795_v59, %v1805_v6  ;;  %v2727_v59 = vld [vmem:[%s3339_s15] sm:$0xff]  }
 0xcec   :  { %v2340_v6 = vld [vmem:[%s3335_s11] ss:$0 sm:$0xff] }
 0xced   :  { %2755 = vpow2.f32 %v1808_v9  ;;  %v1810_v12 = vmul.f32 1.442695, %v1807_v11 }
 0xcef   :  { %2757 = vpow2.f32 %v1810_v12 }
 0xcf7   :  { %v2756_v13 = vpop.eup %2755 }
 0xcf8   :  { %v1812_v46 = vsel %vm283_vm2, %v2756_v13, 0.0 }
 0xcf9   :  { %v2758_v14 = vpop.eup %2757  ;;  %1813 = vadd.xlane.f32.xlu0 %v1812_v46  ;;  %v2341_v46 = vld [vmem:[%s3336_s12] ss:$0 sm:$0xff] }
 0xcfa   :  { %v1815_v15 = vsel %vm283_vm2, %v2758_v14, 0.0 }
 0xcfb   :  { %1816 = vadd.xlane.f32.xlu1 %v1815_v15 }
 0xd86   :  { %v1814_v16 = vpop.xlane.xlu0 %1813 }
 0xd87   :  { %2759 = vrcp.f32 %v1814_v16 }
 0xd88   :  { %v1817_v10 = vpop.xlane.xlu1 %1816 }
 0xd89   :  { %2761 = vrcp.f32 %v1817_v10 }
 0xd91   :  { %v2760_v17 = vpop.eup %2759 }
 0xd92   :  { %v1820_v19 = vmul.f32 %v2760_v17, %v2756_v13  ;;  %v2729_v17 = vld [vmem:[%s3339_s15 + $0x10] sm:$0xff]   ;;  %s2795_s15 = smov [#allocation2]  }
 0xd93   :  { %v2762_v20 = vpop.eup %2761 }
 0xd94   :  { %v1821_v22 = vmul.f32 %v2762_v20, %v2758_v14  ;;  %v1822_v23 = vpack.c.bf16 %v1820_v19, %v1820_v19  ;;  %v2342_v19 = vld [vmem:[%s3338_s14] ss:$0 sm:$0xff]  ;;  %s2188_s14 = sshll.u32 %s2795_s15, 4  ;;  %s2189_s14 = int_to_ptr.vmem [resolvable:$true] %s2188_s14 }
 0xd95   :  { %s2769_s1 = scalar_lea.vmem %s2189_s14, 256  ;;  %p2774_p1 = scmp.lt.s32.totalorder %s2189_s14, %s2189_s14 }
 0xd96   :  { %2661 = vmatmul.mubr.msk.bf16.vlgmr.msra.gmra.mrb[56].mxu1 %vm283_vm2, %v1822_v23  ;;  %v1823_v28 = vpack.c.bf16 %v1821_v22, %v1821_v22  ;;  %p2770_p0 = scmp.ne.s32.totalorder %s2189_s14, %s2769_s1  ;;  %p2775_p2 = scmp.lt.s32.totalorder %s2769_s1, %s2769_s1 }
 0xd97   :  { %2671 = vmatpush3.bf16.msra.mxu1 %v1923_v24  ;;  %2672 = vmatprep.mubr.msk.bf16.mxu1 %vm2794_vm0, %v2793_v1 }
 0xd98   :  { %2667 = vmatmul.mubr.msk.bf16.vlgmr.msra.gmra.mrb[60].mxu0 %vm283_vm2, %v1823_v28  ;;  %2684 = vmatprep.subr.bf16.mxu1 %v2793_v1  ;;  %p2776_p3 = por %p2775_p2, %p2774_p1 }
 0xd99   :  { %2680 = vmatprep.mubr.msk.bf16.mxu0 %vm2794_vm0, %v2793_v1  ;;  %2677 = vmatpush3.bf16.msra.mxu0 %v2725_v57 }
 0xd9a   :  { %2678 = vmatprep.subr.bf16.mxu0 %v2793_v1  ;;  %p2777_p4 = pnand %p2776_p3, %p2770_p0 }
 0xd9d   :  { %2679 = vmatpush3.bf16.msra.mxu0 %v2726_v58 }
 0xe69   :  { %v1864_v29 = vpop.f32.mrb[56].mxu1 }
 0xe6a   :  { %v2662_v31 = vpop.f32.mrb[57].mxu1 }
 0xe6b   :  { %v1867_v8 = vpop.f32.mrb[58].mxu1  ;;  %v1910_v32 = vpop.f32.mrb[60].mxu0 }
 0xe6c   :  { %v1916_v33 = vpack.c.bf16 %v1910_v32, %v1864_v29  ;;  %v2663_v34 = vpop.f32.mrb[59].mxu1  ;;  %v2668_v35 = vpop.f32.mrb[61].mxu0 }
 0xe6d   :  { %v1913_v36 = vpop.f32.mrb[62].mxu0 }
 0xe6e   :  { %v2669_v4 = vpop.f32.mrb[63].mxu0  ;;  %2673 = vmatmul.mubr.msk.bf16.vlgmr.msra.gmra.mrb[60].mxu1 %vm283_vm2, %v1916_v33 }
 0xe6f   :  { %2692 = vmatprep.mubr.msk.bf16.mxu1 %vm2794_vm0, %v2793_v1  ;;  %2685 = vmatpush3.bf16.msra.mxu1 %v2727_v59 }
 0xe70   :  { %2686 = vmatprep.subr.bf16.mxu1 %v2793_v1 }
 0xe73   :  { %2687 = vmatpush3.bf16.msra.mxu1 %v2728_v60 }
 0xe74   :  { %2688 = vmatprep.subr.bf16.mxu1 %v2793_v1 }
 0xe77   :  { %2689 = vmatpush3.bf16.msra.mxu1 %v2729_v17 }
 0xe78   :  { %2690 = vmatprep.subr.bf16.mxu1 %v2793_v1  ;;  %v2346_v1 = vld [vmem:[%s3340_s16] ss:$0 sm:$0xff] }
 0xe7b   :  { %2691 = vmatpush3.bf16.msra.mxu1 %v2730_v18 }
 0xf41   :  { %v1959_v37 = vpop.f32.mrb[60].mxu1 }
 0xf42   :  { %v1966_v39 = vadd.f32 %v1959_v37, %v3202_v27  ;;  %v2674_v7 = vpop.f32.mrb[61].mxu1 }
 0xf43   :  { %v1962_v21 = vpop.f32.mrb[62].mxu1 }
 0xf44   :  { %v1975_v25 = vadd.f32 %v2339_v38, %v1966_v39  ;;  %v1967_v26 = vadd.f32 %v1962_v21, %v3205_v30  ;;  %v2675_v40 = vpop.f32.mrb[63].mxu1 }
 0xf46   :  { %v3258_v42 = vadd.f32 %v2767_v41, %v1975_v25  ;;  %v1976_v43 = vadd.f32 %v2339_v38, %v1967_v26 }
 0xf48   :  { %v3263_v45 = vadd.f32 %v2768_v44, %v1976_v43  ;;  %v1979_v27 = vsel %vm89_vm1, %v3258_v42, 0.0 }
 0xf49   :  { %1980 = vadd.xlane.f32.xlu0 %v1979_v27 }
 0xf4a   :  { %v1982_v30 = vsel %vm89_vm1, %v3263_v45, 0.0 }
 0xf4b   :  { %1983 = vadd.xlane.f32.xlu1 %v1982_v30 }
 0xfd6   :  { %v1981_v47 = vpop.xlane.xlu0 %1980 }
 0xfd7   :  { %v1986_v48 = vmul.f32 0.03125, %v1981_v47 }
 0xfd8   :  { %v1984_v49 = vpop.xlane.xlu1 %1983 }
 0xfd9   :  { %v1988_v50 = vsub.f32 %v3258_v42, %v1986_v48  ;;  %v1987_v51 = vmul.f32 0.03125, %v1984_v49 }
 0xfdb   :  { %v1989_v52 = vsub.f32 %v3263_v45, %v1987_v51  ;;  %v1990_v53 = vmul.f32 %v1988_v50, %v1988_v50 }
 0xfdd   :  { %v1992_v54 = vsel %vm89_vm1, %v1990_v53, 0.0  ;;  %v1991_v55 = vmul.f32 %v1989_v52, %v1989_v52 }
 0xfde   :  { %1993 = vadd.xlane.f32.xlu0 %v1992_v54 }
 0xfdf   :  { %v1995_v56 = vsel %vm89_vm1, %v1991_v55, 0.0 }
 0xfe0   :  { %1996 = vadd.xlane.f32.xlu1 %v1995_v56 }
0x106b   :  { %v1994_v61 = vpop.xlane.xlu0 %1993 }
0x106c   :  { %v1998_v62 = vmul.f32 0.03125, %v1994_v61 }
0x106d   :  { %v1997_v63 = vpop.xlane.xlu1 %1996 }
0x106e   :  { %v2000_v0 = vadd.f32 1e-06, %v1998_v62  ;;  %v1999_v2 = vmul.f32 0.03125, %v1997_v63 }
0x1070   :  { %2763 = vrsqrt.f32 %v2000_v0  ;;  %v2001_v3 = vadd.f32 1e-06, %v1999_v2 }
0x1072   :  { %2765 = vrsqrt.f32 %v2001_v3 }
0x107a   :  { %v2764_v5 = vpop.eup %2763 }
0x107b   :  { %v2004_v9 = vmul.f32 %v2764_v5, %v1988_v50 }
0x107c   :  { %v2766_v11 = vpop.eup %2765 }
0x107d   :  { %v2013_v12 = vmul.f32 %v2340_v6, %v2004_v9  ;;  %v2005_v13 = vmul.f32 %v2766_v11, %v1989_v52 }
0x107f   :  { %v2014_v14 = vmul.f32 %v2340_v6, %v2005_v13  ;;  %v2022_v15 = vadd.f32 %v2341_v46, %v2013_v12 }
0x1081   :  { %v2023_v16 = vadd.f32 %v2341_v46, %v2014_v14 }
0x1083   :  { %v2024_v10 = vpack.c.bf16 %v2023_v16, %v2022_v15 }
0x1085   :  { %2681 = vmatmul.mubr.msk.bf16.vlgmr.msra.gmra.mrb[64].mxu0 %vm89_vm1, %v2024_v10 }
0x1158   :  { %v2085_v20 = vpop.f32.mrb[64].mxu0 }
0x1159   :  { %v2086_v22 = vadd.f32 %v2342_v19, %v2085_v20  ;;  %v2682_v23 = vpop.f32.mrb[65].mxu0 }
0x115a   :  { %v2088_v24 = vpop.f32.mrb[66].mxu0 }
0x115b   :  { %v2089_v28 = vadd.f32 %v2342_v19, %v2088_v24  ;;  %v2683_v29 = vpop.f32.mrb[67].mxu0  ;;  %v2092_v31 = vmax.f32 %v2086_v22, 0.0 }
0x115d   :  { %v2093_v8 = vmax.f32 %v2089_v28, 0.0 }
0x115f   :  { %v2094_v32 = vpack.c.bf16 %v2093_v8, %v2092_v31 }
0x1161   :  { %2693 = vmatmul.mubr.msk.bf16.vlgmr.msra.gmra.mrb[64].mxu1 %vm2134_vm4, %v2094_v32 }
0x1234   :  { %v2172_v33 = vpop.f32.mrb[64].mxu1 }
0x1235   :  { %v2173_v34 = vadd.f32 %v2346_v1, %v2172_v33  ;;  %v2694_v35 = vpop.f32.mrb[65].mxu1 }
0x1236   :  { %v2175_v36 = vpop.f32.mrb[66].mxu1 }
0x1237   :  { %v2179_v4 = vadd.f32 %v2173_v34, %v3258_v42  ;;  %v2176_v37 = vadd.f32 %v2346_v1, %v2175_v36  ;;  %v2695_v38 = vpop.f32.mrb[67].mxu1 }
0x1239   :  { %2181 = vst.msk [vmem:[#allocation2] sm:$0xff] %vm89_vm1, %v2179_v4  ;;  %v2180_v39 = vadd.f32 %v2176_v37, %v3263_v45 }
0x123b   :  { %2182 = vst.msk [vmem:[#allocation2 + $0x8] sm:$0xff] %vm89_vm1, %v2180_v39 }
0x123c   :  { %2780 = shalt.err (!%p2777_p4)
}
0x123d   :  { %s2781_s20 = scalar_lea.hbm %s3341_s17, 256 }
0x123e   :  { %p2782_p5 = scmp.ne.s32.totalorder %s3341_s17, %s2781_s20  ;;  %p2785_p6 = scmp.lt.u32.totalorder %s2781_s20, %s3341_s17 }
0x1240   :  { %p2787_p7 = pnand %p2785_p6, %p2782_p5 }
0x1242   :  { %2790 = shalt.err (!%p2787_p7)
}
0x1243   :  { %s2796_s10 = smov 128   ;;  %s2797_s24 = smov 8  }
0x1244   :  { %2194 = dma.vmem_to_hbm [thread:$0]  %s2189_s14, 256, %s3341_s17, [#allocation3], %s2796_s10, %s2796_s10, %s2797_s24  }
0x1245   :  { %2791 = dma.done.wait [#allocation3], 256  }
0x1246   :  { %2792 = vsyncadd [#allocation3], 4294967040 }
0x1247   :  { %2198 = vsyncpa [#allocation3], 1 }

// kernel: tpu_custom_call.1
= control target key start
LH: loop header
LB: loop body
LE: loop exit
PB: predicated region body
PF: predicated region fallthrough
CT: control target
= control target key end

     0   :  { %s3324_s0 = inlined_call_operand.vmem [shape: f32[2,8,32], index: 0, kind: input, shape index: {}]   ;;  %s3325_s1 = inlined_call_operand.vmem [shape: f32[2,8,32], index: 1, kind: input, shape index: {}]   ;;  %s3326_s2 = inlined_call_operand.vmem [shape: bf16[1,8,8], index: 2, kind: input, shape index: {}]   ;;  %s3327_s3 = inlined_call_operand.vmem [shape: bf16[4,32,8], index: 3, kind: input, shape index: {}]   ;;  %s3328_s4 = inlined_call_operand.vmem [shape: f32[4,1,8], index: 4, kind: input, shape index: {}]   ;;  %s3329_s5 = inlined_call_operand.vmem [shape: bf16[4,32,8], index: 5, kind: input, shape index: {}]   ;;  %s3330_s6 = inlined_call_operand.vmem [shape: f32[4,1,8], index: 6, kind: input, shape index: {}]   ;;  %s3331_s7 = inlined_call_operand.vmem [shape: bf16[4,32,8], index: 7, kind: input, shape index: {}]   ;;  %s3332_s8 = inlined_call_operand.vmem [shape: f32[4,1,8], index: 8, kind: input, shape index: {}]   ;;  %s3333_s9 = inlined_call_operand.vmem [shape: bf16[4,8,32], index: 9, kind: input, shape index: {}]   ;;  %s3334_s10 = inlined_call_operand.vmem [shape: f32[1,32], index: 10, kind: input, shape index: {}]   ;;  %s3335_s11 = inlined_call_operand.vmem [shape: f32[1,32], index: 11, kind: input, shape index: {}]   ;;  %s3336_s12 = inlined_call_operand.vmem [shape: f32[1,32], index: 12, kind: input, shape index: {}]   ;;  %s3337_s13 = inlined_call_operand.vmem [shape: bf16[32,64], index: 13, kind: input, shape index: {}]   ;;  %s3338_s14 = inlined_call_operand.vmem [shape: f32[1,64], index: 14, kind: input, shape index: {}]   ;;  %s3339_s15 = inlined_call_operand.vmem [shape: bf16[64,32], index: 15, kind: input, shape index: {}]   ;;  %s3340_s16 = inlined_call_operand.vmem [shape: f32[1,32], index: 16, kind: input, shape index: {}]   ;;  %s3341_s17 = inlined_call_operand.hbm [shape: f32[2,8,32], index: 17, kind: output, shape index: {}]  }
   0x1   :  { %3344 = sst [smem:[#allocation5_spill]] %s3324_s0 }
   0x2   :  { %3345 = sst [smem:[#allocation6_spill]] %s3325_s1 }
   0x3   :  { %v2701_v0 = vld [vmem:[%s3329_s5] sm:$0xff]   ;;  %v2793_v1 = vmov 0.0   ;;  %v2702_v2 = vld [vmem:[%s3329_s5 + $0x8] sm:$0xff]   ;;  %vm2794_vm0 = vmmov 0   ;;  %s3346_s18 = sld [smem:[#allocation5_spill]]  ;;  %s3347_s24 = sld [smem:[#allocation6_spill]] }
   0x4   :  { %2468 = vmatprep.subr.bf16.mxu1 %v2793_v1  ;;  %2460 = vmatprep.subr.bf16.mxu0 %v2793_v1  ;;  %v2703_v3 = vld [vmem:[%s3327_s3] sm:$0xff]   ;;  %v2704_v6 = vld [vmem:[%s3327_s3 + $0x8] sm:$0xff]   ;;  %vm89_vm1 = vcmask 261120  }
   0x5   :  { %2469 = vmatpush3.bf16.msra.mxu1 %v2701_v0  ;;  %2472 = vmatprep.mubr.msk.bf16.mxu1 %vm2794_vm0, %v2793_v1  ;;  %v2705_v11 = vld [vmem:[%s3331_s7] sm:$0xff]   ;;  %v2706_v12 = vld [vmem:[%s3331_s7 + $0x8] sm:$0xff]  }
   0x6   :  { %2470 = vmatprep.subr.bf16.mxu1 %v2793_v1  ;;  %2464 = vmatprep.mubr.msk.bf16.mxu0 %vm2794_vm0, %v2793_v1 }
   0x7   :  { %2461 = vmatpush3.bf16.msra.mxu0 %v2703_v3 }
   0x8   :  { %2462 = vmatprep.subr.bf16.mxu0 %v2793_v1 }
   0x9   :  { %v61_v4 = vld [vmem:[%s3346_s18] sm:$0xff]  ;;  %v62_v5 = vld [vmem:[%s3346_s18 + $0x8] sm:$0xff]  ;;  %2471 = vmatpush3.bf16.msra.mxu1 %v2702_v2 }
   0xa   :  { %v58_v7 = vld [vmem:[%s3347_s24] sm:$0xff]  ;;  %v2916_v8 = vpack.c.bf16 %v62_v5, %v61_v4  ;;  %v59_v9 = vld [vmem:[%s3347_s24 + $0x8] sm:$0xff]  ;;  %2484 = vmatprep.subr.bf16.mxu1 %v2793_v1 }
   0xb   :  { %v2922_v10 = vpack.c.bf16 %v59_v9, %v58_v7  ;;  %2463 = vmatpush3.bf16.msra.mxu0 %v2704_v6 }
   0xc   :  { %2473 = vmatmul.mubr.msk.bf16.vlgmr.msra.gmra.mrb[0].mxu1 %vm89_vm1, %v2916_v8  ;;  %2476 = vmatprep.subr.bf16.mxu0 %v2793_v1 }
   0xd   :  { %2486 = vmatprep.mubr.msk.bf16.mxu1 %vm2794_vm0, %v2793_v1 }
   0xe   :  { %2465 = vmatmul.mubr.msk.bf16.vlgmr.msra.gmra.mrb[0].mxu0 %vm89_vm1, %v2922_v10 }
   0xf   :  { %2477 = vmatpush3.bf16.msra.mxu0 %v2705_v11  ;;  %2480 = vmatprep.mubr.msk.bf16.mxu0 %vm2794_vm0, %v2793_v1 }
  0x10   :  { %2478 = vmatprep.subr.bf16.mxu0 %v2793_v1 }
  0x13   :  { %2479 = vmatpush3.bf16.msra.mxu0 %v2706_v12 }
  0x14   :  { %2490 = vmatprep.subr.bf16.mxu0 %v2793_v1 }
  0x16   :  { %2481 = vmatmul.mubr.msk.bf16.vlgmr.msra.gmra.mrb[4].mxu0 %vm89_vm1, %v2916_v8 }
  0x17   :  { %2492 = vmatprep.mubr.msk.bf16.mxu0 %vm2794_vm0, %v2793_v1 }
  0x18   :  { %22 = vsyncpa [#allocation3], 0  ;;  %v2205_v13 = vld [vmem:[%s3330_s6] ss:$0 sm:$0xff]  ;;  %vm283_vm2 = vcmask 64512   ;;  %vm403_vm3 = vcmask 1043456  }
  0x19   :  { %v2199_v18 = vld [vmem:[%s3328_s4] ss:$0 sm:$0xff]  ;;  %v2707_v11 = vld [vmem:[%s3329_s5 + $0x10] sm:$0xff]   ;;  %vm2134_vm4 = vcmask 523264  }
  0x1a   :  { %v2211_v30 = vld [vmem:[%s3332_s8] ss:$0 sm:$0xff] }
  0x1b   :  { %v64_v44 = vld [vmem:[%s3326_s2] sm:$0xf] }
  0x1c   :  { %v2972_v46 = vunpack.c.l.bf16 %v64_v44 }
  0xdf   :  { %v200_v14 = vpop.f32.mrb[0].mxu1 }
  0xe0   :  { %v201_v15 = vadd.f32 %v2205_v13, %v200_v14  ;;  %v2474_v16 = vpop.f32.mrb[1].mxu1 }
  0xe1   :  { %v203_v17 = vpop.f32.mrb[2].mxu1  ;;  %v127_v19 = vpop.f32.mrb[0].mxu0  ;;  %v2709_v16 = vld [vmem:[%s3327_s3 + $0x10] sm:$0xff]  }
  0xe2   :  { %v2354_v20 = vpack.c.bf16 %v201_v15, %v201_v15  ;;  %v204_v21 = vadd.f32 %v2205_v13, %v203_v17  ;;  %v2475_v22 = vpop.f32.mrb[3].mxu1  ;;  %v2466_v23 = vpop.f32.mrb[1].mxu0  ;;  %v128_v27 = vadd.f32 %v2199_v18, %v127_v19  ;;  %v2708_v15 = vld [vmem:[%s3329_s5 + $0x18] sm:$0xff]   ;;  %v2711_v19 = vld [vmem:[%s3331_s7 + $0x10] sm:$0xff]  }
  0xe3   :  { %v130_v24 = vpop.f32.mrb[2].mxu0 }
  0xe4   :  { %v288_v25 = vsel %vm283_vm2, %v2354_v20, 0  ;;  %v2355_v26 = vpack.c.bf16 %v204_v21, %v204_v21  ;;  %v2467_v28 = vpop.f32.mrb[3].mxu0  ;;  %v2352_v31 = vpack.c.bf16 %v128_v27, %v128_v27  ;;  %v131_v32 = vadd.f32 %v2199_v18, %v130_v24  ;;  %v2710_v18 = vld [vmem:[%s3327_s3 + $0x18] sm:$0xff]  }
  0xe5   :  { %2485 = vmatpush3.bf16.xpose.msra.mxu1 %v288_v25  ;;  %v2712_v20 = vld [vmem:[%s3331_s7 + $0x18] sm:$0xff]  }
  0xe6   :  { %v334_v29 = vsel %vm283_vm2, %v2355_v26, 0  ;;  %2496 = vmatprep.subr.bf16.mxu1 %v2793_v1  ;;  %v2353_v37 = vpack.c.bf16 %v131_v32, %v131_v32 }
  0xe7   :  { %2491 = vmatpush3.bf16.xpose.msra.mxu0 %v334_v29  ;;  %v2237_v29 = vld [vmem:[%s3330_s6 + $0x1] ss:$0 sm:$0xff] }
  0xe8   :  { %2502 = vmatprep.subr.bf16.mxu0 %v2793_v1 }
  0xe9   :  { %v270_v33 = vpop.f32.mrb[4].mxu0 }
  0xea   :  { %v271_v34 = vadd.f32 %v2211_v30, %v270_v33  ;;  %v2482_v35 = vpop.f32.mrb[5].mxu0 }
  0xeb   :  { %v273_v36 = vpop.f32.mrb[6].mxu0  ;;  %v2226_v35 = vld [vmem:[%s3328_s4 + $0x1] ss:$0 sm:$0xff] }
  0xec   :  { %2487 = vmatmul.mubr.msk.bf16.vlgmr.msra.gmra.mrb[4].mxu1 %vm283_vm2, %v2352_v31  ;;  %v2356_v38 = vpack.c.bf16 %v271_v34, %v271_v34  ;;  %v274_v39 = vadd.f32 %v2211_v30, %v273_v36  ;;  %v2483_v40 = vpop.f32.mrb[7].mxu0 }
  0xed   :  { %2498 = vmatprep.mubr.msk.bf16.mxu1 %vm2794_vm0, %v2793_v1 }
  0xee   :  { %2493 = vmatmul.mubr.msk.bf16.vlgmr.msra.gmra.mrb[8].mxu0 %vm283_vm2, %v2353_v37  ;;  %v405_v41 = vsel %vm403_vm3, %v2356_v38, 0  ;;  %v2357_v42 = vpack.c.bf16 %v274_v39, %v274_v39 }
  0xef   :  { %2497 = vmatpush3.bf16.msra.mxu1 %v405_v41  ;;  %2504 = vmatprep.mubr.msk.bf16.mxu0 %vm2794_vm0, %v2793_v1 }
  0xf0   :  { %v451_v43 = vsel %vm403_vm3, %v2357_v42, 0  ;;  %2508 = vmatprep.subr.bf16.mxu1 %v2793_v1 }
  0xf1   :  { %2503 = vmatpush3.bf16.msra.mxu0 %v451_v43 }
  0xf2   :  { %2516 = vmatprep.subr.bf16.mxu0 %v2793_v1 }
 0x1bf   :  { %v324_v45 = vpop.f32.mrb[4].mxu1 }
 0x1c0   :  { %v2488_v47 = vpop.f32.mrb[5].mxu1  ;;  %v325_v54 = vadd.f32 %v324_v45, %v2972_v46 }
 0x1c1   :  { %v327_v48 = vpop.f32.mrb[6].mxu1  ;;  %v370_v49 = vpop.f32.mrb[8].mxu0 }
 0x1c2   :  { %v371_v50 = vadd.f32 %v370_v49, %v2972_v46  ;;  %v2489_v51 = vpop.f32.mrb[7].mxu1  ;;  %v2494_v52 = vpop.f32.mrb[9].mxu0  ;;  %v376_v57 = vsel %vm283_vm2, %v325_v54, -inf }
 0x1c3   :  { %v373_v53 = vpop.f32.mrb[10].mxu0  ;;  %v2248_v51 = vld [vmem:[%s3332_s8 + $0x1] ss:$0 sm:$0xff] }
 0x1c4   :  { %v2495_v55 = vpop.f32.mrb[11].mxu0  ;;  %v379_v56 = vsel %vm283_vm2, %v371_v50, -inf }
 0x1c5   :  { %380 = vmax.xlane.f32.xlu0 %v379_v56 }
 0x1c9   :  { %377 = vmax.xlane.f32.xlu0 %v376_v57 }
 0x252   :  { %v381_v58 = vpop.xlane.xlu0 %380 }
 0x253   :  { %v383_v59 = vsub.f32 %v371_v50, %v381_v58 }
 0x255   :  { %v386_v60 = vmul.f32 1.442695, %v383_v59 }
 0x256   :  { %v378_v61 = vpop.xlane.xlu0 %377 }
 0x257   :  { %2731 = vpow2.f32 %v386_v60  ;;  %v382_v62 = vsub.f32 %v325_v54, %v378_v61 }
 0x259   :  { %v384_v63 = vmul.f32 1.442695, %v382_v62 }
 0x25b   :  { %2733 = vpow2.f32 %v384_v63 }
 0x261   :  { %v2732_v0 = vpop.eup %2731 }
 0x262   :  { %v391_v2 = vsel %vm283_vm2, %v2732_v0, 0.0 }
 0x263   :  { %392 = vadd.xlane.f32.xlu1 %v391_v2 }
 0x265   :  { %v2734_v3 = vpop.eup %2733 }
 0x266   :  { %v388_v4 = vsel %vm283_vm2, %v2734_v3, 0.0 }
 0x267   :  { %389 = vadd.xlane.f32.xlu1 %v388_v4 }
 0x2f0   :  { %v393_v5 = vpop.xlane.xlu1 %392 }
 0x2f1   :  { %2735 = vrcp.f32 %v393_v5 }
 0x2f4   :  { %v390_v6 = vpop.xlane.xlu1 %389 }
 0x2f5   :  { %2737 = vrcp.f32 %v390_v6 }
 0x2fb   :  { %v2736_v7 = vpop.eup %2735 }
 0x2fc   :  { %v397_v9 = vmul.f32 %v2736_v7, %v2732_v0 }
 0x2fe   :  { %v399_v12 = vpack.c.bf16 %v397_v9, %v397_v9 }
 0x2ff   :  { %v2738_v13 = vpop.eup %2737 }
 0x300   :  { %v396_v14 = vmul.f32 %v2738_v13, %v2734_v3  ;;  %2505 = vmatmul.mubr.msk.bf16.vlgmr.msra.gmra.mrb[12].mxu0 %vm283_vm2, %v399_v12 }
 0x301   :  { %2517 = vmatpush3.bf16.msra.mxu0 %v2707_v11  ;;  %2520 = vmatprep.mubr.msk.bf16.mxu0 %vm2794_vm0, %v2793_v1 }
 0x302   :  { %v398_v17 = vpack.c.bf16 %v396_v14, %v396_v14  ;;  %2518 = vmatprep.subr.bf16.mxu0 %v2793_v1 }
 0x304   :  { %2499 = vmatmul.mubr.msk.bf16.vlgmr.msra.gmra.mrb[8].mxu1 %vm283_vm2, %v398_v17 }
 0x305   :  { %2519 = vmatpush3.bf16.msra.mxu0 %v2708_v15  ;;  %2509 = vmatpush3.bf16.msra.mxu1 %v2709_v16 }
 0x306   :  { %2510 = vmatprep.subr.bf16.mxu1 %v2793_v1  ;;  %2512 = vmatprep.mubr.msk.bf16.mxu1 %vm2794_vm0, %v2793_v1 }
 0x307   :  { %2532 = vmatprep.subr.bf16.mxu0 %v2793_v1 }
 0x308   :  { %2521 = vmatmul.mubr.msk.bf16.vlgmr.msra.gmra.mrb[16].mxu0 %vm89_vm1, %v2916_v8 }
 0x309   :  { %2511 = vmatpush3.bf16.msra.mxu1 %v2710_v18  ;;  %2534 = vmatprep.mubr.msk.bf16.mxu0 %vm2794_vm0, %v2793_v1 }
 0x30a   :  { %2524 = vmatprep.subr.bf16.mxu1 %v2793_v1 }
 0x30c   :  { %2513 = vmatmul.mubr.msk.bf16.vlgmr.msra.gmra.mrb[12].mxu1 %vm89_vm1, %v2922_v10 }
 0x30d   :  { %2528 = vmatprep.mubr.msk.bf16.mxu1 %vm2794_vm0, %v2793_v1  ;;  %2525 = vmatpush3.bf16.msra.mxu1 %v2711_v19 }
 0x30e   :  { %2526 = vmatprep.subr.bf16.mxu1 %v2793_v1 }
 0x311   :  { %2527 = vmatpush3.bf16.msra.mxu1 %v2712_v20 }
 0x312   :  { %2538 = vmatprep.subr.bf16.mxu1 %v2793_v1 }
 0x314   :  { %2529 = vmatmul.mubr.msk.bf16.vlgmr.msra.gmra.mrb[16].mxu1 %vm89_vm1, %v2916_v8 }
 0x315   :  { %2540 = vmatprep.mubr.msk.bf16.mxu1 %vm2794_vm0, %v2793_v1 }
 0x3d3   :  { %v3022_v21 = vpop.f32.mrb[12].mxu0 }
 0x3d4   :  { %v2506_v22 = vpop.f32.mrb[13].mxu0 }
 0x3d5   :  { %v490_v23 = vpop.f32.mrb[14].mxu0 }
 0x3d6   :  { %v2507_v24 = vpop.f32.mrb[15].mxu0 }
 0x3d7   :  { %v3024_v25 = vpop.f32.mrb[8].mxu1 }
 0x3d8   :  { %v493_v26 = vpack.c.bf16 %v3022_v21, %v3024_v25  ;;  %v2500_v27 = vpop.f32.mrb[9].mxu1 }
 0x3d9   :  { %v444_v28 = vpop.f32.mrb[10].mxu1 }
 0x3da   :  { %v2501_v30 = vpop.f32.mrb[11].mxu1 }
 0x3db   :  { %v626_v31 = vpop.f32.mrb[16].mxu0 }
 0x3dc   :  { %v627_v32 = vadd.f32 %v2237_v29, %v626_v31  ;;  %v2522_v33 = vpop.f32.mrb[17].mxu0 }
 0x3dd   :  { %v629_v34 = vpop.f32.mrb[18].mxu0 }
 0x3de   :  { %v2360_v36 = vpack.c.bf16 %v627_v32, %v627_v32  ;;  %v630_v37 = vadd.f32 %v2237_v29, %v629_v34  ;;  %v2523_v38 = vpop.f32.mrb[19].mxu0  ;;  %v2258_v29 = vld [vmem:[%s3333_s9 + $0x4] sm:$0xf]  ;;  %v494_v32 = vld [vmem:[%s3333_s9] sm:$0xf] }
 0x3df   :  { %v554_v39 = vpop.f32.mrb[12].mxu1  ;;  %v2713_v38 = vld [vmem:[%s3329_s5 + $0x20] sm:$0xff]  }
 0x3e0   :  { %v715_v40 = vsel %vm283_vm2, %v2360_v36, 0  ;;  %v2361_v41 = vpack.c.bf16 %v630_v37, %v630_v37  ;;  %v555_v42 = vadd.f32 %v2226_v35, %v554_v39  ;;  %v2514_v43 = vpop.f32.mrb[13].mxu1  ;;  %v973_v37 = vsel %vm403_vm3, %v494_v32, 0  ;;  %v2714_v39 = vld [vmem:[%s3329_s5 + $0x28] sm:$0xff]  }
 0x3e1   :  { %2533 = vmatpush3.bf16.xpose.msra.mxu0 %v715_v40  ;;  %v557_v44 = vpop.f32.mrb[14].mxu1 }
 0x3e2   :  { %v761_v45 = vsel %vm283_vm2, %v2361_v41, 0  ;;  %v2515_v47 = vpop.f32.mrb[15].mxu1  ;;  %2544 = vmatprep.subr.bf16.mxu0 %v2793_v1  ;;  %v2358_v48 = vpack.c.bf16 %v555_v42, %v555_v42  ;;  %v558_v49 = vadd.f32 %v2226_v35, %v557_v44  ;;  %v926_v35 = vsel %vm403_vm3, %v2258_v29, 0  ;;  %v2715_v41 = vld [vmem:[%s3327_s3 + $0x20] sm:$0xff]  }
 0x3e3   :  { %2539 = vmatpush3.bf16.xpose.msra.mxu1 %v761_v45 }
 0x3e4   :  { %2550 = vmatprep.subr.bf16.mxu1 %v2793_v1  ;;  %v2359_v50 = vpack.c.bf16 %v558_v49, %v558_v49 }
 0x3e7   :  { %v698_v52 = vpop.f32.mrb[16].mxu1 }
 0x3e8   :  { %2535 = vmatmul.mubr.msk.bf16.vlgmr.msra.gmra.mrb[20].mxu0 %vm283_vm2, %v2358_v48  ;;  %v699_v53 = vadd.f32 %v2248_v51, %v698_v52  ;;  %v2530_v54 = vpop.f32.mrb[17].mxu1  ;;  %v2716_v48 = vld [vmem:[%s3327_s3 + $0x28] sm:$0xff]  }
 0x3e9   :  { %2546 = vmatprep.mubr.msk.bf16.mxu0 %vm2794_vm0, %v2793_v1  ;;  %v701_v55 = vpop.f32.mrb[18].mxu1  ;;  %v2718_v54 = vld [vmem:[%s3331_s7 + $0x28] sm:$0xff]  }
 0x3ea   :  { %2541 = vmatmul.mubr.msk.bf16.vlgmr.msra.gmra.mrb[20].mxu1 %vm283_vm2, %v2359_v50  ;;  %v2362_v56 = vpack.c.bf16 %v699_v53, %v699_v53  ;;  %v702_v57 = vadd.f32 %v2248_v51, %v701_v55  ;;  %v2531_v58 = vpop.f32.mrb[19].mxu1  ;;  %v2717_v50 = vld [vmem:[%s3331_s7 + $0x20] sm:$0xff]  }
 0x3eb   :  { %2552 = vmatprep.mubr.msk.bf16.mxu1 %vm2794_vm0, %v2793_v1  ;;  %v2277_v55 = vld [vmem:[%s3330_s6 + $0x2] ss:$0 sm:$0xff] }
 0x3ec   :  { %v831_v59 = vsel %vm403_vm3, %v2362_v56, 0  ;;  %v2363_v60 = vpack.c.bf16 %v702_v57, %v702_v57 }
 0x3ed   :  { %2545 = vmatpush3.bf16.msra.mxu0 %v831_v59 }
 0x3ee   :  { %v877_v61 = vsel %vm403_vm3, %v2363_v60, 0  ;;  %2556 = vmatprep.subr.bf16.mxu0 %v2793_v1 }
 0x3ef   :  { %2551 = vmatpush3.bf16.msra.mxu1 %v877_v61 }
 0x3f0   :  { %2562 = vmatprep.subr.bf16.mxu1 %v2793_v1 }
 0x4bb   :  { %v751_v62 = vpop.f32.mrb[20].mxu0 }
 0x4bc   :  { %v752_v63 = vadd.f32 %v751_v62, %v2972_v46  ;;  %v2536_v0 = vpop.f32.mrb[21].mxu0 }
 0x4bd   :  { %v754_v2 = vpop.f32.mrb[22].mxu0  ;;  %v797_v3 = vpop.f32.mrb[20].mxu1 }
 0x4be   :  { %v798_v4 = vadd.f32 %v797_v3, %v2972_v46  ;;  %v2537_v5 = vpop.f32.mrb[23].mxu0  ;;  %v2542_v6 = vpop.f32.mrb[21].mxu1  ;;  %v803_v7 = vsel %vm283_vm2, %v752_v63, -inf }
 0x4bf   :  { %v800_v9 = vpop.f32.mrb[22].mxu1  ;;  %804 = vmax.xlane.f32.xlu0 %v803_v7 }
 0x4c0   :  { %v2543_v11 = vpop.f32.mrb[23].mxu1  ;;  %v806_v12 = vsel %vm283_vm2, %v798_v4, -inf }
 0x4c1   :  { %807 = vmax.xlane.f32.xlu1 %v806_v12  ;;  %v2266_v11 = vld [vmem:[%s3328_s4 + $0x2] ss:$0 sm:$0xff] }
 0x54c   :  { %v805_v13 = vpop.xlane.xlu0 %804 }
 0x54d   :  { %v809_v14 = vsub.f32 %v752_v63, %v805_v13 }
 0x54e   :  { %v808_v15 = vpop.xlane.xlu1 %807 }
 0x54f   :  { %v811_v16 = vmul.f32 1.442695, %v809_v14  ;;  %v810_v17 = vsub.f32 %v798_v4, %v808_v15 }
 0x551   :  { %2739 = vpow2.f32 %v811_v16  ;;  %v813_v18 = vmul.f32 1.442695, %v810_v17 }
 0x553   :  { %2741 = vpow2.f32 %v813_v18 }
 0x55b   :  { %v2740_v19 = vpop.eup %2739 }
 0x55c   :  { %v815_v20 = vsel %vm283_vm2, %v2740_v19, 0.0 }
 0x55d   :  { %v2742_v22 = vpop.eup %2741  ;;  %816 = vadd.xlane.f32.xlu0 %v815_v20  ;;  %v2288_v20 = vld [vmem:[%s3332_s8 + $0x2] ss:$0 sm:$0xff] }
 0x55e   :  { %v818_v23 = vsel %vm283_vm2, %v2742_v22, 0.0 }
 0x55f   :  { %819 = vadd.xlane.f32.xlu1 %v818_v23 }
 0x5ea   :  { %v817_v24 = vpop.xlane.xlu0 %816 }
 0x5eb   :  { %2743 = vrcp.f32 %v817_v24 }
 0x5ec   :  { %v820_v27 = vpop.xlane.xlu1 %819 }
 0x5ed   :  { %2745 = vrcp.f32 %v820_v27 }
 0x5f5   :  { %v2744_v28 = vpop.eup %2743 }
 0x5f6   :  { %v823_v30 = vmul.f32 %v2744_v28, %v2740_v19 }
 0x5f7   :  { %v2746_v31 = vpop.eup %2745 }
 0x5f8   :  { %v824_v33 = vmul.f32 %v2746_v31, %v2742_v22  ;;  %v825_v34 = vpack.c.bf16 %v823_v30, %v823_v30 }
 0x5fa   :  { %2547 = vmatmul.mubr.msk.bf16.vlgmr.msra.gmra.mrb[24].mxu0 %vm283_vm2, %v825_v34  ;;  %v826_v36 = vpack.c.bf16 %v824_v33, %v824_v33 }
 0x5fb   :  { %2557 = vmatpush3.bf16.msra.mxu0 %v926_v35  ;;  %2558 = vmatprep.mubr.msk.bf16.mxu0 %vm2794_vm0, %v2793_v1 }
 0x5fc   :  { %2553 = vmatmul.mubr.msk.bf16.vlgmr.msra.gmra.mrb[24].mxu1 %vm283_vm2, %v826_v36  ;;  %2568 = vmatprep.subr.bf16.mxu0 %v2793_v1 }
 0x5fd   :  { %2563 = vmatpush3.bf16.msra.mxu1 %v973_v37  ;;  %2564 = vmatprep.mubr.msk.bf16.mxu1 %vm2794_vm0, %v2793_v1 }
 0x5fe   :  { %2576 = vmatprep.subr.bf16.mxu1 %v2793_v1 }
 0x604   :  { %2565 = vmatmul.mubr.msk.bf16.vlgmr.msra.gmra.mrb[28].mxu1 %vm283_vm2, %v493_v26 }
 0x605   :  { %2577 = vmatpush3.bf16.msra.mxu1 %v2713_v38  ;;  %2580 = vmatprep.mubr.msk.bf16.mxu1 %vm2794_vm0, %v2793_v1 }
 0x606   :  { %2578 = vmatprep.subr.bf16.mxu1 %v2793_v1 }
 0x609   :  { %2579 = vmatpush3.bf16.msra.mxu1 %v2714_v39 }
 0x60a   :  { %2592 = vmatprep.subr.bf16.mxu1 %v2793_v1 }
 0x60c   :  { %2581 = vmatmul.mubr.msk.bf16.vlgmr.msra.gmra.mrb[32].mxu1 %vm89_vm1, %v2916_v8 }
 0x60d   :  { %2594 = vmatprep.mubr.msk.bf16.mxu1 %vm2794_vm0, %v2793_v1 }
 0x6cd   :  { %v867_v21 = vpop.f32.mrb[24].mxu0 }
 0x6ce   :  { %v2548_v25 = vpop.f32.mrb[25].mxu0 }
 0x6cf   :  { %v870_v26 = vpop.f32.mrb[26].mxu0  ;;  %v913_v40 = vpop.f32.mrb[24].mxu1 }
 0x6d0   :  { %v919_v42 = vpack.c.bf16 %v913_v40, %v867_v21  ;;  %v2549_v43 = vpop.f32.mrb[27].mxu0  ;;  %v2554_v44 = vpop.f32.mrb[25].mxu1 }
 0x6d1   :  { %v916_v45 = vpop.f32.mrb[26].mxu1 }
 0x6d2   :  { %v2555_v47 = vpop.f32.mrb[27].mxu1  ;;  %2559 = vmatmul.mubr.msk.bf16.vlgmr.msra.gmra.mrb[28].mxu0 %vm283_vm2, %v919_v42 }
 0x6d3   :  { %2569 = vmatpush3.bf16.msra.mxu0 %v2715_v41  ;;  %2572 = vmatprep.mubr.msk.bf16.mxu0 %vm2794_vm0, %v2793_v1 }
 0x6d4   :  { %2570 = vmatprep.subr.bf16.mxu0 %v2793_v1 }
 0x6d7   :  { %v1009_v49 = vpop.f32.mrb[28].mxu1  ;;  %2571 = vmatpush3.bf16.msra.mxu0 %v2716_v48 }
 0x6d8   :  { %v2566_v51 = vpop.f32.mrb[29].mxu1  ;;  %2584 = vmatprep.subr.bf16.mxu0 %v2793_v1 }
 0x6d9   :  { %v1012_v52 = vpop.f32.mrb[30].mxu1 }
 0x6da   :  { %v2567_v53 = vpop.f32.mrb[31].mxu1  ;;  %2573 = vmatmul.mubr.msk.bf16.vlgmr.msra.gmra.mrb[32].mxu0 %vm89_vm1, %v2922_v10 }
 0x6db   :  { %2585 = vmatpush3.bf16.msra.mxu0 %v2717_v50  ;;  %2588 = vmatprep.mubr.msk.bf16.mxu0 %vm2794_vm0, %v2793_v1 }
 0x6dc   :  { %2586 = vmatprep.subr.bf16.mxu0 %v2793_v1 }
 0x6df   :  { %v1147_v56 = vpop.f32.mrb[32].mxu1  ;;  %2587 = vmatpush3.bf16.msra.mxu0 %v2718_v54 }
 0x6e0   :  { %v1148_v57 = vadd.f32 %v2277_v55, %v1147_v56  ;;  %v2582_v58 = vpop.f32.mrb[33].mxu1  ;;  %2598 = vmatprep.subr.bf16.mxu0 %v2793_v1 }
 0x6e1   :  { %v1150_v59 = vpop.f32.mrb[34].mxu1 }
 0x6e2   :  { %v2366_v60 = vpack.c.bf16 %v1148_v57, %v1148_v57  ;;  %v1151_v61 = vadd.f32 %v2277_v55, %v1150_v59  ;;  %v2583_v62 = vpop.f32.mrb[35].mxu1  ;;  %2589 = vmatmul.mubr.msk.bf16.vlgmr.msra.gmra.mrb[36].mxu0 %vm89_vm1, %v2916_v8  ;;  %v2298_v57 = vld [vmem:[%s3333_s9 + $0x8] sm:$0xf] }
 0x6e3   :  { %2600 = vmatprep.mubr.msk.bf16.mxu0 %vm2794_vm0, %v2793_v1  ;;  %v1447_v62 = vsel %vm403_vm3, %v2298_v57, 0 }
 0x6e4   :  { %v1236_v63 = vsel %vm283_vm2, %v2366_v60, 0  ;;  %v2367_v0 = vpack.c.bf16 %v1151_v61, %v1151_v61 }
 0x6e5   :  { %2593 = vmatpush3.bf16.xpose.msra.mxu1 %v1236_v63 }
 0x6e6   :  { %v1282_v2 = vsel %vm283_vm2, %v2367_v0, 0  ;;  %2604 = vmatprep.subr.bf16.mxu1 %v2793_v1  ;;  %v2721_v0 = vld [vmem:[%s3327_s3 + $0x30] sm:$0xff]  }
 0x6e8   :  { %2599 = vmatpush3.bf16.xpose.msra.mxu0 %v1282_v2  ;;  %v2722_v2 = vld [vmem:[%s3327_s3 + $0x38] sm:$0xff]  }
 0x6e9   :  { %2610 = vmatprep.subr.bf16.mxu0 %v2793_v1 }
 0x7a5   :  { %v962_v3 = vpop.f32.mrb[28].mxu0 }
 0x7a6   :  { %v3125_v4 = vadd.f32 %v1009_v49, %v962_v3  ;;  %v2560_v5 = vpop.f32.mrb[29].mxu0 }
 0x7a7   :  { %v965_v6 = vpop.f32.mrb[30].mxu0 }
 0x7a8   :  { %v3127_v7 = vadd.f32 %v1012_v52, %v965_v6  ;;  %v2561_v9 = vpop.f32.mrb[31].mxu0 }
 0x7ad   :  { %v1075_v12 = vpop.f32.mrb[32].mxu0 }
 0x7ae   :  { %v1076_v13 = vadd.f32 %v2266_v11, %v1075_v12  ;;  %v2574_v14 = vpop.f32.mrb[33].mxu0 }
 0x7af   :  { %v1078_v15 = vpop.f32.mrb[34].mxu0 }
 0x7b0   :  { %v2364_v16 = vpack.c.bf16 %v1076_v13, %v1076_v13  ;;  %v1079_v17 = vadd.f32 %v2266_v11, %v1078_v15  ;;  %v2575_v18 = vpop.f32.mrb[35].mxu0  ;;  %v2719_v11 = vld [vmem:[%s3329_s5 + $0x30] sm:$0xff]  }
 0x7b1   :  { %v2724_v18 = vld [vmem:[%s3331_s7 + $0x38] sm:$0xff]  }
 0x7b2   :  { %v2365_v19 = vpack.c.bf16 %v1079_v17, %v1079_v17  ;;  %2595 = vmatmul.mubr.msk.bf16.vlgmr.msra.gmra.mrb[36].mxu1 %vm283_vm2, %v2364_v16  ;;  %v2723_v17 = vld [vmem:[%s3331_s7 + $0x30] sm:$0xff]  }
 0x7b3   :  { %2606 = vmatprep.mubr.msk.bf16.mxu1 %vm2794_vm0, %v2793_v1 }
 0x7b4   :  { %2601 = vmatmul.mubr.msk.bf16.vlgmr.msra.gmra.mrb[40].mxu0 %vm283_vm2, %v2365_v19 }
 0x7b5   :  { %v1219_v22 = vpop.f32.mrb[36].mxu0  ;;  %2612 = vmatprep.mubr.msk.bf16.mxu0 %vm2794_vm0, %v2793_v1 }
 0x7b6   :  { %v1220_v23 = vadd.f32 %v2288_v20, %v1219_v22  ;;  %v2590_v24 = vpop.f32.mrb[37].mxu0 }
 0x7b7   :  { %v1222_v27 = vpop.f32.mrb[38].mxu0 }
 0x7b8   :  { %v2368_v28 = vpack.c.bf16 %v1220_v23, %v1220_v23  ;;  %v1223_v29 = vadd.f32 %v2288_v20, %v1222_v27  ;;  %v2591_v30 = vpop.f32.mrb[39].mxu0 }
 0x7ba   :  { %v1352_v31 = vsel %vm403_vm3, %v2368_v28, 0  ;;  %v2369_v32 = vpack.c.bf16 %v1223_v29, %v1223_v29 }
 0x7bb   :  { %2605 = vmatpush3.bf16.msra.mxu1 %v1352_v31 }
 0x7bc   :  { %v1398_v33 = vsel %vm403_vm3, %v2369_v32, 0  ;;  %2616 = vmatprep.subr.bf16.mxu1 %v2793_v1 }
 0x7bd   :  { %2611 = vmatpush3.bf16.msra.mxu0 %v1398_v33 }
 0x7be   :  { %2622 = vmatprep.subr.bf16.mxu0 %v2793_v1 }
 0x885   :  { %v1272_v34 = vpop.f32.mrb[36].mxu1 }
 0x886   :  { %v1273_v35 = vadd.f32 %v1272_v34, %v2972_v46  ;;  %v2596_v36 = vpop.f32.mrb[37].mxu1 }
 0x887   :  { %v1275_v37 = vpop.f32.mrb[38].mxu1  ;;  %v1318_v38 = vpop.f32.mrb[40].mxu0  ;;  %v2305_v36 = vld [vmem:[%s3328_s4 + $0x3] ss:$0 sm:$0xff] }
 0x888   :  { %v1319_v39 = vadd.f32 %v1318_v38, %v2972_v46  ;;  %v2597_v21 = vpop.f32.mrb[39].mxu1  ;;  %v2602_v25 = vpop.f32.mrb[41].mxu0  ;;  %v1324_v26 = vsel %vm283_vm2, %v1273_v35, -inf }
 0x889   :  { %1325 = vmax.xlane.f32.xlu0 %v1324_v26  ;;  %v1321_v40 = vpop.f32.mrb[42].mxu0 }
 0x88a   :  { %v2603_v41 = vpop.f32.mrb[43].mxu0  ;;  %v1327_v42 = vsel %vm283_vm2, %v1319_v39, -inf }
 0x88b   :  { %1328 = vmax.xlane.f32.xlu1 %v1327_v42  ;;  %v2327_v42 = vld [vmem:[%s3332_s8 + $0x3] ss:$0 sm:$0xff] }
 0x916   :  { %v1326_v43 = vpop.xlane.xlu0 %1325 }
 0x917   :  { %v1330_v44 = vsub.f32 %v1273_v35, %v1326_v43 }
 0x918   :  { %v1329_v45 = vpop.xlane.xlu1 %1328 }
 0x919   :  { %v1332_v47 = vmul.f32 1.442695, %v1330_v44  ;;  %v1331_v48 = vsub.f32 %v1319_v39, %v1329_v45 }
 0x91b   :  { %2747 = vpow2.f32 %v1332_v47  ;;  %v1334_v49 = vmul.f32 1.442695, %v1331_v48 }
 0x91d   :  { %2749 = vpow2.f32 %v1334_v49 }
 0x925   :  { %v2748_v50 = vpop.eup %2747 }
 0x926   :  { %v1336_v51 = vsel %vm283_vm2, %v2748_v50, 0.0 }
 0x927   :  { %v2750_v52 = vpop.eup %2749  ;;  %1337 = vadd.xlane.f32.xlu0 %v1336_v51 }
 0x928   :  { %v1339_v53 = vsel %vm283_vm2, %v2750_v52, 0.0 }
 0x929   :  { %1340 = vadd.xlane.f32.xlu1 %v1339_v53 }
 0x9b4   :  { %v1338_v54 = vpop.xlane.xlu0 %1337 }
 0x9b5   :  { %2751 = vrcp.f32 %v1338_v54 }
 0x9b6   :  { %v1341_v55 = vpop.xlane.xlu1 %1340 }
 0x9b7   :  { %2753 = vrcp.f32 %v1341_v55 }
 0x9bf   :  { %v2752_v56 = vpop.eup %2751 }
 0x9c0   :  { %v1344_v58 = vmul.f32 %v2752_v56, %v2748_v50 }
 0x9c1   :  { %v2754_v59 = vpop.eup %2753 }
 0x9c2   :  { %v1345_v60 = vmul.f32 %v2754_v59, %v2750_v52  ;;  %v1346_v61 = vpack.c.bf16 %v1344_v58, %v1344_v58 }
 0x9c4   :  { %2607 = vmatmul.mubr.msk.bf16.vlgmr.msra.gmra.mrb[40].mxu1 %vm283_vm2, %v1346_v61  ;;  %v1347_v63 = vpack.c.bf16 %v1345_v60, %v1345_v60 }
 0x9c5   :  { %2617 = vmatpush3.bf16.msra.mxu1 %v1447_v62  ;;  %2618 = vmatprep.mubr.msk.bf16.mxu1 %vm2794_vm0, %v2793_v1 }
 0x9c6   :  { %2613 = vmatmul.mubr.msk.bf16.vlgmr.msra.gmra.mrb[44].mxu0 %vm283_vm2, %v1347_v63  ;;  %2630 = vmatprep.subr.bf16.mxu1 %v2793_v1 }
 0x9c7   :  { %2626 = vmatprep.mubr.msk.bf16.mxu0 %vm2794_vm0, %v2793_v1  ;;  %2623 = vmatpush3.bf16.msra.mxu0 %v2721_v0 }
 0x9c8   :  { %2624 = vmatprep.subr.bf16.mxu0 %v2793_v1 }
 0x9cb   :  { %2625 = vmatpush3.bf16.msra.mxu0 %v2722_v2 }
 0x9cc   :  { %2638 = vmatprep.subr.bf16.mxu0 %v2793_v1 }
 0x9ce   :  { %2627 = vmatmul.mubr.msk.bf16.vlgmr.msra.gmra.mrb[48].mxu0 %vm89_vm1, %v2922_v10  ;;  %v2720_v10 = vld [vmem:[%s3329_s5 + $0x38] sm:$0xff]  }
 0x9cf   :  { %2642 = vmatprep.mubr.msk.bf16.mxu0 %vm2794_vm0, %v2793_v1  ;;  %2639 = vmatpush3.bf16.msra.mxu0 %v2723_v17 }
 0x9d0   :  { %2640 = vmatprep.subr.bf16.mxu0 %v2793_v1 }
 0x9d3   :  { %2641 = vmatpush3.bf16.msra.mxu0 %v2724_v18  ;;  %v2337_v18 = vld [vmem:[%s3333_s9 + $0xc] sm:$0xf] }
 0x9d4   :  { %2652 = vmatprep.subr.bf16.mxu0 %v2793_v1 }
 0x9d6   :  { %2643 = vmatmul.mubr.msk.bf16.vlgmr.msra.gmra.mrb[52].mxu0 %vm89_vm1, %v2916_v8 }
 0x9d7   :  { %2654 = vmatprep.mubr.msk.bf16.mxu0 %vm2794_vm0, %v2793_v1 }
 0xa97   :  { %v1388_v3 = vpop.f32.mrb[40].mxu1 }
 0xa98   :  { %v2608_v5 = vpop.f32.mrb[41].mxu1 }
 0xa99   :  { %v1391_v6 = vpop.f32.mrb[42].mxu1  ;;  %v1434_v9 = vpop.f32.mrb[44].mxu0 }
 0xa9a   :  { %v1440_v12 = vpack.c.bf16 %v1434_v9, %v1388_v3  ;;  %v2609_v13 = vpop.f32.mrb[43].mxu1  ;;  %v2614_v14 = vpop.f32.mrb[45].mxu0 }
 0xa9b   :  { %v1437_v15 = vpop.f32.mrb[46].mxu0 }
 0xa9c   :  { %v2615_v16 = vpop.f32.mrb[47].mxu0  ;;  %2619 = vmatmul.mubr.msk.bf16.vlgmr.msra.gmra.mrb[44].mxu1 %vm283_vm2, %v1440_v12 }
 0xa9d   :  { %2631 = vmatpush3.bf16.msra.mxu1 %v2719_v11  ;;  %2634 = vmatprep.mubr.msk.bf16.mxu1 %vm2794_vm0, %v2793_v1 }
 0xa9e   :  { %2632 = vmatprep.subr.bf16.mxu1 %v2793_v1 }
 0xaa1   :  { %2633 = vmatpush3.bf16.msra.mxu1 %v2720_v10  ;;  %v1551_v19 = vpop.f32.mrb[48].mxu0 }
 0xaa2   :  { %2646 = vmatprep.subr.bf16.mxu1 %v2793_v1  ;;  %v2628_v20 = vpop.f32.mrb[49].mxu0  ;;  %v1552_v21 = vadd.f32 %v2305_v36, %v1551_v19 }
 0xaa3   :  { %v1554_v22 = vpop.f32.mrb[50].mxu0 }
 0xaa4   :  { %2635 = vmatmul.mubr.msk.bf16.vlgmr.msra.gmra.mrb[48].mxu1 %vm89_vm1, %v2916_v8  ;;  %v2629_v23 = vpop.f32.mrb[51].mxu0  ;;  %v2316_v8 = vld [vmem:[%s3330_s6 + $0x3] ss:$0 sm:$0xff]  ;;  %v2370_v26 = vpack.c.bf16 %v1552_v21, %v1552_v21  ;;  %v1555_v40 = vadd.f32 %v2305_v36, %v1554_v22 }
 0xaa5   :  { %2648 = vmatprep.mubr.msk.bf16.mxu1 %vm2794_vm0, %v2793_v1 }
 0xaa6   :  { %v2371_v41 = vpack.c.bf16 %v1555_v40, %v1555_v40 }
 0xaa9   :  { %v1695_v43 = vpop.f32.mrb[52].mxu0 }
 0xaaa   :  { %v1696_v44 = vadd.f32 %v2327_v42, %v1695_v43  ;;  %v2644_v45 = vpop.f32.mrb[53].mxu0 }
 0xaab   :  { %v1698_v47 = vpop.f32.mrb[54].mxu0 }
 0xaac   :  { %v2374_v48 = vpack.c.bf16 %v1696_v44, %v1696_v44  ;;  %v1699_v49 = vadd.f32 %v2327_v42, %v1698_v47  ;;  %v2645_v50 = vpop.f32.mrb[55].mxu0  ;;  %v2768_v44 = vld [vmem:[%s3347_s24 + $0x8] sm:$0xff] }
 0xaae   :  { %v1828_v51 = vsel %vm403_vm3, %v2374_v48, 0  ;;  %v2375_v52 = vpack.c.bf16 %v1699_v49, %v1699_v49 }
 0xab0   :  { %v1874_v53 = vsel %vm403_vm3, %v2375_v52, 0 }
 0xb6f   :  { %v1483_v24 = vpop.f32.mrb[44].mxu1 }
 0xb70   :  { %v3202_v27 = vadd.f32 %v1483_v24, %v3125_v4  ;;  %v2620_v28 = vpop.f32.mrb[45].mxu1  ;;  %v1923_v24 = vsel %vm403_vm3, %v2337_v18, 0  ;;  %v2730_v18 = vld [vmem:[%s3339_s15 + $0x18] sm:$0xff]  }
 0xb71   :  { %v1486_v29 = vpop.f32.mrb[46].mxu1 }
 0xb72   :  { %v3205_v30 = vadd.f32 %v1486_v29, %v3127_v7  ;;  %v2621_v31 = vpop.f32.mrb[47].mxu1 }
 0xb77   :  { %v1623_v32 = vpop.f32.mrb[48].mxu1 }
 0xb78   :  { %v1624_v33 = vadd.f32 %v2316_v8, %v1623_v32  ;;  %v2636_v34 = vpop.f32.mrb[49].mxu1 }
 0xb79   :  { %v1626_v35 = vpop.f32.mrb[50].mxu1 }
 0xb7a   :  { %v2372_v4 = vpack.c.bf16 %v1624_v33, %v1624_v33  ;;  %v1627_v37 = vadd.f32 %v2316_v8, %v1626_v35  ;;  %v2637_v38 = vpop.f32.mrb[51].mxu1 }
 0xb7b   :  { %v2339_v38 = vld [vmem:[%s3334_s10] ss:$0 sm:$0xff] }
 0xb7c   :  { %v1712_v39 = vsel %vm283_vm2, %v2372_v4, 0  ;;  %v2373_v7 = vpack.c.bf16 %v1627_v37, %v1627_v37 }
 0xb7d   :  { %2647 = vmatpush3.bf16.xpose.msra.mxu1 %v1712_v39 }
 0xb7e   :  { %v1758_v25 = vsel %vm283_vm2, %v2373_v7, 0  ;;  %2658 = vmatprep.subr.bf16.mxu1 %v2793_v1 }
 0xb7f   :  { %2653 = vmatpush3.bf16.xpose.msra.mxu0 %v1758_v25 }
 0xb80   :  { %2664 = vmatprep.subr.bf16.mxu0 %v2793_v1 }
 0xb84   :  { %2649 = vmatmul.mubr.msk.bf16.vlgmr.msra.gmra.mrb[52].mxu1 %vm283_vm2, %v2370_v26 }
 0xb85   :  { %2660 = vmatprep.mubr.msk.bf16.mxu1 %vm2794_vm0, %v2793_v1  ;;  %2659 = vmatpush3.bf16.msra.mxu1 %v1828_v51 }
 0xb86   :  { %2655 = vmatmul.mubr.msk.bf16.vlgmr.msra.gmra.mrb[56].mxu0 %vm283_vm2, %v2371_v41  ;;  %2670 = vmatprep.subr.bf16.mxu1 %v2793_v1  ;;  %v2767_v41 = vld [vmem:[%s3347_s24] sm:$0xff] }
 0xb87   :  { %2666 = vmatprep.mubr.msk.bf16.mxu0 %vm2794_vm0, %v2793_v1  ;;  %2665 = vmatpush3.bf16.msra.mxu0 %v1874_v53 }
 0xb88   :  { %2676 = vmatprep.subr.bf16.mxu0 %v2793_v1 }
 0xc57   :  { %v1748_v54 = vpop.f32.mrb[52].mxu1 }
 0xc58   :  { %v1749_v55 = vadd.f32 %v1748_v54, %v2972_v46  ;;  %v2650_v56 = vpop.f32.mrb[53].mxu1 }
 0xc59   :  { %v1751_v57 = vpop.f32.mrb[54].mxu1  ;;  %v1794_v58 = vpop.f32.mrb[56].mxu0 }
 0xc5a   :  { %v1795_v59 = vadd.f32 %v1794_v58, %v2972_v46  ;;  %v2651_v60 = vpop.f32.mrb[55].mxu1  ;;  %v2656_v61 = vpop.f32.mrb[57].mxu0  ;;  %v1800_v62 = vsel %vm283_vm2, %v1749_v55, -inf  ;;  %v2725_v57 = vld [vmem:[%s3337_s13] sm:$0xff]   ;;  %v2726_v58 = vld [vmem:[%s3337_s13 + $0x8] sm:$0xff]  }
 0xc5b   :  { %1801 = vmax.xlane.f32.xlu0 %v1800_v62  ;;  %v1797_v63 = vpop.f32.mrb[58].mxu0  ;;  %v2728_v60 = vld [vmem:[%s3339_s15 + $0x8] sm:$0xff]  }
 0xc5c   :  { %v2657_v0 = vpop.f32.mrb[59].mxu0  ;;  %v1803_v2 = vsel %vm283_vm2, %v1795_v59, -inf }
 0xc5d   :  { %1804 = vmax.xlane.f32.xlu1 %v1803_v2 }
 0xce8   :  { %v1802_v3 = vpop.xlane.xlu0 %1801 }
 0xce9   :  { %v1806_v5 = vsub.f32 %v1749_v55, %v1802_v3 }
 0xcea   :  { %v1805_v6 = vpop.xlane.xlu1 %1804 }
 0xceb   :  { %v1808_v9 = vmul.f32 1.442695, %v1806_v5  ;;  %v1807_v11 = vsub.f32 %v1795_v59, %v1805_v6  ;;  %v2727_v59 = vld [vmem:[%s3339_s15] sm:$0xff]  }
 0xcec   :  { %v2340_v6 = vld [vmem:[%s3335_s11] ss:$0 sm:$0xff] }
 0xced   :  { %2755 = vpow2.f32 %v1808_v9  ;;  %v1810_v12 = vmul.f32 1.442695, %v1807_v11 }
 0xcef   :  { %2757 = vpow2.f32 %v1810_v12 }
 0xcf7   :  { %v2756_v13 = vpop.eup %2755 }
 0xcf8   :  { %v1812_v46 = vsel %vm283_vm2, %v2756_v13, 0.0 }
 0xcf9   :  { %v2758_v14 = vpop.eup %2757  ;;  %1813 = vadd.xlane.f32.xlu0 %v1812_v46  ;;  %v2341_v46 = vld [vmem:[%s3336_s12] ss:$0 sm:$0xff] }
 0xcfa   :  { %v1815_v15 = vsel %vm283_vm2, %v2758_v14, 0.0 }
 0xcfb   :  { %1816 = vadd.xlane.f32.xlu1 %v1815_v15 }
 0xd86   :  { %v1814_v16 = vpop.xlane.xlu0 %1813 }
 0xd87   :  { %2759 = vrcp.f32 %v1814_v16 }
 0xd88   :  { %v1817_v10 = vpop.xlane.xlu1 %1816 }
 0xd89   :  { %2761 = vrcp.f32 %v1817_v10 }
 0xd91   :  { %v2760_v17 = vpop.eup %2759 }
 0xd92   :  { %v1820_v19 = vmul.f32 %v2760_v17, %v2756_v13  ;;  %v2729_v17 = vld [vmem:[%s3339_s15 + $0x10] sm:$0xff]   ;;  %s2795_s15 = smov [#allocation2]  }
 0xd93   :  { %v2762_v20 = vpop.eup %2761 }
 0xd94   :  { %v1821_v22 = vmul.f32 %v2762_v20, %v2758_v14  ;;  %v1822_v23 = vpack.c.bf16 %v1820_v19, %v1820_v19  ;;  %v2342_v19 = vld [vmem:[%s3338_s14] ss:$0 sm:$0xff]  ;;  %s2188_s14 = sshll.u32 %s2795_s15, 4  ;;  %s2189_s14 = int_to_ptr.vmem [resolvable:$true] %s2188_s14 }
 0xd95   :  { %s2769_s1 = scalar_lea.vmem %s2189_s14, 256  ;;  %p2774_p1 = scmp.lt.s32.totalorder %s2189_s14, %s2189_s14 }
 0xd96   :  { %2661 = vmatmul.mubr.msk.bf16.vlgmr.msra.gmra.mrb[56].mxu1 %vm283_vm2, %v1822_v23  ;;  %v1823_v28 = vpack.c.bf16 %v1821_v22, %v1821_v22  ;;  %p2770_p0 = scmp.ne.s32.totalorder %s2189_s14, %s2769_s1  ;;  %p2775_p2 = scmp.lt.s32.totalorder %s2769_s1, %s2769_s1 }
 0xd97   :  { %2671 = vmatpush3.bf16.msra.mxu1 %v1923_v24  ;;  %2672 = vmatprep.mubr.msk.bf16.mxu1 %vm2794_vm0, %v2793_v1 }
 0xd98   :  { %2667 = vmatmul.mubr.msk.bf16.vlgmr.msra.gmra.mrb[60].mxu0 %vm283_vm2, %v1823_v28  ;;  %2684 = vmatprep.subr.bf16.mxu1 %v2793_v1  ;;  %p2776_p3 = por %p2775_p2, %p2774_p1 }
 0xd99   :  { %2680 = vmatprep.mubr.msk.bf16.mxu0 %vm2794_vm0, %v2793_v1  ;;  %2677 = vmatpush3.bf16.msra.mxu0 %v2725_v57 }
 0xd9a   :  { %2678 = vmatprep.subr.bf16.mxu0 %v2793_v1  ;;  %p2777_p4 = pnand %p2776_p3, %p2770_p0 }
 0xd9d   :  { %2679 = vmatpush3.bf16.msra.mxu0 %v2726_v58 }
 0xe69   :  { %v1864_v29 = vpop.f32.mrb[56].mxu1 }
 0xe6a   :  { %v2662_v31 = vpop.f32.mrb[57].mxu1 }
 0xe6b   :  { %v1867_v8 = vpop.f32.mrb[58].mxu1  ;;  %v1910_v32 = vpop.f32.mrb[60].mxu0 }
 0xe6c   :  { %v1916_v33 = vpack.c.bf16 %v1910_v32, %v1864_v29  ;;  %v2663_v34 = vpop.f32.mrb[59].mxu1  ;;  %v2668_v35 = vpop.f32.mrb[61].mxu0 }
 0xe6d   :  { %v1913_v36 = vpop.f32.mrb[62].mxu0 }
 0xe6e   :  { %v2669_v4 = vpop.f32.mrb[63].mxu0  ;;  %2673 = vmatmul.mubr.msk.bf16.vlgmr.msra.gmra.mrb[60].mxu1 %vm283_vm2, %v1916_v33 }
 0xe6f   :  { %2692 = vmatprep.mubr.msk.bf16.mxu1 %vm2794_vm0, %v2793_v1  ;;  %2685 = vmatpush3.bf16.msra.mxu1 %v2727_v59 }
 0xe70   :  { %2686 = vmatprep.subr.bf16.mxu1 %v2793_v1 }
 0xe73   :  { %2687 = vmatpush3.bf16.msra.mxu1 %v2728_v60 }
 0xe74   :  { %2688 = vmatprep.subr.bf16.mxu1 %v2793_v1 }
 0xe77   :  { %2689 = vmatpush3.bf16.msra.mxu1 %v2729_v17 }
 0xe78   :  { %2690 = vmatprep.subr.bf16.mxu1 %v2793_v1  ;;  %v2346_v1 = vld [vmem:[%s3340_s16] ss:$0 sm:$0xff] }
 0xe7b   :  { %2691 = vmatpush3.bf16.msra.mxu1 %v2730_v18 }
 0xf41   :  { %v1959_v37 = vpop.f32.mrb[60].mxu1 }
 0xf42   :  { %v1966_v39 = vadd.f32 %v1959_v37, %v3202_v27  ;;  %v2674_v7 = vpop.f32.mrb[61].mxu1 }
 0xf43   :  { %v1962_v21 = vpop.f32.mrb[62].mxu1 }
 0xf44   :  { %v1975_v25 = vadd.f32 %v2339_v38, %v1966_v39  ;;  %v1967_v26 = vadd.f32 %v1962_v21, %v3205_v30  ;;  %v2675_v40 = vpop.f32.mrb[63].mxu1 }
 0xf46   :  { %v3258_v42 = vadd.f32 %v2767_v41, %v1975_v25  ;;  %v1976_v43 = vadd.f32 %v2339_v38, %v1967_v26 }
 0xf48   :  { %v3263_v45 = vadd.f32 %v2768_v44, %v1976_v43  ;;  %v1979_v27 = vsel %vm89_vm1, %v3258_v42, 0.0 }
 0xf49   :  { %1980 = vadd.xlane.f32.xlu0 %v1979_v27 }
 0xf4a   :  { %v1982_v30 = vsel %vm89_vm1, %v3263_v45, 0.0 }
 0xf4b   :  { %1983 = vadd.xlane.f32.xlu1 %v1982_v30 }
 0xfd6   :  { %v1981_v47 = vpop.xlane.xlu0 %1980 }
 0xfd7   :  { %v1986_v48 = vmul.f32 0.03125, %v1981_v47 }
 0xfd8   :  { %v1984_v49 = vpop.xlane.xlu1 %1983 }
 0xfd9   :  { %v1988_v50 = vsub.f32 %v3258_v42, %v1986_v48  ;;  %v1987_v51 = vmul.f32 0.03125, %v1984_v49 }
 0xfdb   :  { %v1989_v52 = vsub.f32 %v3263_v45, %v1987_v51  ;;  %v1990_v53 = vmul.f32 %v1988_v50, %v1988_v50 }
 0xfdd   :  { %v1992_v54 = vsel %vm89_vm1, %v1990_v53, 0.0  ;;  %v1991_v55 = vmul.f32 %v1989_v52, %v1989_v52 }
 0xfde   :  { %1993 = vadd.xlane.f32.xlu0 %v1992_v54 }
 0xfdf   :  { %v1995_v56 = vsel %vm89_vm1, %v1991_v55, 0.0 }
 0xfe0   :  { %1996 = vadd.xlane.f32.xlu1 %v1995_v56 }
0x106b   :  { %v1994_v61 = vpop.xlane.xlu0 %1993 }
0x106c   :  { %v1998_v62 = vmul.f32 0.03125, %v1994_v61 }
0x106d   :  { %v1997_v63 = vpop.xlane.xlu1 %1996 }
0x106e   :  { %v2000_v0 = vadd.f32 1e-06, %v1998_v62  ;;  %v1999_v2 = vmul.f32 0.03125, %v1997_v63 }
0x1070   :  { %2763 = vrsqrt.f32 %v2000_v0  ;;  %v2001_v3 = vadd.f32 1e-06, %v1999_v2 }
0x1072   :  { %2765 = vrsqrt.f32 %v2001_v3 }
0x107a   :  { %v2764_v5 = vpop.eup %2763 }
0x107b   :  { %v2004_v9 = vmul.f32 %v2764_v5, %v1988_v50 }
0x107c   :  { %v2766_v11 = vpop.eup %2765 }
0x107d   :  { %v2013_v12 = vmul.f32 %v2340_v6, %v2004_v9  ;;  %v2005_v13 = vmul.f32 %v2766_v11, %v1989_v52 }
0x107f   :  { %v2014_v14 = vmul.f32 %v2340_v6, %v2005_v13  ;;  %v2022_v15 = vadd.f32 %v2341_v46, %v2013_v12 }
0x1081   :  { %v2023_v16 = vadd.f32 %v2341_v46, %v2014_v14 }
0x1083   :  { %v2024_v10 = vpack.c.bf16 %v2023_v16, %v2022_v15 }
0x1085   :  { %2681 = vmatmul.mubr.msk.bf16.vlgmr.msra.gmra.mrb[64].mxu0 %vm89_vm1, %v2024_v10 }
0x1158   :  { %v2085_v20 = vpop.f32.mrb[64].mxu0 }
0x1159   :  { %v2086_v22 = vadd.f32 %v2342_v19, %v2085_v20  ;;  %v2682_v23 = vpop.f32.mrb[65].mxu0 }
0x115a   :  { %v2088_v24 = vpop.f32.mrb[66].mxu0 }
0x115b   :  { %v2089_v28 = vadd.f32 %v2342_v19, %v2088_v24  ;;  %v2683_v29 = vpop.f32.mrb[67].mxu0  ;;  %v2092_v31 = vmax.f32 %v2086_v22, 0.0 }
0x115d   :  { %v2093_v8 = vmax.f32 %v2089_v28, 0.0 }
0x115f   :  { %v2094_v32 = vpack.c.bf16 %v2093_v8, %v2092_v31 }
0x1161   :  { %2693 = vmatmul.mubr.msk.bf16.vlgmr.msra.gmra.mrb[64].mxu1 %vm2134_vm4, %v2094_v32 }
0x1234   :  { %v2172_v33 = vpop.f32.mrb[64].mxu1 }
0x1235   :  { %v2173_v34 = vadd.f32 %v2346_v1, %v2172_v33  ;;  %v2694_v35 = vpop.f32.mrb[65].mxu1 }
0x1236   :  { %v2175_v36 = vpop.f32.mrb[66].mxu1 }
0x1237   :  { %v2179_v4 = vadd.f32 %v2173_v34, %v3258_v42  ;;  %v2176_v37 = vadd.f32 %v2346_v1, %v2175_v36  ;;  %v2695_v38 = vpop.f32.mrb[67].mxu1 }
0x1239   :  { %2181 = vst.msk [vmem:[#allocation2] sm:$0xff] %vm89_vm1, %v2179_v4  ;;  %v2180_v39 = vadd.f32 %v2176_v37, %v3263_v45 }
0x123b   :  { %2182 = vst.msk [vmem:[#allocation2 + $0x8] sm:$0xff] %vm89_vm1, %v2180_v39 }
0x123c   :  { %2780 = shalt.err (!%p2777_p4)
}
0x123d   :  { %s2781_s20 = scalar_lea.hbm %s3341_s17, 256 }
0x123e   :  { %p2782_p5 = scmp.ne.s32.totalorder %s3341_s17, %s2781_s20  ;;  %p2785_p6 = scmp.lt.u32.totalorder %s2781_s20, %s3341_s17 }
0x1240   :  { %p2787_p7 = pnand %p2785_p6, %p2782_p5 }
0x1242   :  { %2790 = shalt.err (!%p2787_p7)
}
0x1243   :  { %s2796_s10 = smov 128   ;;  %s2797_s24 = smov 8  }
0x1244   :  { %2194 = dma.vmem_to_hbm [thread:$0]  %s2189_s14, 256, %s3341_s17, [#allocation3], %s2796_s10, %s2796_s10, %s2797_s24  }
0x1245   :  { %2791 = dma.done.wait [#allocation3], 256  }
0x1246   :  { %2792 = vsyncadd [#allocation3], 4294967040 }
0x1247   :  { %2198 = vsyncpa [#allocation3], 1 }

</bundles_post_ra>
